<compile_context>
chip_gen: v5e
topology: v5e:2x2
jax: 0.10.0
libtpu: 0.0.40
codegen_flags: <defaults>
</compile_context>

<pallas_src>
import functools

import jax
import jax.numpy as jnp
from jax.experimental import pallas as pl
from jax.experimental.pallas import tpu as pltpu


# ----------------------------------------------------------------------------
# Fused Pallas kernel: dwconv+BN -> 1x1 -> multi-head attention -> 1x1 out
# ----------------------------------------------------------------------------
def _fused_attention_kernel(
    xp_ref,      # (1, Hp, Wp, C)      zero-padded NHWC input (q path)
    xph_ref,     # (1, s*s*Hs, Ws, C)  phase-decomposed padded input (kv path)
    qdw_w_ref,   # (K*K, C)  f32       q depthwise weights, tap-major
    kvdw_w_ref,  # (K*K, C)  f32       kv depthwise weights, tap-major
    qw_ref,      # (C, inner)   bf16   q 1x1 weights (BN + att_scale folded)
    qb_ref,      # (1, inner)   f32    folded q bias
    kvw_ref,     # (C, 2*inner) bf16   kv 1x1 weights (BN folded)
    kvb_ref,     # (1, 2*inner) f32    folded kv bias
    ow_ref,      # (inner, dim) bf16   output 1x1 weights
    ob_ref,      # (1, dim)     f32    output 1x1 bias
    o_ref,       # (1, dim, Nq) f32    output, channel-major (lane-dense Nq)
    *, K, H, W, Ho, Wo, stride, Hs, heads, dim_head):
    C = xp_ref.shape[-1]
    inner = heads * dim_head
    Nq, Nk = H * W, Ho * Wo

    # ---- q path: stride-1 depthwise conv, f32 accumulation on the VPU ------
    q_acc = xp_ref[0, 0:H, 0:W, :] * qdw_w_ref[0, :]
    for t in range(1, K * K):
        ki, kj = t // K, t % K
        q_acc = q_acc + xp_ref[0, ki:ki + H, kj:kj + W, :] * qdw_w_ref[t, :]

    # ---- kv path: strided depthwise conv via phase-decomposed input --------
    # Only the kept (strided) output positions are computed; every tap is a
    # plain contiguous slice of the phase-split padded input.
    kv_acc = None
    for t in range(K * K):
        ki, kj = t // K, t % K
        r0 = ((ki % stride) * stride + (kj % stride)) * Hs + ki // stride
        c0 = kj // stride
        term = xph_ref[0, r0:r0 + Ho, c0:c0 + Wo, :] * kvdw_w_ref[t, :]
        kv_acc = term if kv_acc is None else kv_acc + term

    # ---- 1x1 projections (BN affine + attention scale folded into W/b) -----
    q = jnp.dot(q_acc.reshape(Nq, C).astype(jnp.bfloat16), qw_ref[...],
                preferred_element_type=jnp.float32) + qb_ref[...]   # (Nq, inner)
    kv = jnp.dot(kv_acc.reshape(Nk, C).astype(jnp.bfloat16), kvw_ref[...],
                 preferred_element_type=jnp.float32) + kvb_ref[...]  # (Nk, 2*inner)

    # ---- attention: all heads of this batch element in one grid step -------
    # The inner->dim output projection is accumulated per head so the
    # head-split attention output never leaves VMEM.
    proj = None
    for h in range(heads):
        lo = h * dim_head
        qh = q[:, lo:lo + dim_head].astype(jnp.bfloat16)                 # (Nq, d)
        kh = kv[:, lo:lo + dim_head].astype(jnp.bfloat16)                # (Nk, d)
        vh = kv[:, inner + lo:inner + lo + dim_head].astype(jnp.bfloat16)
        dots = jax.lax.dot_general(qh, kh, (((1,), (1,)), ((), ())),
                                   preferred_element_type=jnp.float32)  # (Nq, Nk)
        m = jnp.max(dots, axis=-1, keepdims=True)
        p = jnp.exp(dots - m)
        inv = pl.reciprocal(jnp.sum(p, axis=-1, keepdims=True), approx=True)
        oh = jnp.dot((p * inv).astype(jnp.bfloat16), vh,
                     preferred_element_type=jnp.float32)                 # (Nq, d)
        ph = jnp.dot(oh.astype(jnp.bfloat16), ow_ref[lo:lo + dim_head, :],
                     preferred_element_type=jnp.float32)                 # (Nq, dim)
        proj = ph if proj is None else proj + ph

    out = proj + ob_ref[...]                                             # (Nq, dim)
    o_ref[0] = jnp.transpose(out)                                        # (dim, Nq)


# ----------------------------------------------------------------------------
# Forward pass (single fused pallas_call per forward)
# ----------------------------------------------------------------------------
@functools.partial(jax.jit, static_argnames=("proj_kernel", "kv_proj_stride",
                                             "heads", "dim_head"))
def attention_forward(params, x_nchw, *, proj_kernel, kv_proj_stride, heads,
                      dim_head):
    B, C, H, W = x_nchw.shape
    K, s = proj_kernel, kv_proj_stride
    inner = heads * dim_head
    pad = K // 2
    eps = 1e-5
    att_scale = dim_head ** -0.5

    # NCHW -> NHWC, zero pad ('same' padding for both depthwise convs).
    x = jnp.transpose(x_nchw, (0, 2, 3, 1)).astype(jnp.float32)
    xp = jnp.pad(x, ((0, 0), (pad, pad), (pad, pad), (0, 0)))
    Hp, Wp = H + 2 * pad, W + 2 * pad
    Ho, Wo = (Hp - K) // s + 1, (Wp - K) // s + 1
    Nq = H * W

    # Phase-decompose the padded input so the strided kv depthwise conv only
    # computes kept output positions (no 4x stride waste, contiguous slices).
    Hp2, Wp2 = -(-Hp // s) * s, -(-Wp // s) * s
    xp2 = jnp.pad(xp, ((0, 0), (0, Hp2 - Hp), (0, Wp2 - Wp), (0, 0)))
    Hs, Ws = Hp2 // s, Wp2 // s
    xph = xp2.reshape(B, Hs, s, Ws, s, C).transpose(0, 2, 4, 1, 3, 5)
    xph = xph.reshape(B, s * s * Hs, Ws, C)

    # TODO(synk): BatchNorm2d is evaluated in inference (eval) mode — running
    # stats folded into a per-channel affine, which is then folded into the
    # following 1x1 conv: (y*sc + sh) @ W == y @ (sc[:,None]*W) + (sh @ W).
    q_sc = params["q_bn_gamma"] / jnp.sqrt(params["q_bn_var"] + eps)
    q_sh = params["q_bn_beta"] - params["q_bn_mean"] * q_sc
    kv_sc = params["kv_bn_gamma"] / jnp.sqrt(params["kv_bn_var"] + eps)
    kv_sh = params["kv_bn_beta"] - params["kv_bn_mean"] * kv_sc

    # The attention scale is linear in q, so fold it into the q projection too.
    q_w = ((q_sc[:, None] * params["q_pw_w"]) * att_scale).astype(jnp.bfloat16)
    q_b = ((q_sh @ params["q_pw_w"]) * att_scale)[None, :].astype(jnp.float32)
    kv_w = (kv_sc[:, None] * params["kv_pw_w"]).astype(jnp.bfloat16)
    kv_b = (kv_sh @ params["kv_pw_w"])[None, :].astype(jnp.float32)
    out_w = params["out_w"].astype(jnp.bfloat16)
    out_b = params["out_b"]

    kernel = functools.partial(
        _fused_attention_kernel, K=K, H=H, W=W, Ho=Ho, Wo=Wo, stride=s, Hs=Hs,
        heads=heads, dim_head=dim_head)

    out = pl.pallas_call(
        kernel,
        out_shape=jax.ShapeDtypeStruct((B, C, Nq), jnp.float32),
        grid=(B,),
        in_specs=[
            pl.BlockSpec((1, Hp, Wp, C), lambda b: (b, 0, 0, 0)),
            pl.BlockSpec((1, s * s * Hs, Ws, C), lambda b: (b, 0, 0, 0)),
            pl.BlockSpec((K * K, C), lambda b: (0, 0)),
            pl.BlockSpec((K * K, C), lambda b: (0, 0)),
            pl.BlockSpec((C, inner), lambda b: (0, 0)),
            pl.BlockSpec((1, inner), lambda b: (0, 0)),
            pl.BlockSpec((C, 2 * inner), lambda b: (0, 0)),
            pl.BlockSpec((1, 2 * inner), lambda b: (0, 0)),
            pl.BlockSpec((inner, C), lambda b: (0, 0)),
            pl.BlockSpec((1, C), lambda b: (0, 0)),
        ],
        out_specs=pl.BlockSpec((1, C, Nq), lambda b: (b, 0, 0)),
        compiler_params=pltpu.CompilerParams(
            dimension_semantics=("parallel",)),
    )(xp, xph,
      params["q_dw_w"].reshape(K * K, C), params["kv_dw_w"].reshape(K * K, C),
      q_w, q_b, kv_w, kv_b, out_w, out_b)

    # (B, dim, x*y) -> (B, dim, x, y): free reshape, no transpose needed.
    # nn.Dropout(p=0.0) -> identity.
    return out.reshape(B, C, H, W)


# ----------------------------------------------------------------------------
# Parameters (deterministic, synthetic)
# ----------------------------------------------------------------------------
def init_params(key, dim, proj_kernel, heads, dim_head):
    inner = heads * dim_head
    ks = jax.random.split(key, 14)

    def nrm(k, shape, s=0.1):
        return jax.random.normal(k, shape, jnp.float32) * s

    return dict(
        # to_q: depthwise conv (bias=False) + BN + 1x1 conv (bias=False)
        q_dw_w=nrm(ks[0], (proj_kernel, proj_kernel, dim)),
        q_bn_gamma=1.0 + nrm(ks[1], (dim,)),
        q_bn_beta=nrm(ks[2], (dim,)),
        q_bn_mean=nrm(ks[3], (dim,)),
        q_bn_var=jnp.abs(nrm(ks[4], (dim,))) + 1.0,
        q_pw_w=nrm(ks[5], (dim, inner)),
        # to_kv
        kv_dw_w=nrm(ks[6], (proj_kernel, proj_kernel, dim)),
        kv_bn_gamma=1.0 + nrm(ks[7], (dim,)),
        kv_bn_beta=nrm(ks[8], (dim,)),
        kv_bn_mean=nrm(ks[9], (dim,)),
        kv_bn_var=jnp.abs(nrm(ks[10], (dim,))) + 1.0,
        kv_pw_w=nrm(ks[11], (dim, 2 * inner)),
        # to_out: 1x1 conv (with bias)
        out_w=nrm(ks[12], (inner, dim)),
        out_b=nrm(ks[13], (1, dim)),
    )


# ----------------------------------------------------------------------------
# Pure-JAX reference (for correctness check)
# ----------------------------------------------------------------------------
def reference_forward(params, x_nchw, *, proj_kernel, kv_proj_stride, heads, dim_head):
    B, C, H, W = x_nchw.shape
    inner = heads * dim_head
    pad = proj_kernel // 2
    eps = 1e-5
    x = jnp.transpose(x_nchw, (0, 2, 3, 1)).astype(jnp.float32)

    def dwbn(x, w_kkc, gamma, beta, mean, var, stride):
        w = w_kkc[:, :, None, :]                                         # HWIO, I=1
        y = jax.lax.conv_general_dilated(
            x, w, window_strides=(stride, stride),
            padding=[(pad, pad), (pad, pad)],
            dimension_numbers=("NHWC", "HWIO", "NHWC"),
            feature_group_count=C)
        sc = gamma / jnp.sqrt(var + eps)
        return y * sc + (beta - mean * sc)

    q_dw = dwbn(x, params["q_dw_w"], params["q_bn_gamma"], params["q_bn_beta"],
                params["q_bn_mean"], params["q_bn_var"], 1)
    kv_dw = dwbn(x, params["kv_dw_w"], params["kv_bn_gamma"], params["kv_bn_beta"],
                 params["kv_bn_mean"], params["kv_bn_var"], kv_proj_stride)
    Ho, Wo = kv_dw.shape[1], kv_dw.shape[2]
    q = q_dw.reshape(B, H * W, C) @ params["q_pw_w"]
    kv = kv_dw.reshape(B, Ho * Wo, C) @ params["kv_pw_w"]
    k_, v_ = kv[..., :inner], kv[..., inner:]

    def hd(t):
        b, n, _ = t.shape
        return jnp.transpose(
            t.reshape(b, n, heads, dim_head), (0, 2, 1, 3)
        ).reshape(b * heads, n, dim_head)

    qh, kh, vh = hd(q), hd(k_), hd(v_)
    dots = jnp.einsum("bid,bjd->bij", qh, kh) * (dim_head ** -0.5)
    attn = jax.nn.softmax(dots, axis=-1)
    oh = jnp.einsum("bij,bjd->bid", attn, vh)
    o = jnp.transpose(
        oh.reshape(B, heads, H * W, dim_head), (0, 2, 1, 3)
    ).reshape(B, H * W, inner)
    out = o @ params["out_w"] + params["out_b"][0]
    return jnp.transpose(out.reshape(B, H, W, C), (0, 3, 1, 2))


# ----------------------------------------------------------------------------
if __name__ == "__main__":
    dim, heads, dim_head = 32, 2, 16
    proj_kernel, kv_proj_stride = 3, 2
    B, H, W = 2, 16, 16

    key = jax.random.PRNGKey(0)
    kx, kp = jax.random.split(key)
    x = jax.random.normal(kx, (B, dim, H, W), jnp.float32)
    params = init_params(kp, dim, proj_kernel, heads, dim_head)

    out = attention_forward(params, x, proj_kernel=proj_kernel,
                            kv_proj_stride=kv_proj_stride,
                            heads=heads, dim_head=dim_head)
    out = jax.block_until_ready(out)

    ref = reference_forward(params, x, proj_kernel=proj_kernel,
                            kv_proj_stride=kv_proj_stride,
                            heads=heads, dim_head=dim_head)
    assert out.shape == (B, dim, H, W), out.shape
    # bf16 MXU operands (f32 accumulation) -> compare at loosened tolerance.
    err = float(jnp.max(jnp.abs(out - ref)))
    assert jnp.allclose(out, ref, rtol=2e-2, atol=2e-2), err
    print("KERNEL_OK")
</pallas_src>

<mosaic_0001>
module attributes {stable_mosaic.version = 11 : i64} {
  func.func @_fused_attention_kernel(%arg0: i32, %arg1: memref<1x18x18x32xf32, #tpu.memory_space<vmem>>, %arg2: memref<1x36x9x32xf32, #tpu.memory_space<vmem>>, %arg3: memref<9x32xf32, #tpu.memory_space<vmem>>, %arg4: memref<9x32xf32, #tpu.memory_space<vmem>>, %arg5: memref<32x32xbf16, #tpu.memory_space<vmem>>, %arg6: memref<1x32xf32, #tpu.memory_space<vmem>>, %arg7: memref<32x64xbf16, #tpu.memory_space<vmem>>, %arg8: memref<1x64xf32, #tpu.memory_space<vmem>>, %arg9: memref<32x32xbf16, #tpu.memory_space<vmem>>, %arg10: memref<1x32xf32, #tpu.memory_space<vmem>>, %arg11: memref<1x32x256xf32, #tpu.memory_space<vmem>>) attributes {dimension_semantics = [#tpu.dimension_semantics<parallel>], iteration_bounds = array<i64: 2>, scalar_prefetch = 0 : i64, scratch_operands = 0 : i64, tpu.core_type = #tpu.core_type<tc>, window_params = [{transform_indices = @transform_0, window_bounds = array<i64: 1, 18, 18, 32>}, {transform_indices = @transform_1, window_bounds = array<i64: 1, 36, 9, 32>}, {pipeline_mode = #tpu.pipeline_mode<synchronous>, transform_indices = @transform_2, window_bounds = array<i64: 9, 32>}, {pipeline_mode = #tpu.pipeline_mode<synchronous>, transform_indices = @transform_3, window_bounds = array<i64: 9, 32>}, {pipeline_mode = #tpu.pipeline_mode<synchronous>, transform_indices = @transform_4, window_bounds = array<i64: 32, 32>}, {pipeline_mode = #tpu.pipeline_mode<synchronous>, transform_indices = @transform_5, window_bounds = array<i64: 1, 32>}, {pipeline_mode = #tpu.pipeline_mode<synchronous>, transform_indices = @transform_6, window_bounds = array<i64: 32, 64>}, {pipeline_mode = #tpu.pipeline_mode<synchronous>, transform_indices = @transform_7, window_bounds = array<i64: 1, 64>}, {pipeline_mode = #tpu.pipeline_mode<synchronous>, transform_indices = @transform_8, window_bounds = array<i64: 32, 32>}, {pipeline_mode = #tpu.pipeline_mode<synchronous>, transform_indices = @transform_9, window_bounds = array<i64: 1, 32>}, {transform_indices = @transform_10, window_bounds = array<i64: 1, 32, 256>}]} {
    %c0 = arith.constant 0 : index
    %c0_0 = arith.constant 0 : index
    %c0_1 = arith.constant 0 : index
    %c0_2 = arith.constant 0 : index
    %0 = vector.load %arg1[%c0, %c0_0, %c0_1, %c0_2] : memref<1x18x18x32xf32, #tpu.memory_space<vmem>>, vector<1x16x16x32xf32>
    %1 = vector.shape_cast %0 : vector<1x16x16x32xf32> to vector<16x16x32xf32>
    %c0_3 = arith.constant 0 : index
    %c0_4 = arith.constant 0 : index
    %2 = vector.load %arg3[%c0_3, %c0_4] : memref<9x32xf32, #tpu.memory_space<vmem>>, vector<1x32xf32>
    %3 = vector.shape_cast %2 : vector<1x32xf32> to vector<32xf32>
    %4 = vector.shape_cast %3 : vector<32xf32> to vector<1x1x32xf32>
    %5 = vector.broadcast %4 : vector<1x1x32xf32> to vector<16x16x32xf32>
    %6 = arith.mulf %1, %5 : vector<16x16x32xf32>
    %c0_5 = arith.constant 0 : index
    %c0_6 = arith.constant 0 : index
    %c1 = arith.constant 1 : index
    %c0_7 = arith.constant 0 : index
    %7 = vector.load %arg1[%c0_5, %c0_6, %c1, %c0_7] : memref<1x18x18x32xf32, #tpu.memory_space<vmem>>, vector<1x16x16x32xf32>
    %8 = vector.shape_cast %7 : vector<1x16x16x32xf32> to vector<16x16x32xf32>
    %c1_8 = arith.constant 1 : index
    %c0_9 = arith.constant 0 : index
    %9 = vector.load %arg3[%c1_8, %c0_9] : memref<9x32xf32, #tpu.memory_space<vmem>>, vector<1x32xf32>
    %10 = vector.shape_cast %9 : vector<1x32xf32> to vector<32xf32>
    %11 = vector.shape_cast %10 : vector<32xf32> to vector<1x1x32xf32>
    %12 = vector.broadcast %11 : vector<1x1x32xf32> to vector<16x16x32xf32>
    %13 = arith.mulf %8, %12 : vector<16x16x32xf32>
    %14 = arith.addf %6, %13 : vector<16x16x32xf32>
    %c0_10 = arith.constant 0 : index
    %c0_11 = arith.constant 0 : index
    %c2 = arith.constant 2 : index
    %c0_12 = arith.constant 0 : index
    %15 = vector.load %arg1[%c0_10, %c0_11, %c2, %c0_12] : memref<1x18x18x32xf32, #tpu.memory_space<vmem>>, vector<1x16x16x32xf32>
    %16 = vector.shape_cast %15 : vector<1x16x16x32xf32> to vector<16x16x32xf32>
    %c2_13 = arith.constant 2 : index
    %c0_14 = arith.constant 0 : index
    %17 = vector.load %arg3[%c2_13, %c0_14] : memref<9x32xf32, #tpu.memory_space<vmem>>, vector<1x32xf32>
    %18 = vector.shape_cast %17 : vector<1x32xf32> to vector<32xf32>
    %19 = vector.shape_cast %18 : vector<32xf32> to vector<1x1x32xf32>
    %20 = vector.broadcast %19 : vector<1x1x32xf32> to vector<16x16x32xf32>
    %21 = arith.mulf %16, %20 : vector<16x16x32xf32>
    %22 = arith.addf %14, %21 : vector<16x16x32xf32>
    %c0_15 = arith.constant 0 : index
    %c1_16 = arith.constant 1 : index
    %c0_17 = arith.constant 0 : index
    %c0_18 = arith.constant 0 : index
    %23 = vector.load %arg1[%c0_15, %c1_16, %c0_17, %c0_18] : memref<1x18x18x32xf32, #tpu.memory_space<vmem>>, vector<1x16x16x32xf32>
    %24 = vector.shape_cast %23 : vector<1x16x16x32xf32> to vector<16x16x32xf32>
    %c3 = arith.constant 3 : index
    %c0_19 = arith.constant 0 : index
    %25 = vector.load %arg3[%c3, %c0_19] : memref<9x32xf32, #tpu.memory_space<vmem>>, vector<1x32xf32>
    %26 = vector.shape_cast %25 : vector<1x32xf32> to vector<32xf32>
    %27 = vector.shape_cast %26 : vector<32xf32> to vector<1x1x32xf32>
    %28 = vector.broadcast %27 : vector<1x1x32xf32> to vector<16x16x32xf32>
    %29 = arith.mulf %24, %28 : vector<16x16x32xf32>
    %30 = arith.addf %22, %29 : vector<16x16x32xf32>
    %c0_20 = arith.constant 0 : index
    %c1_21 = arith.constant 1 : index
    %c1_22 = arith.constant 1 : index
    %c0_23 = arith.constant 0 : index
    %31 = vector.load %arg1[%c0_20, %c1_21, %c1_22, %c0_23] : memref<1x18x18x32xf32, #tpu.memory_space<vmem>>, vector<1x16x16x32xf32>
    %32 = vector.shape_cast %31 : vector<1x16x16x32xf32> to vector<16x16x32xf32>
    %c4 = arith.constant 4 : index
    %c0_24 = arith.constant 0 : index
    %33 = vector.load %arg3[%c4, %c0_24] : memref<9x32xf32, #tpu.memory_space<vmem>>, vector<1x32xf32>
    %34 = vector.shape_cast %33 : vector<1x32xf32> to vector<32xf32>
    %35 = vector.shape_cast %34 : vector<32xf32> to vector<1x1x32xf32>
    %36 = vector.broadcast %35 : vector<1x1x32xf32> to vector<16x16x32xf32>
    %37 = arith.mulf %32, %36 : vector<16x16x32xf32>
    %38 = arith.addf %30, %37 : vector<16x16x32xf32>
    %c0_25 = arith.constant 0 : index
    %c1_26 = arith.constant 1 : index
    %c2_27 = arith.constant 2 : index
    %c0_28 = arith.constant 0 : index
    %39 = vector.load %arg1[%c0_25, %c1_26, %c2_27, %c0_28] : memref<1x18x18x32xf32, #tpu.memory_space<vmem>>, vector<1x16x16x32xf32>
    %40 = vector.shape_cast %39 : vector<1x16x16x32xf32> to vector<16x16x32xf32>
    %c5 = arith.constant 5 : index
    %c0_29 = arith.constant 0 : index
    %41 = vector.load %arg3[%c5, %c0_29] : memref<9x32xf32, #tpu.memory_space<vmem>>, vector<1x32xf32>
    %42 = vector.shape_cast %41 : vector<1x32xf32> to vector<32xf32>
    %43 = vector.shape_cast %42 : vector<32xf32> to vector<1x1x32xf32>
    %44 = vector.broadcast %43 : vector<1x1x32xf32> to vector<16x16x32xf32>
    %45 = arith.mulf %40, %44 : vector<16x16x32xf32>
    %46 = arith.addf %38, %45 : vector<16x16x32xf32>
    %c0_30 = arith.constant 0 : index
    %c2_31 = arith.constant 2 : index
    %c0_32 = arith.constant 0 : index
    %c0_33 = arith.constant 0 : index
    %47 = vector.load %arg1[%c0_30, %c2_31, %c0_32, %c0_33] : memref<1x18x18x32xf32, #tpu.memory_space<vmem>>, vector<1x16x16x32xf32>
    %48 = vector.shape_cast %47 : vector<1x16x16x32xf32> to vector<16x16x32xf32>
    %c6 = arith.constant 6 : index
    %c0_34 = arith.constant 0 : index
    %49 = vector.load %arg3[%c6, %c0_34] : memref<9x32xf32, #tpu.memory_space<vmem>>, vector<1x32xf32>
    %50 = vector.shape_cast %49 : vector<1x32xf32> to vector<32xf32>
    %51 = vector.shape_cast %50 : vector<32xf32> to vector<1x1x32xf32>
    %52 = vector.broadcast %51 : vector<1x1x32xf32> to vector<16x16x32xf32>
    %53 = arith.mulf %48, %52 : vector<16x16x32xf32>
    %54 = arith.addf %46, %53 : vector<16x16x32xf32>
    %c0_35 = arith.constant 0 : index
    %c2_36 = arith.constant 2 : index
    %c1_37 = arith.constant 1 : index
    %c0_38 = arith.constant 0 : index
    %55 = vector.load %arg1[%c0_35, %c2_36, %c1_37, %c0_38] : memref<1x18x18x32xf32, #tpu.memory_space<vmem>>, vector<1x16x16x32xf32>
    %56 = vector.shape_cast %55 : vector<1x16x16x32xf32> to vector<16x16x32xf32>
    %c7 = arith.constant 7 : index
    %c0_39 = arith.constant 0 : index
    %57 = vector.load %arg3[%c7, %c0_39] : memref<9x32xf32, #tpu.memory_space<vmem>>, vector<1x32xf32>
    %58 = vector.shape_cast %57 : vector<1x32xf32> to vector<32xf32>
    %59 = vector.shape_cast %58 : vector<32xf32> to vector<1x1x32xf32>
    %60 = vector.broadcast %59 : vector<1x1x32xf32> to vector<16x16x32xf32>
    %61 = arith.mulf %56, %60 : vector<16x16x32xf32>
    %62 = arith.addf %54, %61 : vector<16x16x32xf32>
    %c0_40 = arith.constant 0 : index
    %c2_41 = arith.constant 2 : index
    %c2_42 = arith.constant 2 : index
    %c0_43 = arith.constant 0 : index
    %63 = vector.load %arg1[%c0_40, %c2_41, %c2_42, %c0_43] : memref<1x18x18x32xf32, #tpu.memory_space<vmem>>, vector<1x16x16x32xf32>
    %64 = vector.shape_cast %63 : vector<1x16x16x32xf32> to vector<16x16x32xf32>
    %c8 = arith.constant 8 : index
    %c0_44 = arith.constant 0 : index
    %65 = vector.load %arg3[%c8, %c0_44] : memref<9x32xf32, #tpu.memory_space<vmem>>, vector<1x32xf32>
    %66 = vector.shape_cast %65 : vector<1x32xf32> to vector<32xf32>
    %67 = vector.shape_cast %66 : vector<32xf32> to vector<1x1x32xf32>
    %68 = vector.broadcast %67 : vector<1x1x32xf32> to vector<16x16x32xf32>
    %69 = arith.mulf %64, %68 : vector<16x16x32xf32>
    %70 = arith.addf %62, %69 : vector<16x16x32xf32>
    %c0_45 = arith.constant 0 : index
    %c0_46 = arith.constant 0 : index
    %c0_47 = arith.constant 0 : index
    %c0_48 = arith.constant 0 : index
    %71 = vector.load %arg2[%c0_45, %c0_46, %c0_47, %c0_48] : memref<1x36x9x32xf32, #tpu.memory_space<vmem>>, vector<1x8x8x32xf32>
    %72 = vector.shape_cast %71 : vector<1x8x8x32xf32> to vector<8x8x32xf32>
    %c0_49 = arith.constant 0 : index
    %c0_50 = arith.constant 0 : index
    %73 = vector.load %arg4[%c0_49, %c0_50] : memref<9x32xf32, #tpu.memory_space<vmem>>, vector<1x32xf32>
    %74 = vector.shape_cast %73 : vector<1x32xf32> to vector<32xf32>
    %75 = vector.shape_cast %74 : vector<32xf32> to vector<1x1x32xf32>
    %76 = vector.broadcast %75 : vector<1x1x32xf32> to vector<8x8x32xf32>
    %77 = arith.mulf %72, %76 : vector<8x8x32xf32>
    %c0_51 = arith.constant 0 : index
    %c9 = arith.constant 9 : index
    %c0_52 = arith.constant 0 : index
    %c0_53 = arith.constant 0 : index
    %78 = vector.load %arg2[%c0_51, %c9, %c0_52, %c0_53] : memref<1x36x9x32xf32, #tpu.memory_space<vmem>>, vector<1x8x8x32xf32>
    %79 = vector.shape_cast %78 : vector<1x8x8x32xf32> to vector<8x8x32xf32>
    %c1_54 = arith.constant 1 : index
    %c0_55 = arith.constant 0 : index
    %80 = vector.load %arg4[%c1_54, %c0_55] : memref<9x32xf32, #tpu.memory_space<vmem>>, vector<1x32xf32>
    %81 = vector.shape_cast %80 : vector<1x32xf32> to vector<32xf32>
    %82 = vector.shape_cast %81 : vector<32xf32> to vector<1x1x32xf32>
    %83 = vector.broadcast %82 : vector<1x1x32xf32> to vector<8x8x32xf32>
    %84 = arith.mulf %79, %83 : vector<8x8x32xf32>
    %85 = arith.addf %77, %84 : vector<8x8x32xf32>
    %c0_56 = arith.constant 0 : index
    %c0_57 = arith.constant 0 : index
    %c1_58 = arith.constant 1 : index
    %c0_59 = arith.constant 0 : index
    %86 = vector.load %arg2[%c0_56, %c0_57, %c1_58, %c0_59] : memref<1x36x9x32xf32, #tpu.memory_space<vmem>>, vector<1x8x8x32xf32>
    %87 = vector.shape_cast %86 : vector<1x8x8x32xf32> to vector<8x8x32xf32>
    %c2_60 = arith.constant 2 : index
    %c0_61 = arith.constant 0 : index
    %88 = vector.load %arg4[%c2_60, %c0_61] : memref<9x32xf32, #tpu.memory_space<vmem>>, vector<1x32xf32>
    %89 = vector.shape_cast %88 : vector<1x32xf32> to vector<32xf32>
    %90 = vector.shape_cast %89 : vector<32xf32> to vector<1x1x32xf32>
    %91 = vector.broadcast %90 : vector<1x1x32xf32> to vector<8x8x32xf32>
    %92 = arith.mulf %87, %91 : vector<8x8x32xf32>
    %93 = arith.addf %85, %92 : vector<8x8x32xf32>
    %c0_62 = arith.constant 0 : index
    %c18 = arith.constant 18 : index
    %c0_63 = arith.constant 0 : index
    %c0_64 = arith.constant 0 : index
    %94 = vector.load %arg2[%c0_62, %c18, %c0_63, %c0_64] : memref<1x36x9x32xf32, #tpu.memory_space<vmem>>, vector<1x8x8x32xf32>
    %95 = vector.shape_cast %94 : vector<1x8x8x32xf32> to vector<8x8x32xf32>
    %c3_65 = arith.constant 3 : index
    %c0_66 = arith.constant 0 : index
    %96 = vector.load %arg4[%c3_65, %c0_66] : memref<9x32xf32, #tpu.memory_space<vmem>>, vector<1x32xf32>
    %97 = vector.shape_cast %96 : vector<1x32xf32> to vector<32xf32>
    %98 = vector.shape_cast %97 : vector<32xf32> to vector<1x1x32xf32>
    %99 = vector.broadcast %98 : vector<1x1x32xf32> to vector<8x8x32xf32>
    %100 = arith.mulf %95, %99 : vector<8x8x32xf32>
    %101 = arith.addf %93, %100 : vector<8x8x32xf32>
    %c0_67 = arith.constant 0 : index
    %c27 = arith.constant 27 : index
    %c0_68 = arith.constant 0 : index
    %c0_69 = arith.constant 0 : index
    %102 = vector.load %arg2[%c0_67, %c27, %c0_68, %c0_69] : memref<1x36x9x32xf32, #tpu.memory_space<vmem>>, vector<1x8x8x32xf32>
    %103 = vector.shape_cast %102 : vector<1x8x8x32xf32> to vector<8x8x32xf32>
    %c4_70 = arith.constant 4 : index
    %c0_71 = arith.constant 0 : index
    %104 = vector.load %arg4[%c4_70, %c0_71] : memref<9x32xf32, #tpu.memory_space<vmem>>, vector<1x32xf32>
    %105 = vector.shape_cast %104 : vector<1x32xf32> to vector<32xf32>
    %106 = vector.shape_cast %105 : vector<32xf32> to vector<1x1x32xf32>
    %107 = vector.broadcast %106 : vector<1x1x32xf32> to vector<8x8x32xf32>
    %108 = arith.mulf %103, %107 : vector<8x8x32xf32>
    %109 = arith.addf %101, %108 : vector<8x8x32xf32>
    %c0_72 = arith.constant 0 : index
    %c18_73 = arith.constant 18 : index
    %c1_74 = arith.constant 1 : index
    %c0_75 = arith.constant 0 : index
    %110 = vector.load %arg2[%c0_72, %c18_73, %c1_74, %c0_75] : memref<1x36x9x32xf32, #tpu.memory_space<vmem>>, vector<1x8x8x32xf32>
    %111 = vector.shape_cast %110 : vector<1x8x8x32xf32> to vector<8x8x32xf32>
    %c5_76 = arith.constant 5 : index
    %c0_77 = arith.constant 0 : index
    %112 = vector.load %arg4[%c5_76, %c0_77] : memref<9x32xf32, #tpu.memory_space<vmem>>, vector<1x32xf32>
    %113 = vector.shape_cast %112 : vector<1x32xf32> to vector<32xf32>
    %114 = vector.shape_cast %113 : vector<32xf32> to vector<1x1x32xf32>
    %115 = vector.broadcast %114 : vector<1x1x32xf32> to vector<8x8x32xf32>
    %116 = arith.mulf %111, %115 : vector<8x8x32xf32>
    %117 = arith.addf %109, %116 : vector<8x8x32xf32>
    %c0_78 = arith.constant 0 : index
    %c1_79 = arith.constant 1 : index
    %c0_80 = arith.constant 0 : index
    %c0_81 = arith.constant 0 : index
    %118 = vector.load %arg2[%c0_78, %c1_79, %c0_80, %c0_81] : memref<1x36x9x32xf32, #tpu.memory_space<vmem>>, vector<1x8x8x32xf32>
    %119 = vector.shape_cast %118 : vector<1x8x8x32xf32> to vector<8x8x32xf32>
    %c6_82 = arith.constant 6 : index
    %c0_83 = arith.constant 0 : index
    %120 = vector.load %arg4[%c6_82, %c0_83] : memref<9x32xf32, #tpu.memory_space<vmem>>, vector<1x32xf32>
    %121 = vector.shape_cast %120 : vector<1x32xf32> to vector<32xf32>
    %122 = vector.shape_cast %121 : vector<32xf32> to vector<1x1x32xf32>
    %123 = vector.broadcast %122 : vector<1x1x32xf32> to vector<8x8x32xf32>
    %124 = arith.mulf %119, %123 : vector<8x8x32xf32>
    %125 = arith.addf %117, %124 : vector<8x8x32xf32>
    %c0_84 = arith.constant 0 : index
    %c10 = arith.constant 10 : index
    %c0_85 = arith.constant 0 : index
    %c0_86 = arith.constant 0 : index
    %126 = vector.load %arg2[%c0_84, %c10, %c0_85, %c0_86] : memref<1x36x9x32xf32, #tpu.memory_space<vmem>>, vector<1x8x8x32xf32>
    %127 = vector.shape_cast %126 : vector<1x8x8x32xf32> to vector<8x8x32xf32>
    %c7_87 = arith.constant 7 : index
    %c0_88 = arith.constant 0 : index
    %128 = vector.load %arg4[%c7_87, %c0_88] : memref<9x32xf32, #tpu.memory_space<vmem>>, vector<1x32xf32>
    %129 = vector.shape_cast %128 : vector<1x32xf32> to vector<32xf32>
    %130 = vector.shape_cast %129 : vector<32xf32> to vector<1x1x32xf32>
    %131 = vector.broadcast %130 : vector<1x1x32xf32> to vector<8x8x32xf32>
    %132 = arith.mulf %127, %131 : vector<8x8x32xf32>
    %133 = arith.addf %125, %132 : vector<8x8x32xf32>
    %c0_89 = arith.constant 0 : index
    %c1_90 = arith.constant 1 : index
    %c1_91 = arith.constant 1 : index
    %c0_92 = arith.constant 0 : index
    %134 = vector.load %arg2[%c0_89, %c1_90, %c1_91, %c0_92] : memref<1x36x9x32xf32, #tpu.memory_space<vmem>>, vector<1x8x8x32xf32>
    %135 = vector.shape_cast %134 : vector<1x8x8x32xf32> to vector<8x8x32xf32>
    %c8_93 = arith.constant 8 : index
    %c0_94 = arith.constant 0 : index
    %136 = vector.load %arg4[%c8_93, %c0_94] : memref<9x32xf32, #tpu.memory_space<vmem>>, vector<1x32xf32>
    %137 = vector.shape_cast %136 : vector<1x32xf32> to vector<32xf32>
    %138 = vector.shape_cast %137 : vector<32xf32> to vector<1x1x32xf32>
    %139 = vector.broadcast %138 : vector<1x1x32xf32> to vector<8x8x32xf32>
    %140 = arith.mulf %135, %139 : vector<8x8x32xf32>
    %141 = arith.addf %133, %140 : vector<8x8x32xf32>
    %142 = vector.shape_cast %70 : vector<16x16x32xf32> to vector<256x32xf32>
    %143 = arith.truncf %142 : vector<256x32xf32> to vector<256x32xbf16>
    %c0_95 = arith.constant 0 : index
    %c0_96 = arith.constant 0 : index
    %144 = vector.load %arg5[%c0_95, %c0_96] : memref<32x32xbf16, #tpu.memory_space<vmem>>, vector<32x32xbf16>
    %cst = arith.constant dense<0.000000e+00> : vector<256x32xf32>
    %145 = tpu.matmul %143, %144, %cst {dimension_numbers = #tpu.dot_dimension_numbers<[1], [0], [0], [1], [0, 0, 1, 1], [], []>} : vector<256x32xbf16>, vector<32x32xbf16>, vector<256x32xf32> -> vector<256x32xf32>
    %c0_97 = arith.constant 0 : index
    %c0_98 = arith.constant 0 : index
    %146 = vector.load %arg6[%c0_97, %c0_98] : memref<1x32xf32, #tpu.memory_space<vmem>>, vector<1x32xf32>
    %147 = vector.broadcast %146 : vector<1x32xf32> to vector<256x32xf32>
    %148 = arith.addf %145, %147 : vector<256x32xf32>
    %149 = vector.shape_cast %141 : vector<8x8x32xf32> to vector<64x32xf32>
    %150 = arith.truncf %149 : vector<64x32xf32> to vector<64x32xbf16>
    %c0_99 = arith.constant 0 : index
    %c0_100 = arith.constant 0 : index
    %151 = vector.load %arg7[%c0_99, %c0_100] : memref<32x64xbf16, #tpu.memory_space<vmem>>, vector<32x64xbf16>
    %cst_101 = arith.constant dense<0.000000e+00> : vector<64x64xf32>
    %152 = tpu.matmul %150, %151, %cst_101 {dimension_numbers = #tpu.dot_dimension_numbers<[1], [0], [0], [1], [0, 0, 1, 1], [], []>} : vector<64x32xbf16>, vector<32x64xbf16>, vector<64x64xf32> -> vector<64x64xf32>
    %c0_102 = arith.constant 0 : index
    %c0_103 = arith.constant 0 : index
    %153 = vector.load %arg8[%c0_102, %c0_103] : memref<1x64xf32, #tpu.memory_space<vmem>>, vector<1x64xf32>
    %154 = vector.broadcast %153 : vector<1x64xf32> to vector<64x64xf32>
    %155 = arith.addf %152, %154 : vector<64x64xf32>
    %156 = vector.extract_strided_slice %148 {offsets = [0, 0], sizes = [256, 16], strides = [1, 1]} : vector<256x32xf32> to vector<256x16xf32>
    %157 = arith.truncf %156 : vector<256x16xf32> to vector<256x16xbf16>
    %158 = vector.extract_strided_slice %155 {offsets = [0, 0], sizes = [64, 16], strides = [1, 1]} : vector<64x64xf32> to vector<64x16xf32>
    %159 = arith.truncf %158 : vector<64x16xf32> to vector<64x16xbf16>
    %160 = vector.extract_strided_slice %155 {offsets = [0, 32], sizes = [64, 16], strides = [1, 1]} : vector<64x64xf32> to vector<64x16xf32>
    %161 = arith.truncf %160 : vector<64x16xf32> to vector<64x16xbf16>
    %cst_104 = arith.constant dense<0.000000e+00> : vector<256x64xf32>
    %162 = tpu.matmul %157, %159, %cst_104 {dimension_numbers = #tpu.dot_dimension_numbers<[1], [1], [0], [0], [0, 0, 1, 0], [], []>} : vector<256x16xbf16>, vector<64x16xbf16>, vector<256x64xf32> -> vector<256x64xf32>
    %cst_105 = arith.constant dense<0xFF800000> : vector<256xf32>
    %163 = vector.multi_reduction <maximumf>, %162, %cst_105 [1] : vector<256x64xf32> to vector<256xf32>
    %164 = vector.shape_cast %163 : vector<256xf32> to vector<256x1xf32>
    %165 = vector.broadcast %164 : vector<256x1xf32> to vector<256x64xf32>
    %166 = arith.subf %162, %165 : vector<256x64xf32>
    %167 = math.exp %166 : vector<256x64xf32>
    %cst_106 = arith.constant dense<0.000000e+00> : vector<256xf32>
    %168 = vector.multi_reduction <add>, %167, %cst_106 [1] : vector<256x64xf32> to vector<256xf32>
    %169 = vector.shape_cast %168 : vector<256xf32> to vector<256x1xf32>
    %170 = tpu.reciprocal %169 {approx = true} : vector<256x1xf32> -> vector<256x1xf32>
    %171 = vector.broadcast %170 : vector<256x1xf32> to vector<256x64xf32>
    %172 = arith.mulf %167, %171 : vector<256x64xf32>
    %173 = arith.truncf %172 : vector<256x64xf32> to vector<256x64xbf16>
    %cst_107 = arith.constant dense<0.000000e+00> : vector<256x16xf32>
    %174 = tpu.matmul %173, %161, %cst_107 {dimension_numbers = #tpu.dot_dimension_numbers<[1], [0], [0], [1], [0, 0, 1, 1], [], []>} : vector<256x64xbf16>, vector<64x16xbf16>, vector<256x16xf32> -> vector<256x16xf32>
    %175 = arith.truncf %174 : vector<256x16xf32> to vector<256x16xbf16>
    %c0_108 = arith.constant 0 : index
    %c0_109 = arith.constant 0 : index
    %176 = vector.load %arg9[%c0_108, %c0_109] : memref<32x32xbf16, #tpu.memory_space<vmem>>, vector<16x32xbf16>
    %cst_110 = arith.constant dense<0.000000e+00> : vector<256x32xf32>
    %177 = tpu.matmul %175, %176, %cst_110 {dimension_numbers = #tpu.dot_dimension_numbers<[1], [0], [0], [1], [0, 0, 1, 1], [], []>} : vector<256x16xbf16>, vector<16x32xbf16>, vector<256x32xf32> -> vector<256x32xf32>
    %178 = vector.extract_strided_slice %148 {offsets = [0, 16], sizes = [256, 16], strides = [1, 1]} : vector<256x32xf32> to vector<256x16xf32>
    %179 = arith.truncf %178 : vector<256x16xf32> to vector<256x16xbf16>
    %180 = vector.extract_strided_slice %155 {offsets = [0, 16], sizes = [64, 16], strides = [1, 1]} : vector<64x64xf32> to vector<64x16xf32>
    %181 = arith.truncf %180 : vector<64x16xf32> to vector<64x16xbf16>
    %182 = vector.extract_strided_slice %155 {offsets = [0, 48], sizes = [64, 16], strides = [1, 1]} : vector<64x64xf32> to vector<64x16xf32>
    %183 = arith.truncf %182 : vector<64x16xf32> to vector<64x16xbf16>
    %cst_111 = arith.constant dense<0.000000e+00> : vector<256x64xf32>
    %184 = tpu.matmul %179, %181, %cst_111 {dimension_numbers = #tpu.dot_dimension_numbers<[1], [1], [0], [0], [0, 0, 1, 0], [], []>} : vector<256x16xbf16>, vector<64x16xbf16>, vector<256x64xf32> -> vector<256x64xf32>
    %cst_112 = arith.constant dense<0xFF800000> : vector<256xf32>
    %185 = vector.multi_reduction <maximumf>, %184, %cst_112 [1] : vector<256x64xf32> to vector<256xf32>
    %186 = vector.shape_cast %185 : vector<256xf32> to vector<256x1xf32>
    %187 = vector.broadcast %186 : vector<256x1xf32> to vector<256x64xf32>
    %188 = arith.subf %184, %187 : vector<256x64xf32>
    %189 = math.exp %188 : vector<256x64xf32>
    %cst_113 = arith.constant dense<0.000000e+00> : vector<256xf32>
    %190 = vector.multi_reduction <add>, %189, %cst_113 [1] : vector<256x64xf32> to vector<256xf32>
    %191 = vector.shape_cast %190 : vector<256xf32> to vector<256x1xf32>
    %192 = tpu.reciprocal %191 {approx = true} : vector<256x1xf32> -> vector<256x1xf32>
    %193 = vector.broadcast %192 : vector<256x1xf32> to vector<256x64xf32>
    %194 = arith.mulf %189, %193 : vector<256x64xf32>
    %195 = arith.truncf %194 : vector<256x64xf32> to vector<256x64xbf16>
    %cst_114 = arith.constant dense<0.000000e+00> : vector<256x16xf32>
    %196 = tpu.matmul %195, %183, %cst_114 {dimension_numbers = #tpu.dot_dimension_numbers<[1], [0], [0], [1], [0, 0, 1, 1], [], []>} : vector<256x64xbf16>, vector<64x16xbf16>, vector<256x16xf32> -> vector<256x16xf32>
    %197 = arith.truncf %196 : vector<256x16xf32> to vector<256x16xbf16>
    %c16 = arith.constant 16 : index
    %c0_115 = arith.constant 0 : index
    %198 = vector.load %arg9[%c16, %c0_115] : memref<32x32xbf16, #tpu.memory_space<vmem>>, vector<16x32xbf16>
    %cst_116 = arith.constant dense<0.000000e+00> : vector<256x32xf32>
    %199 = tpu.matmul %197, %198, %cst_116 {dimension_numbers = #tpu.dot_dimension_numbers<[1], [0], [0], [1], [0, 0, 1, 1], [], []>} : vector<256x16xbf16>, vector<16x32xbf16>, vector<256x32xf32> -> vector<256x32xf32>
    %200 = arith.addf %177, %199 : vector<256x32xf32>
    %c0_117 = arith.constant 0 : index
    %c0_118 = arith.constant 0 : index
    %201 = vector.load %arg10[%c0_117, %c0_118] : memref<1x32xf32, #tpu.memory_space<vmem>>, vector<1x32xf32>
    %202 = vector.broadcast %201 : vector<1x32xf32> to vector<256x32xf32>
    %203 = arith.addf %200, %202 : vector<256x32xf32>
    %204 = tpu.transpose %203, [1, 0] : vector<256x32xf32> -> vector<32x256xf32>
    %c0_119 = arith.constant 0 : index
    %c0_120 = arith.constant 0 : index
    %c0_121 = arith.constant 0 : index
    %205 = vector.load %arg11[%c0_119, %c0_120, %c0_121] : memref<1x32x256xf32, #tpu.memory_space<vmem>>, vector<1x32x256xf32>
    %206 = vector.shape_cast %205 : vector<1x32x256xf32> to vector<32x256xf32>
    %207 = vector.shape_cast %204 : vector<32x256xf32> to vector<1x32x256xf32>
    tpu.vector_store %arg11[%c0_119, %c0_120, %c0_121], %207 {strides = array<i32>} : memref<1x32x256xf32, #tpu.memory_space<vmem>>, vector<1x32x256xf32>,
    return
  }
  func.func @transform_0(%arg0: i32) -> (i32, i32, i32, i32) {
    %c0_i32 = arith.constant 0 : i32
    %c0_i32_0 = arith.constant 0 : i32
    %c0_i32_1 = arith.constant 0 : i32
    %c0_i32_2 = arith.constant 0 : i32
    return %arg0, %c0_i32, %c0_i32_0, %c0_i32_1 : i32, i32, i32, i32
  }
  func.func @transform_1(%arg0: i32) -> (i32, i32, i32, i32) {
    %c0_i32 = arith.constant 0 : i32
    %c0_i32_0 = arith.constant 0 : i32
    %c0_i32_1 = arith.constant 0 : i32
    %c0_i32_2 = arith.constant 0 : i32
    return %arg0, %c0_i32, %c0_i32_0, %c0_i32_1 : i32, i32, i32, i32
  }
  func.func @transform_2(%arg0: i32) -> (i32, i32) {
    %c0_i32 = arith.constant 0 : i32
    %c0_i32_0 = arith.constant 0 : i32
    %c0_i32_1 = arith.constant 0 : i32
    return %c0_i32, %c0_i32_0 : i32, i32
  }
  func.func @transform_3(%arg0: i32) -> (i32, i32) {
    %c0_i32 = arith.constant 0 : i32
    %c0_i32_0 = arith.constant 0 : i32
    %c0_i32_1 = arith.constant 0 : i32
    return %c0_i32, %c0_i32_0 : i32, i32
  }
  func.func @transform_4(%arg0: i32) -> (i32, i32) {
    %c0_i32 = arith.constant 0 : i32
    %c0_i32_0 = arith.constant 0 : i32
    %c0_i32_1 = arith.constant 0 : i32
    return %c0_i32, %c0_i32_0 : i32, i32
  }
  func.func @transform_5(%arg0: i32) -> (i32, i32) {
    %c0_i32 = arith.constant 0 : i32
    %c0_i32_0 = arith.constant 0 : i32
    %c0_i32_1 = arith.constant 0 : i32
    return %c0_i32, %c0_i32_0 : i32, i32
  }
  func.func @transform_6(%arg0: i32) -> (i32, i32) {
    %c0_i32 = arith.constant 0 : i32
    %c0_i32_0 = arith.constant 0 : i32
    %c0_i32_1 = arith.constant 0 : i32
    return %c0_i32, %c0_i32_0 : i32, i32
  }
  func.func @transform_7(%arg0: i32) -> (i32, i32) {
    %c0_i32 = arith.constant 0 : i32
    %c0_i32_0 = arith.constant 0 : i32
    %c0_i32_1 = arith.constant 0 : i32
    return %c0_i32, %c0_i32_0 : i32, i32
  }
  func.func @transform_8(%arg0: i32) -> (i32, i32) {
    %c0_i32 = arith.constant 0 : i32
    %c0_i32_0 = arith.constant 0 : i32
    %c0_i32_1 = arith.constant 0 : i32
    return %c0_i32, %c0_i32_0 : i32, i32
  }
  func.func @transform_9(%arg0: i32) -> (i32, i32) {
    %c0_i32 = arith.constant 0 : i32
    %c0_i32_0 = arith.constant 0 : i32
    %c0_i32_1 = arith.constant 0 : i32
    return %c0_i32, %c0_i32_0 : i32, i32
  }
  func.func @transform_10(%arg0: i32) -> (i32, i32, i32) {
    %c0_i32 = arith.constant 0 : i32
    %c0_i32_0 = arith.constant 0 : i32
    %c0_i32_1 = arith.constant 0 : i32
    return %arg0, %c0_i32, %c0_i32_0 : i32, i32, i32
  }
}

</mosaic_0001>

<bundles_post_ra>
// kernel: attention_forward.1
= control target key start
LH: loop header
LB: loop body
LE: loop exit
PB: predicated region body
PF: predicated region fallthrough
CT: control target
= control target key end

     0   :  { %s4395_s13 = smov 0   ;;  %s6544_s0 = inlined_call_operand.vmem [shape: f32[2,18,18,32], index: 0, kind: input, shape index: {}]   ;;  %s6545_s1 = inlined_call_operand.vmem [shape: f32[2,36,9,32], index: 1, kind: input, shape index: {}]   ;;  %s6546_s2 = inlined_call_operand.vmem [shape: f32[9,32], index: 2, kind: input, shape index: {}]   ;;  %s6547_s3 = inlined_call_operand.vmem [shape: f32[9,32], index: 3, kind: input, shape index: {}]   ;;  %s6548_s4 = inlined_call_operand.vmem [shape: bf16[32,32], index: 4, kind: input, shape index: {}]   ;;  %s6549_s5 = inlined_call_operand.vmem [shape: f32[1,32], index: 5, kind: input, shape index: {}]   ;;  %s6550_s6 = inlined_call_operand.vmem [shape: bf16[32,64], index: 6, kind: input, shape index: {}]   ;;  %s6551_s7 = inlined_call_operand.vmem [shape: f32[1,64], index: 7, kind: input, shape index: {}]   ;;  %s6552_s8 = inlined_call_operand.vmem [shape: bf16[32,32], index: 8, kind: input, shape index: {}]   ;;  %s6553_s9 = inlined_call_operand.vmem [shape: f32[1,32], index: 9, kind: input, shape index: {}]   ;;  %s6554_s10 = inlined_call_operand.vmem [shape: f32[2,32,256], index: 10, kind: output, shape index: {}]  }
   0x1 LB: > { %s3614_s14 = sadd.s32 4294967295, %s4335_s13   ;;  %p3618_p0 = scmp.ge.s32.totalorder %s4335_s13, 1  ;;  %s4335_s13 = sphi %s4395_s13, %s20_s13  }
   0x2   : > { %p322_p1 = scmp.lt.s32.totalorder %s4335_s13, 3 }
   0x4   : > { %p323_p2 = pnand %p3618_p0, %p322_p1 }
   0x6   : > { %326 = sbr.rel (%p323_p2) target bundleno = 2181 (0x885), region = 60 }
   0xb   : > { %v4015_v0 = vld [vmem:[%s6548_s4 + $0x8] sm:$0xff]  ;;  %p365_p3 = scmp.lt.s32.totalorder %s3614_s14, 1  ;;  %v4014_v1 = vld [vmem:[%s6548_s4] sm:$0xff]  ;;  %vm1500_vm0 = vcmask 261120   ;;  %s4337_s18 = smov 112   ;;  %vm1723_vm1 = vcmask 130048  }
   0xc   : > { %4020 = vmatpush.bf16.msra.mxu1 %v4015_v0  ;;  %v4414_v2 = vld [vmem:[%s6546_s2] ss:$0 sm:$0xff]  ;;  %v4419_v3 = vld [vmem:[%s6546_s2 + $0x1] ss:$0 sm:$0xff]  ;;  %1555 = vmatpush.bf16.msra.mxu0 %v4015_v0  ;;  %v4424_v4 = vld [vmem:[%s6546_s2 + $0x2] ss:$0 sm:$0xff] }
   0xd   : > { %s6572_s14 = smov (!%p365_p3, %s3614_s14), 1  ;;  %v4430_v5 = vld [vmem:[%s6546_s2 + $0x3] ss:$0 sm:$0xff]  ;;  %v4435_v6 = vld [vmem:[%s6546_s2 + $0x4] ss:$0 sm:$0xff]  ;;  %s4338_s21 = smov 96  }
   0xe   : > { %s4030_s25 = smul.u32 432, %s6572_s14  ;;  %v4440_v7 = vld [vmem:[%s6546_s2 + $0x5] ss:$0 sm:$0xff]  ;;  %v4450_v8 = vld [vmem:[%s6546_s2 + $0x6] ss:$0 sm:$0xff]  ;;  %vm1873_vm2 = vcmask 523264  }
   0xf   : > { %6563 = vst [vmem:[#allocation2_spill] sm:$0xff] %v4450_v8  ;;  %v4455_v9 = vld [vmem:[%s6546_s2 + $0x7] ss:$0 sm:$0xff]  ;;  %v4519_v48 = vld [vmem:[%s6546_s2 + $0x8] ss:$0 sm:$0xff]  ;;  %s4031_s27 = smul.u32 576, %s6572_s14 }
  0x10   : > { %4021 = vmatpush.bf16.msra.mxu1 %v4014_v1  ;;  %s4445_s16 = scalar_lea.vmem %s6544_s0, %s4030_s25  ;;  %6564 = vst [vmem:[#allocation3_spill] sm:$0xff] %v4455_v9  ;;  %1556 = vmatpush.bf16.msra.mxu0 %v4014_v1  ;;  %s4013_s28 = sshll.u32 %s6572_s14, 6 }
  0x11   : > { %v409_v10 = vld [vmem:[%s4445_s16 + $0x150] sm:$0xff]  ;;  %v410_v11 = vld [vmem:[%s4445_s16 + $0x158] sm:$0xff]  ;;  %v3651_v22 = vld [vmem:[%s4445_s16 + $0x168] sm:$0xff]  ;;  %6565 = vst [vmem:[#allocation4_spill] sm:$0xff] %v4519_v48  ;;  %s4648_s30 = scalar_lea.vmem %s6545_s1, %s4031_s27  ;;  %s379_s12 = scalar_lea.vmem %s6554_s10, %s4013_s28 }
  0x12   : > { %v475_v12 = vld [vmem:[%s4445_s16 + $0x151] sm:$0xff]  ;;  %v443_v13 = vmul.f32 %v4414_v2, %v409_v10  ;;  %v444_v14 = vmul.f32 %v4414_v2, %v410_v11  ;;  %v476_v15 = vld [vmem:[%s4445_s16 + $0x159] sm:$0xff]  ;;  %v3683_v24 = vld [vmem:[%s4445_s16 + $0x169] sm:$0xff]  ;;  %v706_v26 = vmul.f32 %v4430_v5, %v3651_v22  ;;  %v445_v51 = vmul.f32 %v4414_v2, %v3651_v22 }
  0x13   : > { %v509_v16 = vmul.f32 %v4419_v3, %v475_v12  ;;  %v573_v17 = vld [vmem:[%s4445_s16 + $0x152] sm:$0xff]  ;;  %v574_v18 = vld [vmem:[%s4445_s16 + $0x15a] sm:$0xff]  ;;  %v510_v19 = vmul.f32 %v4419_v3, %v476_v15  ;;  %v804_v29 = vmul.f32 %v4435_v6, %v3683_v24  ;;  %v4479_v30 = vld [vmem:[%s4445_s16 + $0x16a] sm:$0xff]  ;;  %v511_v59 = vmul.f32 %v4419_v3, %v3683_v24 }
  0x14   : > { %v607_v20 = vmul.f32 %v4424_v4, %v573_v17  ;;  %v608_v21 = vmul.f32 %v4424_v4, %v574_v18  ;;  %v3652_v23 = vld [vmem:[%s4445_s16 + $0x170] sm:$0xff]  ;;  %v902_v34 = vmul.f32 %v4440_v7, %v4479_v30  ;;  %v4491_v36 = vld [vmem:[%s4445_s16 + $0x180] sm:$0xff]  ;;  %v4494_v37 = vld [vmem:[%s4445_s16 + $0x188] sm:$0xff] }
  0x15   : > { %v541_v25 = vadd.f32 %v509_v16, %v443_v13  ;;  %v707_v27 = vmul.f32 %v4430_v5, %v3652_v23  ;;  %v4475_v28 = vld [vmem:[%s4445_s16 + $0x171] sm:$0xff]  ;;  %v542_v32 = vadd.f32 %v510_v19, %v444_v14  ;;  %v4497_v38 = vld [vmem:[%s4445_s16 + $0x181] sm:$0xff]  ;;  %v1001_v40 = vmul.f32 %v4450_v8, %v4491_v36  ;;  %v4504_v42 = vld [vmem:[%s4445_s16 + $0x189] sm:$0xff] }
  0x16   : > { %v4482_v31 = vld [vmem:[%s4445_s16 + $0x172] sm:$0xff]  ;;  %v805_v33 = vmul.f32 %v4435_v6, %v4475_v28  ;;  %v1002_v41 = vmul.f32 %v4450_v8, %v4494_v37  ;;  %v1099_v43 = vmul.f32 %v4455_v9, %v4497_v38  ;;  %v4509_v44 = vld [vmem:[%s4445_s16 + $0x182] sm:$0xff]  ;;  %v4512_v45 = vld [vmem:[%s4445_s16 + $0x18a] sm:$0xff]  ;;  %v1100_v47 = vmul.f32 %v4455_v9, %v4504_v42 }
  0x17   : > { %v903_v35 = vmul.f32 %v4440_v7, %v4482_v31  ;;  %v639_v39 = vadd.f32 %v607_v20, %v541_v25  ;;  %v640_v46 = vadd.f32 %v608_v21, %v542_v32  ;;  %v381_v49 = vld [vmem:[%s4445_s16] sm:$0xff]  ;;  %v382_v50 = vld [vmem:[%s4445_s16 + $0x8] sm:$0xff]  ;;  %v4525_v52 = vmul.f32 %v4414_v2, %v3652_v23  ;;  %v4540_v1 = vld [vmem:[%s4445_s16 + $0x18] sm:$0xff] }
  0x18   : > { %v415_v54 = vmul.f32 %v4414_v2, %v381_v49  ;;  %v416_v55 = vmul.f32 %v4414_v2, %v382_v50  ;;  %v447_v56 = vld [vmem:[%s4445_s16 + $0x1] sm:$0xff]  ;;  %v448_v57 = vld [vmem:[%s4445_s16 + $0x9] sm:$0xff]  ;;  %v1197_v61 = vmul.f32 %v4519_v48, %v4509_v44  ;;  %v1198_v62 = vmul.f32 %v4519_v48, %v4512_v45  ;;  %v4549_v15 = vld [vmem:[%s4445_s16 + $0x19] sm:$0xff] }
  0x19   : > { %v738_v53 = vadd.f32 %v706_v26, %v639_v39  ;;  %v545_v58 = vld [vmem:[%s4445_s16 + $0x2] sm:$0xff]  ;;  %v739_v60 = vadd.f32 %v707_v27, %v640_v46  ;;  %v481_v63 = vmul.f32 %v4419_v3, %v447_v56  ;;  %v546_v0 = vld [vmem:[%s4445_s16 + $0xa] sm:$0xff]  ;;  %v482_v12 = vmul.f32 %v4419_v3, %v448_v57  ;;  %v4555_v17 = vld [vmem:[%s4445_s16 + $0x1a] sm:$0xff] }
  0x1a   : > { %v4543_v10 = vld [vmem:[%s4445_s16 + $0x20] sm:$0xff]  ;;  %v579_v13 = vmul.f32 %v4424_v4, %v545_v58  ;;  %v580_v14 = vmul.f32 %v4424_v4, %v546_v0  ;;  %v678_v20 = vmul.f32 %v4430_v5, %v4540_v1  ;;  %v4565_v23 = vld [vmem:[%s4445_s16 + $0x30] sm:$0xff]  ;;  %v4568_v24 = vld [vmem:[%s4445_s16 + $0x38] sm:$0xff]  ;;  %v776_v27 = vmul.f32 %v4435_v6, %v4549_v15 }
  0x1b   : > { %v836_v11 = vadd.f32 %v804_v29, %v738_v53  ;;  %v4552_v16 = vld [vmem:[%s4445_s16 + $0x21] sm:$0xff]  ;;  %v837_v18 = vadd.f32 %v805_v33, %v739_v60  ;;  %v513_v19 = vadd.f32 %v481_v63, %v415_v54  ;;  %v679_v21 = vmul.f32 %v4430_v5, %v4543_v10  ;;  %v4575_v32 = vld [vmem:[%s4445_s16 + $0x31] sm:$0xff]  ;;  %v4578_v33 = vld [vmem:[%s4445_s16 + $0x39] sm:$0xff] }
  0x1c   : > { %v4562_v22 = vld [vmem:[%s4445_s16 + $0x22] sm:$0xff]  ;;  %v514_v26 = vadd.f32 %v482_v12, %v416_v55  ;;  %v777_v29 = vmul.f32 %v4435_v6, %v4552_v16  ;;  %v874_v49 = vmul.f32 %v4440_v7, %v4555_v17  ;;  %v4585_v50 = vld [vmem:[%s4445_s16 + $0x32] sm:$0xff]  ;;  %v4588_v53 = vld [vmem:[%s4445_s16 + $0x3a] sm:$0xff]  ;;  %v973_v56 = vmul.f32 %v4450_v8, %v4565_v23 }
  0x1d   : > { %v934_v25 = vadd.f32 %v902_v34, %v836_v11  ;;  %v935_v39 = vadd.f32 %v903_v35, %v837_v18  ;;  %v611_v46 = vadd.f32 %v579_v13, %v513_v19  ;;  %v875_v34 = vmul.f32 %v4440_v7, %v4562_v22  ;;  %v4017_v19 = vld [vmem:[%s6550_s6 + $0x8] sm:$0xff] }
  0x1e   : > { %v612_v55 = vadd.f32 %v580_v14, %v514_v26  ;;  %v974_v57 = vmul.f32 %v4450_v8, %v4568_v24  ;;  %v1071_v60 = vmul.f32 %v4455_v9, %v4575_v32  ;;  %v1072_v63 = vmul.f32 %v4455_v9, %v4578_v33  ;;  %1680 = vmatpush.bf16.msrb.mxu1 %v4017_v19 }
  0x1f   : > { %v1033_v54 = vadd.f32 %v1001_v40, %v934_v25  ;;  %v1034_v35 = vadd.f32 %v1002_v41, %v935_v39  ;;  %v710_v58 = vadd.f32 %v678_v20, %v611_v46  ;;  %v1169_v40 = vmul.f32 %v4519_v48, %v4585_v50 }
  0x20   : > { %v711_v11 = vadd.f32 %v679_v21, %v612_v55  ;;  %v1170_v12 = vmul.f32 %v4519_v48, %v4588_v53  ;;  %v512_v41 = vmul.f32 %v4419_v3, %v4475_v28  ;;  %v543_v18 = vadd.f32 %v511_v59, %v445_v51  ;;  %v3749_v59 = vld [vmem:[%s4445_s16 + $0x198] sm:$0xff] }
  0x21   : > { %v1131_v0 = vadd.f32 %v1099_v43, %v1033_v54  ;;  %v1132_v13 = vadd.f32 %v1100_v47, %v1034_v35  ;;  %v808_v14 = vadd.f32 %v776_v27, %v710_v58  ;;  %v609_v21 = vmul.f32 %v4424_v4, %v4479_v30  ;;  %v3813_v35 = vld [vmem:[%s4445_s16 + $0x19a] sm:$0xff]  ;;  %v3814_v58 = vld [vmem:[%s4445_s16 + $0x1a2] sm:$0xff] }
  0x22   : > { %v809_v20 = vadd.f32 %v777_v29, %v711_v11  ;;  %v610_v25 = vmul.f32 %v4424_v4, %v4482_v31  ;;  %v544_v28 = vadd.f32 %v512_v41, %v4525_v52  ;;  %v708_v51 = vmul.f32 %v4430_v5, %v4491_v36  ;;  %v4016_v52 = vld [vmem:[%s6550_s6] sm:$0xff] }
  0x23   : > { %v1229_v43 = vadd.f32 %v1197_v61, %v1131_v0  ;;  %v1230_v26 = vadd.f32 %v1198_v62, %v1132_v13  ;;  %v906_v47 = vadd.f32 %v874_v49, %v808_v14  ;;  %v641_v61 = vadd.f32 %v609_v21, %v543_v18  ;;  %v3750_v62 = vld [vmem:[%s4445_s16 + $0x1a0] sm:$0xff]  ;;  %1681 = vmatpush.bf16.msrb.mxu1 %v4016_v52 }
  0x24   : > { %v907_v27 = vadd.f32 %v875_v34, %v809_v20  ;;  %v709_v30 = vmul.f32 %v4430_v5, %v4494_v37  ;;  %v806_v31 = vmul.f32 %v4435_v6, %v4497_v38  ;;  %v642_v39 = vadd.f32 %v610_v25, %v544_v28  ;;  %v3781_v49 = vld [vmem:[%s4445_s16 + $0x199] sm:$0xff]  ;;  %v3782_v34 = vld [vmem:[%s4445_s16 + $0x1a1] sm:$0xff] }
  0x25   : > { %v1478_v29 = vpack.c.bf16 %v1230_v26, %v1229_v43  ;;  %v1005_v36 = vadd.f32 %v973_v56, %v906_v47  ;;  %v807_v46 = vmul.f32 %v4435_v6, %v4504_v42  ;;  %v740_v55 = vadd.f32 %v708_v51, %v641_v61  ;;  %v4661_v28 = vld [vmem:[%s4445_s16 + $0x48] sm:$0xff]  ;;  %v4664_v51 = vld [vmem:[%s4445_s16 + $0x50] sm:$0xff]  ;;  %v1233_v61 = vld [vmem:[%s4648_s30] sm:$0xff] }
  0x26   : > { %v1006_v54 = vadd.f32 %v974_v57, %v907_v27  ;;  %v904_v37 = vmul.f32 %v4440_v7, %v4509_v44  ;;  %v905_v38 = vmul.f32 %v4440_v7, %v4512_v45  ;;  %v741_v0 = vadd.f32 %v709_v30, %v642_v39  ;;  %v4669_v27 = vld [vmem:[%s4445_s16 + $0x49] sm:$0xff]  ;;  %v4684_v52 = vld [vmem:[%s6547_s3] ss:$0 sm:$0xff] }
  0x27   : > { %3893 = vmatmul.msk.bf16.vlgmr.msra.gmra.mxu1 %vm1500_vm0, %v1478_v29  ;;  %v1103_v56 = vadd.f32 %v1071_v60, %v1005_v36  ;;  %v1003_v11 = vmul.f32 %v4450_v8, %v3749_v59  ;;  %v1004_v42 = vmul.f32 %v4450_v8, %v3750_v62  ;;  %v838_v57 = vadd.f32 %v806_v31, %v740_v55  ;;  %v4679_v62 = vld [vmem:[%s4648_s30 + $0x10] sm:$0xff]  ;;  %v4698_v55 = vld [vmem:[%s6547_s3 + $0x1] ss:$0 sm:$0xff] }
  0x28   : > { %v1104_v13 = vadd.f32 %v1072_v63, %v1006_v54  ;;  %v1101_v14 = vmul.f32 %v4455_v9, %v3781_v49  ;;  %v1102_v44 = vmul.f32 %v4455_v9, %v3782_v34  ;;  %v839_v45 = vadd.f32 %v807_v46, %v741_v0  ;;  %v3815_v29 = vld [vmem:[%s4648_s30 + $0x90] sm:$0xff]  ;;  %v4693_v54 = vld [vmem:[%s4648_s30 + $0xa0] sm:$0xff] }
  0x29   : > { %v1201_v41 = vadd.f32 %v1169_v40, %v1103_v56  ;;  %v1199_v18 = vmul.f32 %v4519_v48, %v3813_v35  ;;  %v1200_v60 = vmul.f32 %v4519_v48, %v3814_v58  ;;  %v936_v43 = vadd.f32 %v904_v37, %v838_v57  ;;  %v4690_v34 = vld [vmem:[%s4445_s16 + $0x4a] sm:$0xff]  ;;  %v1278_v37 = vld [vmem:[%s4648_s30 + $0x1] sm:$0xff] }
  0x2a   : > { %v1202_v19 = vadd.f32 %v1170_v12, %v1104_v13  ;;  %v417_v20 = vmul.f32 %v4414_v2, %v4540_v1  ;;  %v418_v63 = vmul.f32 %v4414_v2, %v4543_v10  ;;  %v937_v40 = vadd.f32 %v905_v38, %v839_v45  ;;  %v4708_v0 = vld [vmem:[%s4648_s30 + $0x11] sm:$0xff] }
  0x2b   : > { %v483_v21 = vmul.f32 %v4419_v3, %v4549_v15  ;;  %v484_v12 = vmul.f32 %v4419_v3, %v4552_v16  ;;  %v581_v1 = vmul.f32 %v4424_v4, %v4555_v17  ;;  %v1035_v10 = vadd.f32 %v1003_v11, %v936_v43  ;;  %v4713_v11 = vld [vmem:[%s6547_s3 + $0x2] ss:$0 sm:$0xff] }
  0x2c   : > { %v1464_v25 = vpack.c.bf16 %v1202_v19, %v1201_v41  ;;  %v582_v26 = vmul.f32 %v4424_v4, %v4562_v22  ;;  %v680_v47 = vmul.f32 %v4430_v5, %v4565_v23  ;;  %v1036_v15 = vadd.f32 %v1004_v42, %v937_v40  ;;  %v4672_v22 = vld [vmem:[%s4445_s16 + $0x51] sm:$0xff]  ;;  %6566 = vst [vmem:[#allocation5_spill] sm:$0xff] %v4713_v11  ;;  %v4718_v42 = vld [vmem:[%s6547_s3 + $0x3] ss:$0 sm:$0xff] }
  0x2d   : > { %v515_v59 = vadd.f32 %v483_v21, %v417_v20  ;;  %v516_v16 = vadd.f32 %v484_v12, %v418_v63  ;;  %v681_v17 = vmul.f32 %v4430_v5, %v4568_v24  ;;  %v1133_v30 = vadd.f32 %v1101_v14, %v1035_v10  ;;  %v3823_v43 = vld [vmem:[%s4648_s30 + $0x120] sm:$0xff]  ;;  %v4736_v21 = vld [vmem:[%s4445_s16 + $0x52] sm:$0xff] }
  0x2e   : > { %3879 = vmatmul.msk.bf16.vlgmr.msra.gmra.mxu0 %vm1500_vm0, %v1464_v25  ;;  %v778_v31 = vmul.f32 %v4435_v6, %v4575_v32  ;;  %v1134_v36 = vadd.f32 %v1102_v44, %v1036_v15  ;;  %v779_v49 = vmul.f32 %v4435_v6, %v4578_v33  ;;  %v876_v35 = vmul.f32 %v4440_v7, %v4585_v50  ;;  %v3831_v25 = vld [vmem:[%s4648_s30 + $0x1b0] sm:$0xff] }
  0x2f   : > { %v613_v39 = vadd.f32 %v581_v1, %v515_v59  ;;  %v614_v46 = vadd.f32 %v582_v26, %v516_v16  ;;  %v1231_v38 = vadd.f32 %v1199_v18, %v1133_v30  ;;  %v877_v58 = vmul.f32 %v4440_v7, %v4588_v53  ;;  %v3824_v1 = vld [vmem:[%s4648_s30 + $0x130] sm:$0xff]  ;;  %v3832_v59 = vld [vmem:[%s4648_s30 + $0x1c0] sm:$0xff] }
  0x30   : > { %v975_v56 = vmul.f32 %v4450_v8, %v4661_v28  ;;  %v1232_v13 = vadd.f32 %v1200_v60, %v1134_v36  ;;  %v976_v44 = vmul.f32 %v4450_v8, %v4664_v51  ;;  %v1073_v41 = vmul.f32 %v4455_v9, %v4669_v27  ;;  %v4733_v60 = vld [vmem:[%s6547_s3 + $0x4] ss:$0 sm:$0xff]  ;;  %v4752_v16 = vld [vmem:[%s6547_s3 + $0x5] ss:$0 sm:$0xff] }
  0x31   : > { %v712_v57 = vadd.f32 %v680_v47, %v613_v39  ;;  %v713_v14 = vadd.f32 %v681_v17, %v614_v46  ;;  %v1074_v45 = vmul.f32 %v4455_v9, %v4672_v22  ;;  %v1243_v18 = vmul.f32 %v4684_v52, %v1233_v61  ;;  %v4757_v17 = vld [vmem:[%s6547_s3 + $0x6] ss:$0 sm:$0xff]  ;;  %v3840_v39 = vld [vmem:[%s4648_s30 + $0x131] sm:$0xff] }
  0x32   : > { %v1244_v19 = vmul.f32 %v4684_v52, %v4679_v62  ;;  %v1479_v20 = vpack.c.bf16 %v1232_v13, %v1231_v38  ;;  %v1262_v12 = vmul.f32 %v4698_v55, %v3815_v29  ;;  %v1171_v10 = vmul.f32 %v4519_v48, %v4690_v34  ;;  %v3839_v36 = vld [vmem:[%s4648_s30 + $0x121] sm:$0xff] }
  0x33   : > { %v810_v63 = vadd.f32 %v778_v31, %v712_v57  ;;  %v811_v40 = vadd.f32 %v779_v49, %v713_v14  ;;  %v1263_v26 = vmul.f32 %v4698_v55, %v4693_v54  ;;  %v1288_v47 = vmul.f32 %v4713_v11, %v1278_v37  ;;  %v3848_v13 = vld [vmem:[%s4648_s30 + $0x20] sm:$0xff] }
  0x34   : > { %v1289_v15 = vmul.f32 %v4713_v11, %v4708_v0  ;;  %v1270_v31 = vadd.f32 %v1262_v12, %v1243_v18  ;;  %v1315_v29 = vmul.f32 %v4718_v42, %v3823_v43  ;;  %v1172_v46 = vmul.f32 %v4519_v48, %v4736_v21 }
  0x35   : > { %v908_v61 = vadd.f32 %v876_v35, %v810_v63  ;;  %v909_v30 = vadd.f32 %v877_v58, %v811_v40  ;;  %v1271_v49 = vadd.f32 %v1263_v26, %v1244_v19  ;;  %v1316_v37 = vmul.f32 %v4718_v42, %v3824_v1  ;;  %v4770_v35 = vld [vmem:[%s6547_s3 + $0x7] ss:$0 sm:$0xff]  ;;  %v3856_v19 = vld [vmem:[%s4648_s30 + $0xb0] sm:$0xff] }
  0x36   : > { %v1342_v38 = vmul.f32 %v4733_v60, %v3831_v25  ;;  %v1296_v14 = vadd.f32 %v1288_v47, %v1270_v31  ;;  %v1343_v18 = vmul.f32 %v4733_v60, %v3832_v59  ;;  %v1368_v63 = vmul.f32 %v4752_v16, %v3839_v36  ;;  %v1236_v1 = vld [vmem:[%s4648_s30 + $0x30] sm:$0xff]  ;;  %v3818_v26 = vld [vmem:[%s4648_s30 + $0xc0] sm:$0xff]  ;;  %v4794_v36 = vld [vmem:[%s6547_s3 + $0x8] ss:$0 sm:$0xff] }
  0x37   : > { %3894 = vmatmul.msk.bf16.gmra.mxu1 %vm1500_vm0, %v1479_v20  ;;  %v1007_v58 = vadd.f32 %v975_v56, %v908_v61  ;;  %v1008_v57 = vadd.f32 %v976_v44, %v909_v30  ;;  %v1297_v43 = vadd.f32 %v1289_v15, %v1271_v49  ;;  %v1369_v40 = vmul.f32 %v4752_v16, %v3840_v39  ;;  %v4787_v30 = vld [vmem:[%s4648_s30 + $0x31] sm:$0xff] }
  0x38   : > { %v1395_v12 = vmul.f32 %v4757_v17, %v4679_v62  ;;  %v1323_v56 = vadd.f32 %v1315_v29, %v1296_v14  ;;  %v1396_v44 = vmul.f32 %v4757_v17, %v3848_v13  ;;  %v1422_v15 = vmul.f32 %v4770_v35, %v4693_v54  ;;  %v3825_v62 = vld [vmem:[%s4648_s30 + $0x140] sm:$0xff]  ;;  %v3826_v39 = vld [vmem:[%s4648_s30 + $0x150] sm:$0xff] }
  0x39   : > { %v1105_v25 = vadd.f32 %v1073_v41, %v1007_v58  ;;  %v1106_v20 = vadd.f32 %v1074_v45, %v1008_v57  ;;  %v1324_v47 = vadd.f32 %v1316_v37, %v1297_v43  ;;  %v1423_v59 = vmul.f32 %v4770_v35, %v3856_v19  ;;  %v3864_v29 = vld [vmem:[%s4648_s30 + $0x21] sm:$0xff] }
  0x3a   : > { %v1245_v61 = vmul.f32 %v4684_v52, %v3848_v13  ;;  %v1350_v45 = vadd.f32 %v1342_v38, %v1323_v56  ;;  %v1246_v54 = vmul.f32 %v4684_v52, %v1236_v1  ;;  %v1264_v37 = vmul.f32 %v4698_v55, %v3856_v19  ;;  %v3834_v43 = vld [vmem:[%s4648_s30 + $0x1e0] sm:$0xff] }
  0x3b   : > { %v1203_v31 = vadd.f32 %v1171_v10, %v1105_v25  ;;  %v1204_v41 = vadd.f32 %v1172_v46, %v1106_v20  ;;  %v1351_v49 = vadd.f32 %v1343_v18, %v1324_v47  ;;  %v1265_v13 = vmul.f32 %v4698_v55, %v3818_v26  ;;  %v3833_v46 = vld [vmem:[%s4648_s30 + $0x1d0] sm:$0xff]  ;;  %v3841_v19 = vld [vmem:[%s4648_s30 + $0x141] sm:$0xff] }
  0x3c   : > { %v1290_v10 = vmul.f32 %v4713_v11, %v3864_v29  ;;  %v1376_v58 = vadd.f32 %v1368_v63, %v1350_v45  ;;  %v1291_v57 = vmul.f32 %v4713_v11, %v4787_v30  ;;  %v1317_v14 = vmul.f32 %v4718_v42, %v3825_v62  ;;  %v3842_v47 = vld [vmem:[%s4648_s30 + $0x151] sm:$0xff] }
  0x3d   : > { %v1465_v38 = vpack.c.bf16 %v1204_v41, %v1203_v31  ;;  %v1377_v25 = vadd.f32 %v1369_v40, %v1351_v49  ;;  %v1272_v20 = vadd.f32 %v1264_v37, %v1245_v61  ;;  %v1273_v56 = vadd.f32 %v1265_v13, %v1246_v54  ;;  %v3850_v54 = vld [vmem:[%s4648_s30 + $0x40] sm:$0xff] }
  0x3e   : > { %v1318_v18 = vmul.f32 %v4718_v42, %v3826_v39  ;;  %v1403_v48 = vadd.f32 %v1395_v12, %v1376_v58  ;;  %v1448_v63 = vmul.f32 %v4794_v36, %v4708_v0  ;;  %v1449_v31 = vmul.f32 %v4794_v36, %v3864_v29  ;;  %v1238_v0 = vld [vmem:[%s4648_s30 + $0x50] sm:$0xff] }
  0x3f   : > { %3880 = vmatmul.msk.bf16.gmra.mxu0 %vm1500_vm0, %v1465_v38  ;;  %v1344_v62 = vmul.f32 %v4733_v60, %v3833_v46  ;;  %v1404_v40 = vadd.f32 %v1396_v44, %v1377_v25  ;;  %v1298_v61 = vadd.f32 %v1290_v10, %v1272_v20  ;;  %v1299_v41 = vadd.f32 %v1291_v57, %v1273_v56  ;;  %v3820_v10 = vld [vmem:[%s4648_s30 + $0xe0] sm:$0xff]  ;;  %v4822_v46 = vld [vmem:[%s4648_s30 + $0x51] sm:$0xff] }
  0x40   : > { %v1345_v45 = vmul.f32 %v4733_v60, %v3834_v43  ;;  %v1430_v39 = vadd.f32 %v1422_v15, %v1403_v48  ;;  %v1370_v49 = vmul.f32 %v4752_v16, %v3841_v19  ;;  %v1371_v12 = vmul.f32 %v4752_v16, %v3842_v47  ;;  %v3858_v48 = vld [vmem:[%s4648_s30 + $0xd0] sm:$0xff]  ;;  %v3866_v25 = vld [vmem:[%s4648_s30 + $0x41] sm:$0xff] }
  0x41   : > { %v1431_v37 = vadd.f32 %v1423_v59, %v1404_v40  ;;  %v1325_v29 = vadd.f32 %v1317_v14, %v1298_v61  ;;  %v1326_v13 = vadd.f32 %v1318_v18, %v1299_v41  ;;  %v1397_v44 = vmul.f32 %v4757_v17, %v1236_v1  ;;  %v3827_v1 = vld [vmem:[%s4648_s30 + $0x160] sm:$0xff]  ;;  %v3828_v56 = vld [vmem:[%s4648_s30 + $0x170] sm:$0xff] }
  0x42   : > { %v1456_v38 = vadd.f32 %v1448_v63, %v1430_v39  ;;  %v1398_v58 = vmul.f32 %v4757_v17, %v3850_v54  ;;  %v1424_v15 = vmul.f32 %v4770_v35, %v3818_v26  ;;  %v1247_v57 = vmul.f32 %v4684_v52, %v3850_v54  ;;  %v3835_v61 = vld [vmem:[%s4648_s30 + $0x1f0] sm:$0xff]  ;;  %v3836_v41 = vld [vmem:[%s4648_s30 + $0x200] sm:$0xff] }
  0x43   : > { %v1457_v43 = vadd.f32 %v1449_v31, %v1431_v37  ;;  %v1352_v59 = vadd.f32 %v1344_v62, %v1325_v29  ;;  %v1353_v14 = vadd.f32 %v1345_v45, %v1326_v13  ;;  %v1248_v20 = vmul.f32 %v4684_v52, %v1238_v0  ;;  %v3843_v29 = vld [vmem:[%s4648_s30 + $0x161] sm:$0xff] }
  0x44   : > { %v1266_v18 = vmul.f32 %v4698_v55, %v3858_v48  ;;  %v1267_v19 = vmul.f32 %v4698_v55, %v3820_v10  ;;  %v1292_v47 = vmul.f32 %v4713_v11, %v3866_v25  ;;  %v1293_v26 = vmul.f32 %v4713_v11, %v4822_v46 }
  0x45   : > { %v1638_v63 = vpack.c.bf16 %v1457_v43, %v1456_v38  ;;  %v1378_v31 = vadd.f32 %v1370_v49, %v1352_v59  ;;  %v1379_v62 = vadd.f32 %v1371_v12, %v1353_v14  ;;  %v1425_v40 = vmul.f32 %v4770_v35, %v3858_v48  ;;  %v3844_v12 = vld [vmem:[%s4648_s30 + $0x171] sm:$0xff]  ;;  %v3852_v59 = vld [vmem:[%s4648_s30 + $0x60] sm:$0xff] }
  0x46   : > { %v1274_v45 = vadd.f32 %v1266_v18, %v1247_v57  ;;  %v1275_v54 = vadd.f32 %v1267_v19, %v1248_v20  ;;  %v1319_v39 = vmul.f32 %v4718_v42, %v3827_v1  ;;  %v1320_v37 = vmul.f32 %v4718_v42, %v3828_v56 }
  0x47   : > { %3903 = vmatmul.msk.bf16.vlgmr.msrb.gmra.mxu1 %vm1500_vm0, %v1638_v63  ;;  %v1405_v13 = vadd.f32 %v1397_v44, %v1378_v31  ;;  %v1406_v11 = vadd.f32 %v1398_v58, %v1379_v62  ;;  %v1450_v49 = vmul.f32 %v4794_v36, %v4787_v30  ;;  %v1346_v43 = vmul.f32 %v4733_v60, %v3835_v61  ;;  %v3860_v63 = vld [vmem:[%s4648_s30 + $0xf0] sm:$0xff] }
  0x48   : > { %v1300_v38 = vadd.f32 %v1292_v47, %v1274_v45  ;;  %v1301_v48 = vadd.f32 %v1293_v26, %v1275_v54  ;;  %v1347_v57 = vmul.f32 %v4733_v60, %v3836_v41  ;;  %v1451_v1 = vmul.f32 %v4794_v36, %v3866_v25  ;;  %v3868_v45 = vld [vmem:[%s4648_s30 + $0x61] sm:$0xff] }
  0x49   : > { %v1432_v14 = vadd.f32 %v1424_v15, %v1405_v13  ;;  %v1433_v20 = vadd.f32 %v1425_v40, %v1406_v11  ;;  %v1372_v56 = vmul.f32 %v4752_v16, %v3843_v29  ;;  %v1373_v18 = vmul.f32 %v4752_v16, %v3844_v12  ;;  %v4885_v12 = vld [vmem:[%s4445_s16 + $0x68] sm:$0xff] }
  0x4a   : > { %v1327_v44 = vadd.f32 %v1319_v39, %v1300_v38  ;;  %v1328_v58 = vadd.f32 %v1320_v37, %v1301_v48  ;;  %v1399_v30 = vmul.f32 %v4757_v17, %v1238_v0  ;;  %v1400_v47 = vmul.f32 %v4757_v17, %v3852_v59  ;;  %v4880_v37 = vld [vmem:[%s4445_s16 + $0x60] sm:$0xff] }
  0x4b   : > { %v4854_v19 = vadd.f32 %v1450_v49, %v1432_v14  ;;  %v1426_v26 = vmul.f32 %v4770_v35, %v3820_v10  ;;  %v419_v11 = vmul.f32 %v4414_v2, %v4565_v23  ;;  %v420_v31 = vmul.f32 %v4414_v2, %v4568_v24  ;;  %v4895_v14 = vld [vmem:[%s4445_s16 + $0x69] sm:$0xff] }
  0x4c   : > { %v1354_v15 = vadd.f32 %v1346_v43, %v1327_v44  ;;  %v1355_v25 = vadd.f32 %v1347_v57, %v1328_v58  ;;  %v485_v0 = vmul.f32 %v4419_v3, %v4575_v32  ;;  %v1459_v62 = vadd.f32 %v1451_v1, %v1433_v20  ;;  %v4892_v57 = vld [vmem:[%s4445_s16 + $0x61] sm:$0xff]  ;;  %v1240_v58 = vld [vmem:[%s4648_s30 + $0x70] sm:$0xff] }
  0x4d   : > { %v486_v40 = vmul.f32 %v4419_v3, %v4578_v33  ;;  %v583_v10 = vmul.f32 %v4424_v4, %v4585_v50  ;;  %v584_v23 = vmul.f32 %v4424_v4, %v4588_v53  ;;  %v682_v24 = vmul.f32 %v4430_v5, %v4661_v28 }
  0x4e   : > { %v1380_v61 = vadd.f32 %v1372_v56, %v1354_v15  ;;  %v1381_v41 = vadd.f32 %v1373_v18, %v1355_v25  ;;  %v517_v54 = vadd.f32 %v485_v0, %v419_v11  ;;  %v1427_v32 = vmul.f32 %v4770_v35, %v3860_v63  ;;  %v4905_v18 = vld [vmem:[%s4648_s30 + $0x100] sm:$0xff]  ;;  %v4913_v25 = vld [vmem:[%s4648_s30 + $0x71] sm:$0xff] }
  0x4f   : > { %v1452_v33 = vmul.f32 %v4794_v36, %v4822_v46  ;;  %v518_v39 = vadd.f32 %v486_v40, %v420_v31  ;;  %v683_v50 = vmul.f32 %v4430_v5, %v4664_v51  ;;  %v780_v49 = vmul.f32 %v4435_v6, %v4669_v27  ;;  %v4910_v15 = vld [vmem:[%s4445_s16 + $0x62] sm:$0xff] }
  0x50   : > { %v1407_v53 = vadd.f32 %v1399_v30, %v1380_v61  ;;  %v1408_v29 = vadd.f32 %v1400_v47, %v1381_v41  ;;  %v615_v13 = vadd.f32 %v583_v10, %v517_v54  ;;  %v1639_v38 = vpack.c.bf16 %v1459_v62, %v4854_v19  ;;  %v3829_v40 = vld [vmem:[%s4648_s30 + $0x180] sm:$0xff] }
  0x51   : > { %v1453_v46 = vmul.f32 %v4794_v36, %v3868_v45  ;;  %v616_v48 = vadd.f32 %v584_v23, %v518_v39  ;;  %v781_v43 = vmul.f32 %v4435_v6, %v4672_v22  ;;  %v878_v1 = vmul.f32 %v4440_v7, %v4690_v34  ;;  %v4922_v23 = vld [vmem:[%s4445_s16 + $0x6a] sm:$0xff] }
  0x52   : > { %v714_v20 = vadd.f32 %v682_v24, %v615_v13  ;;  %v879_v56 = vmul.f32 %v4440_v7, %v4736_v21  ;;  %v977_v44 = vmul.f32 %v4450_v8, %v4880_v37  ;;  %v1434_v30 = vadd.f32 %v1426_v26, %v1407_v53  ;;  %v3830_v24 = vld [vmem:[%s4648_s30 + $0x190] sm:$0xff] }
  0x53   : > { %v1435_v19 = vadd.f32 %v1427_v32, %v1408_v29  ;;  %v715_v47 = vadd.f32 %v683_v50, %v616_v48  ;;  %v978_v11 = vmul.f32 %v4450_v8, %v4885_v12  ;;  %v1075_v0 = vmul.f32 %v4455_v9, %v4892_v57  ;;  %v3837_v32 = vld [vmem:[%s4648_s30 + $0x210] sm:$0xff] }
  0x54   : > { %v812_v31 = vadd.f32 %v780_v49, %v714_v20  ;;  %v1076_v62 = vmul.f32 %v4455_v9, %v4895_v14  ;;  %v1249_v26 = vmul.f32 %v4684_v52, %v3852_v59  ;;  %v1250_v61 = vmul.f32 %v4684_v52, %v1240_v58  ;;  %v6567_v50 = vld [vmem:[#allocation4_spill] sm:$0xff]  ;;  %v6568_v59 = vld [vmem:[#allocation5_spill] sm:$0xff]  ;;  %v3838_v49 = vld [vmem:[%s4648_s30 + $0x220] sm:$0xff] }
  0x55   : > { %v813_v10 = vadd.f32 %v781_v43, %v715_v47  ;;  %v1268_v41 = vmul.f32 %v4698_v55, %v3860_v63  ;;  %v1269_v54 = vmul.f32 %v4698_v55, %v4905_v18  ;;  %v1173_v53 = vmul.f32 %v6567_v50, %v4910_v15  ;;  %v3845_v43 = vld [vmem:[%s4648_s30 + $0x181] sm:$0xff] }
  0x56   : > { %v910_v39 = vadd.f32 %v878_v1, %v812_v31  ;;  %v1294_v29 = vmul.f32 %v6568_v59, %v3868_v45  ;;  %v1295_v13 = vmul.f32 %v6568_v59, %v4913_v25  ;;  %v1321_v55 = vmul.f32 %v4718_v42, %v3829_v40  ;;  %v3846_v31 = vld [vmem:[%s4648_s30 + $0x191] sm:$0xff] }
  0x57   : > { %3904 = vmatmul.msk.bf16.gmra.mxu1 %vm1500_vm0, %v1639_v38  ;;  %v911_v52 = vadd.f32 %v879_v56, %v813_v10  ;;  %v1276_v63 = vadd.f32 %v1268_v41, %v1249_v26  ;;  %v1277_v48 = vadd.f32 %v1269_v54, %v1250_v61  ;;  %v1174_v1 = vmul.f32 %v6567_v50, %v4922_v23  ;;  %v3854_v56 = vld [vmem:[%s4648_s30 + $0x80] sm:$0xff] }
  0x58   : > { %v1009_v20 = vadd.f32 %v977_v44, %v910_v39  ;;  %v1322_v47 = vmul.f32 %v4718_v42, %v3830_v24  ;;  %v1348_v45 = vmul.f32 %v4733_v60, %v3837_v32  ;;  %v1349_v38 = vmul.f32 %v4733_v60, %v3838_v49 }
  0x59   : > { %v1010_v59 = vadd.f32 %v978_v11, %v911_v52  ;;  %v1302_v9 = vadd.f32 %v1294_v29, %v1276_v63  ;;  %v1303_v8 = vadd.f32 %v1295_v13, %v1277_v48  ;;  %v1460_v26 = vadd.f32 %v1452_v33, %v1434_v30  ;;  %v3862_v30 = vld [vmem:[%s4648_s30 + $0x110] sm:$0xff] }
  0x5a   : > { %v1107_v10 = vadd.f32 %v1075_v0, %v1009_v20  ;;  %v1374_v40 = vmul.f32 %v4752_v16, %v3845_v43  ;;  %v1375_v54 = vmul.f32 %v4752_v16, %v3846_v31  ;;  %v1461_v42 = vadd.f32 %v1453_v46, %v1435_v19  ;;  %v3870_v0 = vld [vmem:[%s4648_s30 + $0x81] sm:$0xff]  ;;  %v4990_v31 = vld [vmem:[%s4445_s16 + $0x79] sm:$0xff] }
  0x5b   : > { %v1108_v44 = vadd.f32 %v1076_v62, %v1010_v59  ;;  %v1329_v61 = vadd.f32 %v1321_v55, %v1302_v9  ;;  %v1330_v41 = vadd.f32 %v1322_v47, %v1303_v8  ;;  %v1401_v11 = vmul.f32 %v4757_v17, %v1240_v58  ;;  %v4977_v55 = vld [vmem:[%s4445_s16 + $0x78] sm:$0xff]  ;;  %v4980_v43 = vld [vmem:[%s4445_s16 + $0x80] sm:$0xff] }
  0x5c   : > { %v1205_v24 = vadd.f32 %v1173_v53, %v1107_v10  ;;  %v1402_v32 = vmul.f32 %v4757_v17, %v3854_v56  ;;  %v421_v33 = vmul.f32 %v4414_v2, %v4661_v28  ;;  %v422_v9 = vmul.f32 %v4414_v2, %v4664_v51  ;;  %v6569_v56 = vld [vmem:[#allocation2_spill] sm:$0xff] }
  0x5d   : > { %v1206_v39 = vadd.f32 %v1174_v1, %v1108_v44  ;;  %v1356_v60 = vadd.f32 %v1348_v45, %v1329_v61  ;;  %v1357_v29 = vadd.f32 %v1349_v38, %v1330_v41  ;;  %v487_v8 = vmul.f32 %v4419_v3, %v4669_v27  ;;  %v6570_v61 = vld [vmem:[#allocation3_spill] sm:$0xff] }
  0x5e   : > { %v488_v16 = vmul.f32 %v4419_v3, %v4672_v22  ;;  %v585_v46 = vmul.f32 %v4424_v4, %v4690_v34  ;;  %v586_v28 = vmul.f32 %v4424_v4, %v4736_v21  ;;  %v684_v27 = vmul.f32 %v4430_v5, %v4880_v37 }
  0x5f   : > { %v1466_v17 = vpack.c.bf16 %v1206_v39, %v1205_v24  ;;  %v1382_v58 = vadd.f32 %v1374_v40, %v1356_v60  ;;  %v1383_v19 = vadd.f32 %v1375_v54, %v1357_v29  ;;  %v519_v62 = vadd.f32 %v487_v8, %v421_v33  ;;  %v5007_v54 = vld [vmem:[%s4445_s16 + $0x7a] sm:$0xff] }
  0x60   : > { %v520_v51 = vadd.f32 %v488_v16, %v422_v9  ;;  %v685_v22 = vmul.f32 %v4430_v5, %v4885_v12  ;;  %v1428_v13 = vmul.f32 %v4770_v35, %v4905_v18  ;;  %v1429_v21 = vmul.f32 %v4770_v35, %v3862_v30 }
  0x61   : > { %3881 = vmatmul.msk.bf16.gmra.mxu0 %vm1500_vm0, %v1466_v17  ;;  %v1409_v34 = vadd.f32 %v1401_v11, %v1382_v58  ;;  %v1410_v53 = vadd.f32 %v1402_v32, %v1383_v19  ;;  %v617_v49 = vadd.f32 %v585_v46, %v519_v62  ;;  %v782_v63 = vmul.f32 %v4435_v6, %v4892_v57  ;;  %v5040_v17 = vld [vmem:[%s4445_s16 + $0x90] sm:$0xff]  ;;  %v5043_v58 = vld [vmem:[%s4445_s16 + $0x98] sm:$0xff] }
  0x62   : > { %v618_v52 = vadd.f32 %v586_v28, %v520_v51  ;;  %v783_v48 = vmul.f32 %v4435_v6, %v4895_v14  ;;  %v1640_v20 = vpack.c.bf16 %v1461_v42, %v1460_v26  ;;  %v1454_v1 = vmul.f32 %v4794_v36, %v4913_v25  ;;  %v4997_v25 = vld [vmem:[%s4445_s16 + $0x81] sm:$0xff] }
  0x63   : > { %v1455_v18 = vmul.f32 %v4794_v36, %v3870_v0  ;;  %v716_v35 = vadd.f32 %v684_v27, %v617_v49  ;;  %v880_v45 = vmul.f32 %v4440_v7, %v4910_v15  ;;  %v881_v6 = vmul.f32 %v4440_v7, %v4922_v23  ;;  %v5010_v42 = vld [vmem:[%s4445_s16 + $0x82] sm:$0xff] }
  0x64   : > { %v717_v47 = vadd.f32 %v685_v22, %v618_v52  ;;  %v1436_v59 = vadd.f32 %v1428_v13, %v1409_v34  ;;  %v1437_v38 = vadd.f32 %v1429_v21, %v1410_v53  ;;  %v979_v26 = vmul.f32 %v6569_v56, %v4977_v55  ;;  %v5048_v0 = vld [vmem:[%s6546_s2 + $0x5] ss:$0 sm:$0xff]  ;;  %v5055_v13 = vld [vmem:[%s4445_s16 + $0x91] sm:$0xff]  ;;  %v5058_v21 = vld [vmem:[%s4445_s16 + $0x99] sm:$0xff] }
  0x65   : > { %v980_v36 = vmul.f32 %v6569_v56, %v4980_v43  ;;  %v814_v10 = vadd.f32 %v782_v63, %v716_v35  ;;  %v423_v44 = vmul.f32 %v4414_v2, %v4880_v37  ;;  %v424_v7 = vmul.f32 %v4414_v2, %v4885_v12  ;;  %v5063_v63 = vld [vmem:[%s6546_s2 + $0x6] ss:$0 sm:$0xff] }
  0x66   : > { %v815_v40 = vadd.f32 %v783_v48, %v717_v47  ;;  %v1077_v41 = vmul.f32 %v6570_v61, %v4990_v31  ;;  %v489_v24 = vmul.f32 %v4419_v3, %v4892_v57  ;;  %v490_v11 = vmul.f32 %v4419_v3, %v4895_v14  ;;  %v5072_v47 = vld [vmem:[%s6546_s2 + $0x7] ss:$0 sm:$0xff] }
  0x67   : > { %3905 = vmatmul.msk.bf16.gmra.mxu1 %vm1500_vm0, %v1640_v20  ;;  %v587_v37 = vmul.f32 %v4424_v4, %v4910_v15  ;;  %v912_v32 = vadd.f32 %v880_v45, %v814_v10  ;;  %v1078_v12 = vmul.f32 %v6570_v61, %v4997_v25  ;;  %v588_v39 = vmul.f32 %v4424_v4, %v4922_v23  ;;  %v5033_v23 = vld [vmem:[%s6546_s2 + $0x4] ss:$0 sm:$0xff]  ;;  %v5084_v10 = vld [vmem:[%s6546_s2] ss:$0 sm:$0xff] }
  0x68   : > { %v913_v2 = vadd.f32 %v881_v6, %v815_v40  ;;  %v521_v60 = vadd.f32 %v489_v24, %v423_v44  ;;  %v522_v29 = vadd.f32 %v490_v11, %v424_v7  ;;  %v686_v57 = vmul.f32 %v4430_v5, %v4977_v55 }
  0x69   : > { %v687_v3 = vmul.f32 %v4430_v5, %v4980_v43  ;;  %v1011_v14 = vadd.f32 %v979_v26, %v912_v32  ;;  %v1175_v33 = vmul.f32 %v6567_v50, %v5007_v54  ;;  %v1176_v30 = vmul.f32 %v6567_v50, %v5010_v42 }
  0x6a   : > { %v1012_v15 = vadd.f32 %v980_v36, %v913_v2  ;;  %v619_v9 = vadd.f32 %v587_v37, %v521_v60  ;;  %v620_v4 = vadd.f32 %v588_v39, %v522_v29  ;;  %v784_v8 = vmul.f32 %v5033_v23, %v4990_v31 }
  0x6b   : > { %v785_v5 = vmul.f32 %v5033_v23, %v4997_v25  ;;  %v1109_v16 = vadd.f32 %v1077_v41, %v1011_v14  ;;  %v882_v62 = vmul.f32 %v5048_v0, %v5007_v54  ;;  %v883_v51 = vmul.f32 %v5048_v0, %v5010_v42  ;;  %v5095_v41 = vld [vmem:[%s6546_s2 + $0x1] ss:$0 sm:$0xff] }
  0x6c   : > { %v1110_v46 = vadd.f32 %v1078_v12, %v1012_v15  ;;  %v718_v19 = vadd.f32 %v686_v57, %v619_v9  ;;  %v719_v28 = vadd.f32 %v687_v3, %v620_v4  ;;  %v1462_v27 = vadd.f32 %v1454_v1, %v1436_v59  ;;  %v3791_v59 = vld [vmem:[%s4445_s16 + $0x92] sm:$0xff] }
  0x6d   : > { %v1463_v22 = vadd.f32 %v1455_v18, %v1437_v38  ;;  %v1207_v34 = vadd.f32 %v1175_v33, %v1109_v16  ;;  %v981_v48 = vmul.f32 %v5063_v63, %v5040_v17  ;;  %v982_v20 = vmul.f32 %v5063_v63, %v5043_v58  ;;  %v3792_v38 = vld [vmem:[%s4445_s16 + $0x9a] sm:$0xff] }
  0x6e   : > { %v1208_v53 = vadd.f32 %v1176_v30, %v1110_v46  ;;  %v816_v49 = vadd.f32 %v784_v8, %v718_v19  ;;  %v817_v52 = vadd.f32 %v785_v5, %v719_v28  ;;  %v1079_v45 = vmul.f32 %v5072_v47, %v5055_v13  ;;  %v3729_v8 = vld [vmem:[%s4445_s16 + $0xa8] sm:$0xff]  ;;  %v3730_v5 = vld [vmem:[%s4445_s16 + $0xb0] sm:$0xff] }
  0x6f   : > { %v1080_v6 = vmul.f32 %v5072_v47, %v5058_v21  ;;  %v1641_v56 = vpack.c.bf16 %v1463_v22, %v1462_v27  ;;  %v425_v40 = vmul.f32 %v5084_v10, %v4977_v55  ;;  %v426_v44 = vmul.f32 %v5084_v10, %v4980_v43  ;;  %v5104_v43 = vld [vmem:[%s6546_s2 + $0x2] ss:$0 sm:$0xff]  ;;  %v3762_v27 = vld [vmem:[%s4445_s16 + $0xb1] sm:$0xff] }
  0x70   : > { %v1467_v1 = vpack.c.bf16 %v1208_v53, %v1207_v34  ;;  %v914_v18 = vadd.f32 %v882_v62, %v816_v49  ;;  %v915_v35 = vadd.f32 %v883_v51, %v817_v52  ;;  %v1177_v7 = vmul.f32 %v6567_v50, %v3791_v59  ;;  %v3761_v51 = vld [vmem:[%s4445_s16 + $0xa9] sm:$0xff] }
  0x71   : > { %v1178_v61 = vmul.f32 %v6567_v50, %v3792_v38  ;;  %v491_v24 = vmul.f32 %v5095_v41, %v4990_v31  ;;  %v492_v11 = vmul.f32 %v5095_v41, %v4997_v25  ;;  %v589_v50 = vmul.f32 %v5104_v43, %v5007_v54  ;;  %v5114_v31 = vld [vmem:[%s6546_s2 + $0x3] ss:$0 sm:$0xff]  ;;  %v3793_v52 = vld [vmem:[%s4445_s16 + $0xaa] sm:$0xff] }
  0x72   : > { %3882 = vmatmul.msk.bf16.gmra.mxu0 %vm1500_vm0, %v1467_v1  ;;  %v1013_v26 = vadd.f32 %v981_v48, %v914_v18  ;;  %v1014_v36 = vadd.f32 %v982_v20, %v915_v35  ;;  %v590_v32 = vmul.f32 %v5104_v43, %v5010_v42  ;;  %v688_v25 = vmul.f32 %v5114_v31, %v5040_v17  ;;  %v3794_v48 = vld [vmem:[%s4445_s16 + $0xb2] sm:$0xff] }
  0x73   : > { %v523_v2 = vadd.f32 %v491_v24, %v425_v40  ;;  %v524_v12 = vadd.f32 %v492_v11, %v426_v44  ;;  %v689_v54 = vmul.f32 %v5114_v31, %v5043_v58  ;;  %v786_v57 = vmul.f32 %v5033_v23, %v5055_v13 }
  0x74   : > { %v1111_v37 = vadd.f32 %v1079_v45, %v1013_v26  ;;  %v1112_v55 = vadd.f32 %v1080_v6, %v1014_v36  ;;  %v787_v3 = vmul.f32 %v5033_v23, %v5058_v21  ;;  %v884_v33 = vmul.f32 %v5048_v0, %v3791_v59 }
  0x75   : > { %v621_v39 = vadd.f32 %v589_v50, %v523_v2  ;;  %v622_v60 = vadd.f32 %v590_v32, %v524_v12  ;;  %v885_v30 = vmul.f32 %v5048_v0, %v3792_v38  ;;  %v983_v28 = vmul.f32 %v5063_v63, %v3729_v8 }
  0x76   : > { %v1209_v42 = vadd.f32 %v1177_v7, %v1111_v37  ;;  %v1210_v29 = vadd.f32 %v1178_v61, %v1112_v55  ;;  %v984_v62 = vmul.f32 %v5063_v63, %v3730_v5  ;;  %v1081_v53 = vmul.f32 %v5072_v47, %v3761_v51 }
  0x77   : > { %3906 = vmatmul.msk.bf16.gmra.mxu1 %vm1500_vm0, %v1641_v56  ;;  %v720_v14 = vadd.f32 %v688_v25, %v621_v39  ;;  %v721_v15 = vadd.f32 %v689_v54, %v622_v60  ;;  %v1082_v49 = vmul.f32 %v5072_v47, %v3762_v27  ;;  %v427_v20 = vmul.f32 %v5084_v10, %v5040_v17  ;;  %v5150_v17 = vld [vmem:[%s6546_s2 + $0x8] ss:$0 sm:$0xff]  ;;  %v3731_v25 = vld [vmem:[%s4445_s16 + $0xc0] sm:$0xff] }
  0x78   : > { %v1468_v16 = vpack.c.bf16 %v1210_v29, %v1209_v42  ;;  %v428_v1 = vmul.f32 %v5084_v10, %v5043_v58  ;;  %v493_v18 = vmul.f32 %v5095_v41, %v5055_v13  ;;  %v494_v35 = vmul.f32 %v5095_v41, %v5058_v21  ;;  %v3732_v54 = vld [vmem:[%s4445_s16 + $0xc8] sm:$0xff] }
  0x79   : > { %v818_v9 = vadd.f32 %v786_v57, %v720_v14  ;;  %v819_v4 = vadd.f32 %v787_v3, %v721_v15  ;;  %v591_v56 = vmul.f32 %v5104_v43, %v3791_v59  ;;  %v592_v26 = vmul.f32 %v5104_v43, %v3792_v38  ;;  %v3763_v3 = vld [vmem:[%s4445_s16 + $0xc1] sm:$0xff]  ;;  %v3764_v14 = vld [vmem:[%s4445_s16 + $0xc9] sm:$0xff] }
  0x7a   : > { %v525_v45 = vadd.f32 %v493_v18, %v427_v20  ;;  %v526_v6 = vadd.f32 %v494_v35, %v428_v1  ;;  %v1179_v58 = vmul.f32 %v5150_v17, %v3793_v52  ;;  %v1180_v13 = vmul.f32 %v5150_v17, %v3794_v48 }
  0x7b   : > { %v916_v46 = vadd.f32 %v884_v33, %v818_v9  ;;  %v917_v19 = vadd.f32 %v885_v30, %v819_v4  ;;  %v690_v7 = vmul.f32 %v5114_v31, %v3729_v8  ;;  %v691_v59 = vmul.f32 %v5114_v31, %v3730_v5  ;;  %v3795_v4 = vld [vmem:[%s4445_s16 + $0xc2] sm:$0xff] }
  0x7c   : > { %v623_v21 = vadd.f32 %v591_v56, %v525_v45  ;;  %v624_v44 = vadd.f32 %v592_v26, %v526_v6  ;;  %v788_v24 = vmul.f32 %v5033_v23, %v3761_v51  ;;  %v789_v11 = vmul.f32 %v5033_v23, %v3762_v27 }
  0x7d   : > { %v1015_v22 = vadd.f32 %v983_v28, %v916_v46  ;;  %v1016_v34 = vadd.f32 %v984_v62, %v917_v19  ;;  %v886_v2 = vmul.f32 %v5048_v0, %v3793_v52  ;;  %v887_v12 = vmul.f32 %v5048_v0, %v3794_v48 }
  0x7e   : > { %v722_v38 = vadd.f32 %v690_v7, %v623_v21  ;;  %v723_v61 = vadd.f32 %v691_v59, %v624_v44  ;;  %v985_v42 = vmul.f32 %v5063_v63, %v3731_v25  ;;  %v986_v29 = vmul.f32 %v5063_v63, %v3732_v54  ;;  %v5186_v21 = vld [vmem:[%s4445_s16 + $0xd8] sm:$0xff]  ;;  %v5189_v44 = vld [vmem:[%s4445_s16 + $0xe0] sm:$0xff] }
  0x7f   : > { %v1113_v36 = vadd.f32 %v1081_v53, %v1015_v22  ;;  %v1114_v40 = vadd.f32 %v1082_v49, %v1016_v34  ;;  %v1083_v30 = vmul.f32 %v5072_v47, %v3763_v3  ;;  %v1084_v9 = vmul.f32 %v5072_v47, %v3764_v14 }
  0x80   : > { %v820_v50 = vadd.f32 %v788_v24, %v722_v38  ;;  %v821_v32 = vadd.f32 %v789_v11, %v723_v61  ;;  %v429_v46 = vmul.f32 %v5084_v10, %v3729_v8  ;;  %v430_v19 = vmul.f32 %v5084_v10, %v3730_v5  ;;  %v5196_v11 = vld [vmem:[%s4445_s16 + $0xd9] sm:$0xff] }
  0x81   : > { %v1211_v37 = vadd.f32 %v1179_v58, %v1113_v36  ;;  %v1212_v55 = vadd.f32 %v1180_v13, %v1114_v40  ;;  %v495_v22 = vmul.f32 %v5095_v41, %v3761_v51  ;;  %v496_v34 = vmul.f32 %v5095_v41, %v3762_v27 }
  0x82   : > { %3883 = vmatmul.msk.bf16.gmra.mxu0 %vm1500_vm0, %v1468_v16  ;;  %v918_v39 = vadd.f32 %v886_v2, %v820_v50  ;;  %v919_v60 = vadd.f32 %v887_v12, %v821_v32  ;;  %v3796_v16 = vld [vmem:[%s4445_s16 + $0xca] sm:$0xff]  ;;  %v1181_v53 = vmul.f32 %v5150_v17, %v3795_v4  ;;  %v593_v20 = vmul.f32 %v5104_v43, %v3793_v52 }
  0x83   : > { %v1469_v57 = vpack.c.bf16 %v1212_v55, %v1211_v37  ;;  %v1182_v49 = vmul.f32 %v5150_v17, %v3796_v16  ;;  %v594_v1 = vmul.f32 %v5104_v43, %v3794_v48  ;;  %v527_v18 = vadd.f32 %v495_v22, %v429_v46  ;;  %v5199_v37 = vld [vmem:[%s4445_s16 + $0xe1] sm:$0xff] }
  0x84   : > { %v1017_v15 = vadd.f32 %v985_v42, %v918_v39  ;;  %v1018_v33 = vadd.f32 %v986_v29, %v919_v60  ;;  %v528_v35 = vadd.f32 %v496_v34, %v430_v19  ;;  %v692_v8 = vmul.f32 %v5114_v31, %v3731_v25  ;;  %v3797_v39 = vld [vmem:[%s4445_s16 + $0xda] sm:$0xff]  ;;  %v3798_v60 = vld [vmem:[%s4445_s16 + $0xe2] sm:$0xff] }
  0x85   : > { %v693_v5 = vmul.f32 %v5114_v31, %v3732_v54  ;;  %v625_v45 = vadd.f32 %v593_v20, %v527_v18  ;;  %v790_v56 = vmul.f32 %v5033_v23, %v3763_v3  ;;  %v791_v52 = vmul.f32 %v5033_v23, %v3764_v14 }
  0x86   : > { %v1115_v28 = vadd.f32 %v1083_v30, %v1017_v15  ;;  %v1116_v62 = vadd.f32 %v1084_v9, %v1018_v33  ;;  %v626_v51 = vadd.f32 %v594_v1, %v528_v35  ;;  %v888_v36 = vmul.f32 %v5048_v0, %v3795_v4 }
  0x87   : > { %v724_v26 = vadd.f32 %v692_v8, %v625_v45  ;;  %v889_v40 = vmul.f32 %v5048_v0, %v3796_v16  ;;  %v987_v61 = vmul.f32 %v5063_v63, %v5186_v21  ;;  %v988_v24 = vmul.f32 %v5063_v63, %v5189_v44 }
  0x88   : > { %v1213_v6 = vadd.f32 %v1181_v53, %v1115_v28  ;;  %v1214_v27 = vadd.f32 %v1182_v49, %v1116_v62  ;;  %v725_v48 = vadd.f32 %v693_v5, %v626_v51  ;;  %v1085_v32 = vmul.f32 %v5072_v47, %v5196_v11  ;;  %v5231_v51 = vld [vmem:[%s4445_s16 + $0xf0] sm:$0xff] }
  0x89   : > { %v822_v58 = vadd.f32 %v790_v56, %v724_v26  ;;  %v1086_v2 = vmul.f32 %v5072_v47, %v5199_v37  ;;  %v431_v42 = vmul.f32 %v5084_v10, %v3731_v25  ;;  %v432_v29 = vmul.f32 %v5084_v10, %v3732_v54 }
  0x8a   : > { %v823_v13 = vadd.f32 %v791_v52, %v725_v48  ;;  %v1470_v7 = vpack.c.bf16 %v1214_v27, %v1213_v6  ;;  %v498_v15 = vmul.f32 %v5095_v41, %v3764_v14  ;;  %v595_v9 = vmul.f32 %v5104_v43, %v3795_v4  ;;  %v5234_v6 = vld [vmem:[%s4445_s16 + $0xf8] sm:$0xff] }
  0x8b   : > { %v920_v59 = vadd.f32 %v888_v36, %v822_v58  ;;  %v596_v46 = vmul.f32 %v5104_v43, %v3796_v16  ;;  %v1183_v62 = vmul.f32 %v5150_v17, %v3797_v39  ;;  %v1184_v22 = vmul.f32 %v5150_v17, %v3798_v60  ;;  %v5241_v36 = vld [vmem:[%s4445_s16 + $0xf1] sm:$0xff]  ;;  %v5249_v58 = vld [vmem:[%s6549_s5] ss:$0 sm:$0xff] }
  0x8c   : > { %v921_v38 = vadd.f32 %v889_v40, %v823_v13  ;;  %v530_v30 = vadd.f32 %v498_v15, %v432_v29  ;;  %v694_v54 = vmul.f32 %v5114_v31, %v5186_v21  ;;  %v792_v16 = vmul.f32 %v5033_v23, %v5196_v11  ;;  %v5244_v40 = vld [vmem:[%s4445_s16 + $0xf9] sm:$0xff] }
  0x8d   : > { %v1019_v55 = vadd.f32 %v987_v61, %v920_v59  ;;  %v793_v53 = vmul.f32 %v5033_v23, %v5199_v37  ;;  %v890_v5 = vmul.f32 %v5048_v0, %v3797_v39  ;;  %v891_v45 = vmul.f32 %v5048_v0, %v3798_v60 }
  0x8e   : > { %v1020_v50 = vadd.f32 %v988_v24, %v921_v38  ;;  %v628_v25 = vadd.f32 %v596_v46, %v530_v30  ;;  %v989_v56 = vmul.f32 %v5063_v63, %v5231_v51  ;;  %v990_v52 = vmul.f32 %v5063_v63, %v5234_v6  ;;  %v5257_v24 = vld [vmem:[%s4445_s16 + $0xf2] sm:$0xff] }
  0x8f   : > { %v1117_v19 = vadd.f32 %v1085_v32, %v1019_v55  ;;  %v1088_v61 = vmul.f32 %v5072_v47, %v5244_v40  ;;  %v5260_v55 = vld [vmem:[%s4445_s16 + $0xfa] sm:$0xff]  ;;  %v433_v29 = vmul.f32 %v5084_v10, %v5186_v21  ;;  %v1185_v15 = vmul.f32 %v5150_v17, %v5257_v24 }
  0x90   : > { %v1118_v28 = vadd.f32 %v1086_v2, %v1020_v50  ;;  %v499_v30 = vmul.f32 %v5095_v41, %v5196_v11  ;;  %v597_v21 = vmul.f32 %v5104_v43, %v3797_v39  ;;  %v697_v11 = vmul.f32 %v5114_v31, %v5234_v6 }
  0x91   : > { %v1215_v20 = vadd.f32 %v1183_v62, %v1117_v19 }
  0x92   : > { %3884 = vmatmul.msk.bf16.gmra.mxu0 %vm1500_vm0, %v1469_v57  ;;  %v497_v57 = vmul.f32 %v5095_v41, %v3763_v3  ;;  %v695_v3 = vmul.f32 %v5114_v31, %v5189_v44  ;;  %v1216_v1 = vadd.f32 %v1184_v22, %v1118_v28  ;;  %v598_v28 = vmul.f32 %v5104_v43, %v3798_v60 }
  0x93   : > { %v696_v22 = vmul.f32 %v5114_v31, %v5231_v51  ;;  %v794_v60 = vmul.f32 %v5033_v23, %v5241_v36 }
  0x94   : > { %v529_v33 = vadd.f32 %v497_v57, %v431_v42  ;;  %v727_v4 = vadd.f32 %v695_v3, %v628_v25  ;;  %v1471_v26 = vpack.c.bf16 %v1216_v1, %v1215_v20  ;;  %v434_v57 = vmul.f32 %v5084_v10, %v5189_v44 }
  0x95   : > { %v531_v44 = vadd.f32 %v499_v30, %v433_v29  ;;  %v435_v29 = vmul.f32 %v5084_v10, %v5231_v51 }
  0x96   : > { %v627_v34 = vadd.f32 %v595_v9, %v529_v33  ;;  %v825_v8 = vadd.f32 %v793_v53, %v727_v4  ;;  %v1186_v33 = vmul.f32 %v5150_v17, %v5260_v55  ;;  %v500_v9 = vmul.f32 %v5095_v41, %v5199_v37 }
  0x97   : > { %v629_v37 = vadd.f32 %v597_v21, %v531_v44  ;;  %v892_v53 = vmul.f32 %v5048_v0, %v5257_v24 }
  0x98   : > { %v726_v14 = vadd.f32 %v694_v54, %v627_v34  ;;  %v923_v48 = vadd.f32 %v891_v45, %v825_v8  ;;  %v532_v62 = vadd.f32 %v500_v9, %v434_v57  ;;  %v795_v54 = vmul.f32 %v5033_v23, %v5244_v40  ;;  %v5302_v8 = vld [vmem:[%s4445_s16 + $0x110] sm:$0xff] }
  0x99   : > { %v728_v3 = vadd.f32 %v696_v22, %v629_v37  ;;  %v436_v57 = vmul.f32 %v5084_v10, %v5234_v6  ;;  %v599_v6 = vmul.f32 %v5104_v43, %v5257_v24  ;;  %v699_v37 = vmul.f32 %v5114_v31, %v5302_v8 }
  0x9a   : > { %v824_v35 = vadd.f32 %v792_v16, %v726_v14  ;;  %v1022_v38 = vadd.f32 %v990_v52, %v923_v48  ;;  %v630_v34 = vadd.f32 %v598_v28, %v532_v62  ;;  %v992_v52 = vmul.f32 %v5063_v63, %v5302_v8  ;;  %v5312_v48 = vld [vmem:[%s4445_s16 + $0x111] sm:$0xff] }
  0x9b   : > { %v826_v20 = vadd.f32 %v794_v60, %v728_v3 }
  0x9c   : > { %v922_v27 = vadd.f32 %v890_v5, %v824_v35  ;;  %v1120_v46 = vadd.f32 %v1088_v61, %v1022_v38  ;;  %v729_v14 = vadd.f32 %v697_v11, %v630_v34  ;;  %v5299_v35 = vld [vmem:[%s4445_s16 + $0x108] sm:$0xff]  ;;  %v5354_v34 = vld [vmem:[%s6551_s7] ss:$0 sm:$0xff] }
  0x9d   : > { %v924_v45 = vadd.f32 %v892_v53, %v826_v20  ;;  %v698_v11 = vmul.f32 %v5114_v31, %v5299_v35 }
  0x9e   : > { %v1021_v13 = vadd.f32 %v989_v56, %v922_v27  ;;  %v1218_v39 = vadd.f32 %v1186_v33, %v1120_v46  ;;  %v827_v1 = vadd.f32 %v795_v54, %v729_v14  ;;  %v991_v56 = vmul.f32 %v5063_v63, %v5299_v35 }
  0x9f   : > { %v502_v33 = vmul.f32 %v5095_v41, %v5244_v40  ;;  %v600_v40 = vmul.f32 %v5104_v43, %v5260_v55 }
  0xa1   : > { %v534_v51 = vadd.f32 %v502_v33, %v436_v57 }
  0xa2   : > { %3885 = vmatmul.msk.bf16.gmra.mxu0 %vm1500_vm0, %v1470_v7  ;;  %v1087_v7 = vmul.f32 %v5072_v47, %v5241_v36 }
  0xa3   : > { %v632_v24 = vadd.f32 %v600_v40, %v534_v51 }
  0xa4   : > { %v5206_v12 = vpop.f32.mrf.mxu1  ;;  %v1119_v42 = vadd.f32 %v1087_v7, %v1021_v13  ;;  %v5316_v7 = vld [vmem:[%s4445_s16 + $0x10a] sm:$0xff] }
  0xa5   : > { %v1187_v46 = vmul.f32 %v5150_v17, %v5316_v7  ;;  %v731_v3 = vadd.f32 %v699_v37, %v632_v24  ;;  %v601_v40 = vmul.f32 %v5104_v43, %v5316_v7 }
  0xa6   : > { %v1217_v25 = vadd.f32 %v1185_v15, %v1119_v42  ;;  %v501_v15 = vmul.f32 %v5095_v41, %v5241_v36 }
  0xa8   : > { %v1472_v5 = vpack.c.bf16 %v1218_v39, %v1217_v25  ;;  %v533_v28 = vadd.f32 %v501_v15, %v435_v29  ;;  %v797_v39 = vmul.f32 %v5033_v23, %v5312_v48 }
  0xaa   : > { %v631_v22 = vadd.f32 %v599_v6, %v533_v28  ;;  %v829_v20 = vadd.f32 %v797_v39, %v731_v3  ;;  %v504_v6 = vmul.f32 %v5095_v41, %v5312_v48 }
  0xab   : > { %v1558_v49 = vpop.f32.mrf.mxu0 }
  0xac   : > { %v5226_v18 = vpop.f32.mrf.mxu1  ;;  %v1559_v59 = vadd.f32 %v5249_v58, %v1558_v49  ;;  %v893_v49 = vmul.f32 %v5048_v0, %v5260_v55  ;;  %v730_v25 = vadd.f32 %v698_v11, %v631_v22 }
  0xae   : > { %v925_v27 = vadd.f32 %v893_v49, %v827_v1  ;;  %v5365_v1 = vld [vmem:[%s4445_s16 + $0x120] sm:$0xff] }
  0xb0   : > { %v1024_v38 = vadd.f32 %v992_v52, %v925_v27  ;;  %v993_v52 = vmul.f32 %v5063_v63, %v5365_v1 }
  0xb2   : > { %3886 = vmatmul.msk.bf16.gmra.mxu0 %vm1500_vm0, %v1471_v26  ;;  %v5309_v26 = vld [vmem:[%s4445_s16 + $0x109] sm:$0xff] }
  0xb3   : > { %v1560_v50 = vpop.f32.mrf.mxu0  ;;  %v1089_v61 = vmul.f32 %v5072_v47, %v5309_v26  ;;  %v796_v55 = vmul.f32 %v5033_v23, %v5309_v26  ;;  %v503_v28 = vmul.f32 %v5095_v41, %v5309_v26 }
  0xb4   : > { %v1561_v32 = vadd.f32 %v5249_v58, %v1560_v50  ;;  %v5264_v2 = vpop.f32.mrf.mxu1  ;;  %v1090_v50 = vmul.f32 %v5072_v47, %v5312_v48  ;;  %v700_v48 = vmul.f32 %v5114_v31, %v5365_v1 }
  0xb5   : > { %v828_v14 = vadd.f32 %v796_v55, %v730_v25 }
  0xb6   : > { %v5278_v19 = vpack.c.bf16 %v1561_v32, %v1559_v59  ;;  %v1023_v59 = vadd.f32 %v991_v56, %v924_v45  ;;  %v5324_v32 = vld [vmem:[%s4445_s16 + $0x112] sm:$0xff]  ;;  %v1122_v62 = vadd.f32 %v1090_v50, %v1024_v38 }
  0xb7   : > { %v1188_v21 = vmul.f32 %v5150_v17, %v5324_v32  ;;  %v895_v53 = vmul.f32 %v5048_v0, %v5324_v32  ;;  %v602_v22 = vmul.f32 %v5104_v43, %v5324_v32 }
  0xb8   : > { %2429 = vrot.lane.b32.xlu2 %v5278_v19, %s4337_s18  ;;  %v1121_v36 = vadd.f32 %v1089_v61, %v1023_v59  ;;  %v5377_v61 = vld [vmem:[%s4445_s16 + $0x121] sm:$0xff] }
  0xb9   : > { %v1220_v54 = vadd.f32 %v1188_v21, %v1122_v62  ;;  %v927_v59 = vadd.f32 %v895_v53, %v829_v20  ;;  %v1091_v57 = vmul.f32 %v5072_v47, %v5377_v61  ;;  %v438_v21 = vmul.f32 %v5084_v10, %v5302_v8  ;;  %v5420_v20 = vld [vmem:[%s4445_s16 + $0x138] sm:$0xff] }
  0xba   : > { %v1219_v60 = vadd.f32 %v1187_v46, %v1121_v36  ;;  %v437_v46 = vmul.f32 %v5084_v10, %v5299_v35  ;;  %v798_v32 = vmul.f32 %v5033_v23, %v5377_v61 }
  0xbb   : > { %v536_v37 = vadd.f32 %v504_v6, %v438_v21 }
  0xbc   : > { %v1563_v4 = vpop.f32.mrf.mxu0  ;;  %v5292_v16 = vpop.f32.mrf.mxu1  ;;  %v535_v62 = vadd.f32 %v503_v28, %v437_v46  ;;  %v5439_v46 = vld [vmem:[%s4445_s16 + $0x141] sm:$0xff] }
  0xbd   : > { %v1564_v13 = vadd.f32 %v5249_v58, %v1563_v4  ;;  %v894_v4 = vmul.f32 %v5048_v0, %v5316_v7  ;;  %v634_v25 = vadd.f32 %v602_v22, %v536_v37  ;;  %v1094_v6 = vmul.f32 %v5072_v47, %v5439_v46 }
  0xbe   : > { %v633_v26 = vadd.f32 %v601_v40, %v535_v62  ;;  %v3806_v62 = vld [vmem:[%s4445_s16 + $0x142] sm:$0xff]  ;;  %v439_v40 = vmul.f32 %v5084_v10, %v5365_v1 }
  0xbf   : > { %v926_v56 = vadd.f32 %v894_v4, %v828_v14 }
  0xc0   : > { %v732_v7 = vadd.f32 %v700_v48, %v633_v26 }
  0xc1   : > { %v1025_v29 = vadd.f32 %v993_v52, %v926_v56 }
  0xc2   : > { %3887 = vmatmul.msk.bf16.gmra.mxu0 %vm1500_vm0, %v1472_v5  ;;  %v5368_v5 = vld [vmem:[%s4445_s16 + $0x128] sm:$0xff]  ;;  %v830_v3 = vadd.f32 %v798_v32, %v732_v7 }
  0xc3   : > { %v994_v38 = vmul.f32 %v5063_v63, %v5368_v5  ;;  %v1123_v36 = vadd.f32 %v1091_v57, %v1025_v29  ;;  %v701_v24 = vmul.f32 %v5114_v31, %v5368_v5  ;;  %v440_v22 = vmul.f32 %v5084_v10, %v5368_v5 }
  0xc4   : > { %v1565_v42 = vpop.f32.mrf.mxu0  ;;  %v1683_v9 = vpop.f32.mrf.mxu1  ;;  %v1192_v5 = vmul.f32 %v5150_v17, %v3806_v62 }
  0xc5   : > { %v1566_v30 = vadd.f32 %v5249_v58, %v1565_v42  ;;  %v1684_v45 = vadd.f32 %v5354_v34, %v1683_v9  ;;  %v5382_v42 = vld [vmem:[%s4445_s16 + $0x129] sm:$0xff]  ;;  %v1026_v15 = vadd.f32 %v994_v38, %v927_v59 }
  0xc6   : > { %v1092_v33 = vmul.f32 %v5072_v47, %v5382_v42  ;;  %v3804_v9 = vld [vmem:[%s4445_s16 + $0x12a] sm:$0xff]  ;;  %v799_v55 = vmul.f32 %v5033_v23, %v5382_v42 }
  0xc7   : > { %v5341_v44 = vpack.c.bf16 %v1566_v30, %v1564_v13  ;;  %v1473_v13 = vpack.c.bf16 %v1220_v54, %v1219_v60  ;;  %v3803_v30 = vld [vmem:[%s4445_s16 + $0x122] sm:$0xff]  ;;  %v1190_v8 = vmul.f32 %v5150_v17, %v3804_v9  ;;  %v733_v54 = vadd.f32 %v701_v24, %v634_v25 }
  0xc8   : > { %v1124_v11 = vadd.f32 %v1092_v33, %v1026_v15  ;;  %v1189_v35 = vmul.f32 %v5150_v17, %v3803_v30  ;;  %v896_v14 = vmul.f32 %v5048_v0, %v3803_v30  ;;  %v897_v4 = vmul.f32 %v5048_v0, %v3804_v9  ;;  %v5434_v15 = vld [vmem:[%s4445_s16 + $0x139] sm:$0xff] }
  0xc9   : > { %2431 = vrot.lane.b32.xlu0 %v5341_v44, %s4337_s18  ;;  %v1093_v28 = vmul.f32 %v5072_v47, %v5434_v15  ;;  %v603_v48 = vmul.f32 %v5104_v43, %v3803_v30  ;;  %v604_v24 = vmul.f32 %v5104_v43, %v3804_v9  ;;  %v800_v9 = vmul.f32 %v5033_v23, %v5434_v15 }
  0xca   : > { %v1221_v39 = vadd.f32 %v1189_v35, %v1123_v36  ;;  %v1222_v60 = vadd.f32 %v1190_v8, %v1124_v11  ;;  %v928_v52 = vadd.f32 %v896_v14, %v830_v3  ;;  %v3805_v36 = vld [vmem:[%s4445_s16 + $0x13a] sm:$0xff]  ;;  %v505_v11 = vmul.f32 %v5095_v41, %v5377_v61 }
  0xcb   : > { %v506_v8 = vmul.f32 %v5095_v41, %v5382_v42  ;;  %v1191_v1 = vmul.f32 %v5150_v17, %v3805_v36  ;;  %v702_v42 = vmul.f32 %v5114_v31, %v5420_v20 }
  0xcc   : > { %v1685_v49 = vpop.f32.mrf.mxu1  ;;  %v1474_v38 = vpack.c.bf16 %v1222_v60, %v1221_v39  ;;  %v537_v26 = vadd.f32 %v505_v11, %v439_v40  ;;  %v801_v60 = vmul.f32 %v5033_v23, %v5439_v46  ;;  %v3775_v40 = vld [vmem:[%s4445_s16 + $0x151] sm:$0xff] }
  0xcd   : > { %v1686_v27 = vadd.f32 %v5354_v34, %v1685_v49  ;;  %v831_v49 = vadd.f32 %v799_v55, %v733_v54  ;;  %v538_v32 = vadd.f32 %v506_v8, %v440_v22  ;;  %v3776_v8 = vld [vmem:[%s4445_s16 + $0x159] sm:$0xff] }
  0xce   : > { %v635_v61 = vadd.f32 %v603_v48, %v537_v26  ;;  %v1096_v48 = vmul.f32 %v5072_v47, %v3776_v8 }
  0xcf   : > { %v5379_v50 = vpack.c.bf16 %v1686_v27, %v1684_v45  ;;  %v5423_v45 = vld [vmem:[%s4445_s16 + $0x140] sm:$0xff]  ;;  %v929_v29 = vadd.f32 %v897_v4, %v831_v49  ;;  %v636_v30 = vadd.f32 %v604_v24, %v538_v32  ;;  %v899_v49 = vmul.f32 %v5048_v0, %v3806_v62  ;;  %v3807_v24 = vld [vmem:[%s4445_s16 + $0x152] sm:$0xff] }
  0xd0   : > { %v996_v57 = vmul.f32 %v5063_v63, %v5423_v45  ;;  %v703_v55 = vmul.f32 %v5114_v31, %v5423_v45  ;;  %v734_v39 = vadd.f32 %v702_v42, %v635_v61  ;;  %v507_v32 = vmul.f32 %v5095_v41, %v5434_v15 }
  0xd1   : > { %2461 = vrot.lane.b32.xlu1 %v5379_v50, %s4337_s18  ;;  %2246 = vrot.lane.b32.xlu0 %v5379_v50, %s4338_s21  ;;  %v508_v42 = vmul.f32 %v5095_v41, %v5439_v46 }
  0xd2   : > { %3888 = vmatmul.msk.bf16.gmra.mxu0 %vm1500_vm0, %v1473_v13  ;;  %v995_v13 = vmul.f32 %v5063_v63, %v5420_v20  ;;  %v735_v14 = vadd.f32 %v703_v55, %v636_v30  ;;  %v832_v4 = vadd.f32 %v800_v9, %v734_v39  ;;  %v605_v39 = vmul.f32 %v5104_v43, %v3805_v36 }
  0xd3   : > { %v606_v9 = vmul.f32 %v5104_v43, %v3806_v62  ;;  %v803_v43 = vmul.f32 %v5033_v23, %v3776_v8  ;;  %v3777_v8 = vld [vmem:[%s4445_s16 + $0x169] sm:$0xff] }
  0xd4   : > { %v1688_v51 = vpop.f32.mrf.mxu1  ;;  %v1027_v21 = vadd.f32 %v995_v13, %v928_v52  ;;  %v3743_v52 = vld [vmem:[%s4445_s16 + $0x150] sm:$0xff]  ;;  %v3744_v13 = vld [vmem:[%s4445_s16 + $0x158] sm:$0xff] }
  0xd5   : > { %v1689_v27 = vadd.f32 %v5354_v34, %v1688_v51  ;;  %v1028_v51 = vadd.f32 %v996_v57, %v929_v29  ;;  %v704_v15 = vmul.f32 %v5114_v31, %v3743_v52  ;;  %v705_v41 = vmul.f32 %v5114_v31, %v3744_v13  ;;  %v3746_v31 = vld [vmem:[%s4445_s16 + $0x170] sm:$0xff] }
  0xd6   : > { %v1125_v37 = vadd.f32 %v1093_v28, %v1027_v21  ;;  %v997_v21 = vmul.f32 %v5063_v63, %v3743_v52 }
  0xd7   : > { %v1126_v7 = vadd.f32 %v1094_v6, %v1028_v51  ;;  %v998_v6 = vmul.f32 %v5063_v63, %v3744_v13 }
  0xd8   : > { %v1223_v54 = vadd.f32 %v1191_v1, %v1125_v37  ;;  %v1095_v37 = vmul.f32 %v5072_v47, %v3775_v40  ;;  %v441_v1 = vmul.f32 %v5084_v10, %v5420_v20 }
  0xd9   : > { %v1224_v3 = vadd.f32 %v1192_v5, %v1126_v7  ;;  %v3808_v7 = vld [vmem:[%s4445_s16 + $0x15a] sm:$0xff]  ;;  %v442_v5 = vmul.f32 %v5084_v10, %v5423_v45 }
  0xda   : > { %v539_v30 = vadd.f32 %v507_v32, %v441_v1  ;;  %v1194_v20 = vmul.f32 %v5150_v17, %v3808_v7 }
  0xdb   : > { %v1475_v28 = vpack.c.bf16 %v1224_v3, %v1223_v54  ;;  %v1193_v54 = vmul.f32 %v5150_v17, %v3807_v24  ;;  %v540_v3 = vadd.f32 %v508_v42, %v442_v5 }
  0xdc   : > { %v1690_v53 = vpop.f32.mrf.mxu1  ;;  %v637_v45 = vadd.f32 %v605_v39, %v539_v30 }
  0xdd   : > { %v1691_v56 = vadd.f32 %v5354_v34, %v1690_v53  ;;  %v898_v53 = vmul.f32 %v5048_v0, %v3805_v36  ;;  %v638_v46 = vadd.f32 %v606_v9, %v540_v3  ;;  %v802_v36 = vmul.f32 %v5033_v23, %v3775_v40 }
  0xde   : > { %v5429_v59 = vpop.f32.mrf.mxu0 }
  0xdf   : > { %v5436_v33 = vpack.c.bf16 %v1691_v56, %v1689_v27  ;;  %v833_v56 = vadd.f32 %v801_v60, %v735_v14  ;;  %v930_v57 = vadd.f32 %v898_v53, %v832_v4  ;;  %v736_v14 = vadd.f32 %v704_v15, %v637_v45 }
  0xe0   : > { %v737_v53 = vadd.f32 %v705_v41, %v638_v46 }
  0xe1   : > { %2463 = vrot.lane.b32.xlu0 %v5436_v33, %s4337_s18  ;;  %2248 = vrot.lane.b32.xlu2 %v5436_v33, %s4338_s21  ;;  %v931_v51 = vadd.f32 %v899_v49, %v833_v56  ;;  %v834_v49 = vadd.f32 %v802_v36, %v736_v14  ;;  %v901_v56 = vmul.f32 %v5048_v0, %v3808_v7  ;;  %v3810_v7 = vld [vmem:[%s4445_s16 + $0x172] sm:$0xff] }
  0xe2   : > { %3889 = vmatmul.msk.bf16.gmra.mxu0 %vm1500_vm0, %v1474_v38  ;;  %v835_v52 = vadd.f32 %v803_v43, %v737_v53  ;;  %v1196_v42 = vmul.f32 %v5150_v17, %v3810_v7 }
  0xe3   : > { %v1030_v26 = vadd.f32 %v998_v6, %v931_v51 }
  0xe4   : > { %v1693_v35 = vpop.f32.mrf.mxu1  ;;  %v933_v6 = vadd.f32 %v901_v56, %v835_v52 }
  0xe5   : > { %v1694_v38 = vadd.f32 %v5354_v34, %v1693_v35  ;;  %v1029_v35 = vadd.f32 %v997_v21, %v930_v57  ;;  %v1128_v60 = vadd.f32 %v1096_v48, %v1030_v26 }
  0xe6   : > { %v5462_v25 = vpop.f32.mrf.mxu0 }
  0xe7   : > { %v1127_v55 = vadd.f32 %v1095_v37, %v1029_v35  ;;  %v1226_v4 = vadd.f32 %v1194_v20, %v1128_v60  ;;  %v3778_v35 = vld [vmem:[%s4445_s16 + $0x171] sm:$0xff] }
  0xe8   : > { %v1098_v48 = vmul.f32 %v5072_v47, %v3778_v35 }
  0xe9   : > { %v1225_v62 = vadd.f32 %v1193_v54, %v1127_v55 }
  0xeb   : > { %v1476_v21 = vpack.c.bf16 %v1226_v4, %v1225_v62  ;;  %v1571_v4 = vadd.f32 %v5249_v58, %v5462_v25 }
  0xec   : > { %v1695_v27 = vpop.f32.mrf.mxu1 }
  0xed   : > { %v1696_v29 = vadd.f32 %v5354_v34, %v1695_v27  ;;  %v900_v27 = vmul.f32 %v5048_v0, %v3807_v24  ;;  %v1000_v0 = vmul.f32 %v5063_v63, %v3746_v31  ;;  %v3809_v24 = vld [vmem:[%s4445_s16 + $0x16a] sm:$0xff] }
  0xef   : > { %v5483_v22 = vpack.c.bf16 %v1696_v29, %v1694_v38  ;;  %v5485_v11 = vpop.f32.mrf.mxu0  ;;  %v3745_v29 = vld [vmem:[%s4445_s16 + $0x168] sm:$0xff]  ;;  %v932_v23 = vadd.f32 %v900_v27, %v834_v49  ;;  %v1032_v26 = vadd.f32 %v1000_v0, %v933_v6  ;;  %s4339_s16 = smov 80  }
  0xf0   : > { %v999_v40 = vmul.f32 %v5063_v63, %v3745_v29  ;;  %v1097_v63 = vmul.f32 %v5072_v47, %v3777_v8  ;;  %v1776_v47 = vsel %vm1723_vm1, %v5436_v33, 0 }
  0xf1   : > { %2250 = vrot.lane.b32.xlu1 %v5483_v22, %s4338_s21  ;;  %2465 = vrot.lane.b32.xlu2 %v5483_v22, %s4337_s18  ;;  %v1130_v32 = vadd.f32 %v1098_v48, %v1032_v26  ;;  %v1779_v55 = vsel %vm1723_vm1, %v5483_v22, 0 }
  0xf2   : > { %3890 = vmatmul.msk.bf16.gmra.mxu0 %vm1500_vm0, %v1475_v28  ;;  %v1031_v37 = vadd.f32 %v999_v40, %v932_v23 }
  0xf3   : > { %v1228_v39 = vadd.f32 %v1196_v42, %v1130_v32 }
  0xf4   : > { %v1698_v61 = vpop.f32.mrf.mxu1  ;;  %v1129_v5 = vadd.f32 %v1097_v63, %v1031_v37 }
  0xf5   : > { %v1699_v13 = vadd.f32 %v5354_v34, %v1698_v61  ;;  %v1195_v61 = vmul.f32 %v5150_v17, %v3809_v24  ;;  %v1773_v17 = vsel %vm1723_vm1, %v5379_v50, 0 }
  0xf7   : > { %v5509_v10 = vpop.f32.mrf.mxu0  ;;  %v1227_v30 = vadd.f32 %v1195_v61, %v1129_v5 }
  0xf8   : > { %v1576_v25 = vadd.f32 %v5249_v58, %v5509_v10 }
  0xf9   : > { %v1477_v60 = vpack.c.bf16 %v1228_v39, %v1227_v30 }
  0xfc   : > { %v1700_v38 = vpop.f32.mrf.mxu1 }
  0xfd   : > { %v1701_v57 = vadd.f32 %v5354_v34, %v1700_v38 }
  0xff   : > { %v5521_v28 = vpack.c.bf16 %v1701_v57, %v1699_v13  ;;  %v1578_v51 = vpop.f32.mrf.mxu0 }
 0x100   : > { %v1579_v20 = vadd.f32 %v5249_v58, %v1578_v51 }
 0x101   : > { %2467 = vrot.lane.b32.xlu1 %v5521_v28, %s4337_s18  ;;  %2252 = vrot.lane.b32.xlu0 %v5521_v28, %s4338_s21  ;;  %v1782_v34 = vsel %vm1723_vm1, %v5521_v28, 0 }
 0x102   : > { %1788 = vmatpush.bf16.xpose.msra.mxu1 %v1782_v34  ;;  %4022 = vmatpush.bf16.xpose.msra.mxu2 %v1782_v34 }
 0x103   : > { %3891 = vmatmul.msk.bf16.gmra.mxu0 %vm1500_vm0, %v1476_v21 }
 0x107   : > { %v1580_v1 = vpop.f32.mrf.mxu0 }
 0x108   : > { %v1581_v3 = vadd.f32 %v5249_v58, %v1580_v1 }
 0x10a   : > { %1789 = vmatpush.bf16.xpose.msra.mxu1 %v1779_v55  ;;  %4023 = vmatpush.bf16.xpose.msra.mxu2 %v1779_v55  ;;  %v5549_v45 = vpack.c.bf16 %v1581_v3, %v1579_v20 }
 0x10f   : > { %v1583_v9 = vpop.f32.mrf.mxu0 }
 0x110   : > { %v1584_v46 = vadd.f32 %v5249_v58, %v1583_v9 }
 0x112   : > { %1790 = vmatpush.bf16.xpose.msra.mxu1 %v1776_v47  ;;  %4024 = vmatpush.bf16.xpose.msra.mxu2 %v1776_v47  ;;  %v5603_v63 = vpop.permute.xlu2 %2429 }
 0x113   : > { %3892 = vmatmul.msk.bf16.gmra.mxu0 %vm1500_vm0, %v1477_v60 }
 0x117   : > { %v1585_v54 = vpop.f32.mrf.mxu0 }
 0x118   : > { %v1586_v14 = vadd.f32 %v5249_v58, %v1585_v54 }
 0x11a   : > { %1791 = vmatpush.bf16.xpose.msra.mxu1 %v1773_v17  ;;  %4025 = vmatpush.bf16.xpose.msra.mxu2 %v1773_v17  ;;  %v5557_v36 = vpack.c.bf16 %v1586_v14, %v1584_v46 }
 0x11f   : > { %v1588_v15 = vpop.f32.mrf.mxu0 }
 0x120   : > { %v1589_v53 = vadd.f32 %v5249_v58, %v1588_v15 }
 0x121   : > { %3907 = vmatmul.msk.bf16.vlgmr.msra.gmra.mxu1 %vm1723_vm1, %v5278_v19  ;;  %3911 = vmatmul.msk.bf16.vlgmr.msra.gmra.mxu2 %vm1723_vm1, %v5549_v45  ;;  %v1569_v19 = vadd.f32 %v5249_v58, %v5429_v59  ;;  %v1574_v59 = vadd.f32 %v5249_v58, %v5485_v11 }
 0x123   : > { %v5569_v27 = vpack.c.bf16 %v1571_v4, %v1569_v19  ;;  %v5583_v31 = vpack.c.bf16 %v1576_v25, %v1574_v59 }
 0x127   : > { %v1590_v41 = vpop.f32.mrf.mxu0 }
 0x128   : > { %v1591_v49 = vadd.f32 %v5249_v58, %v1590_v41 }
 0x12a   : > { %v5571_v56 = vpack.c.bf16 %v1591_v49, %v1589_v53 }
 0x12f   : > { %v1593_v43 = vpop.f32.mrf.mxu0 }
 0x130   : > { %v1594_v52 = vadd.f32 %v5249_v58, %v1593_v43 }
 0x131   : > { %3908 = vmatmul.msk.bf16.gmra.mxu1 %vm1723_vm1, %v5341_v44  ;;  %3912 = vmatmul.msk.bf16.gmra.mxu2 %vm1723_vm1, %v5557_v36 }
 0x137   : > { %v1595_v62 = vpop.f32.mrf.mxu0 }
 0x138   : > { %v1596_v29 = vadd.f32 %v5249_v58, %v1595_v62 }
 0x13a   : > { %v5585_v13 = vpack.c.bf16 %v1596_v29, %v1594_v52 }
 0x13b   : > { %v5591_v11 = vpop.permute.xlu0 %2431  ;;  %v2249_v32 = vpop.permute.xlu2 %2248 }
 0x13f   : > { %v1598_v38 = vpop.f32.mrf.mxu0 }
 0x140   : > { %v1599_v10 = vadd.f32 %v5249_v58, %v1598_v38 }
 0x141   : > { %3913 = vmatmul.msk.bf16.gmra.mxu2 %vm1723_vm1, %v5571_v56  ;;  %3909 = vmatmul.msk.bf16.gmra.mxu1 %vm1723_vm1, %v5569_v27 }
 0x143   : > { %v2247_v40 = vpop.permute.xlu0 %2246  ;;  %v2462_v37 = vpop.permute.xlu1 %2461 }
 0x144   : > { %v2518_v15 = vsel %vm1723_vm1, %v2462_v37, 0 }
 0x147   : > { %v1600_v44 = vpop.f32.mrf.mxu0 }
 0x148   : > { %v1601_v23 = vadd.f32 %v5249_v58, %v1600_v44 }
 0x14a   : > { %v5595_v51 = vpack.c.bf16 %v1601_v23, %v1599_v10  ;;  %v1629_v10 = vadd.f32 %v5249_v58, %v5206_v12  ;;  %v1634_v12 = vadd.f32 %v5249_v58, %v5264_v2 }
 0x14b   : > { %v2466_v39 = vpop.permute.xlu2 %2465 }
 0x14c   : > { %v2524_v9 = vsel %vm1723_vm1, %v2466_v39, 0 }
 0x14f   : > { %v1603_v57 = vpop.f32.mrf.mxu0 }
 0x150   : > { %v1604_v0 = vadd.f32 %v5249_v58, %v1603_v57 }
 0x151   : > { %3914 = vmatmul.msk.bf16.gmra.mxu2 %vm1723_vm1, %v5585_v13  ;;  %3910 = vmatmul.msk.bf16.gmra.mxu1 %vm1723_vm1, %v5583_v31 }
 0x153   : > { %v2464_v34 = vpop.permute.xlu0 %2463 }
 0x154   : > { %v2521_v17 = vsel %vm1723_vm1, %v2464_v34, 0 }
 0x157   : > { %v1605_v21 = vpop.f32.mrf.mxu0 }
 0x158   : > { %v1606_v8 = vadd.f32 %v5249_v58, %v1605_v21  ;;  %v1631_v21 = vadd.f32 %v5249_v58, %v5226_v18 }
 0x15a   : > { %v5601_v26 = vpack.c.bf16 %v1606_v8, %v1604_v0 }
 0x15f   : > { %v1608_v6 = vpop.f32.mrf.mxu0 }
 0x160   : > { %v1609_v1 = vadd.f32 %v5249_v58, %v1608_v6  ;;  %v5645_v6 = vpack.c.bf16 %v1631_v21, %v1629_v10 }
 0x161   : > { %3915 = vmatmul.msk.bf16.gmra.mxu2 %vm1723_vm1, %v5595_v51 }
 0x163   : > { %v2251_v7 = vpop.permute.xlu1 %2250 }
 0x167   : > { %v1610_v35 = vpop.f32.mrf.mxu0 }
 0x168   : > { %v1611_v5 = vadd.f32 %v5249_v58, %v1610_v35 }
 0x16a   : > { %v5609_v42 = vpack.c.bf16 %v1611_v5, %v1609_v1 }
 0x16f   : > { %v1613_v24 = vpop.f32.mrf.mxu0 }
 0x170   : > { %v1614_v47 = vadd.f32 %v5249_v58, %v1613_v24 }
 0x171   : > { %3916 = vmatmul.msk.bf16.gmra.mxu2 %vm1723_vm1, %v5601_v26 }
 0x173   : > { %v2253_v48 = vpop.permute.xlu0 %2252  ;;  %v2468_v61 = vpop.permute.xlu1 %2467 }
 0x174   : > { %2310 = vmatpush.bf16.msrb.mxu1 %v2253_v48  ;;  %4026 = vmatpush.bf16.msra.mxu3 %v2253_v48  ;;  %v2527_v30 = vsel %vm1723_vm1, %v2468_v61, 0 }
 0x177   : > { %v1615_v55 = vpop.f32.mrf.mxu0 }
 0x178   : > { %2311 = vmatpush.bf16.msrb.mxu1 %v2251_v7  ;;  %4027 = vmatpush.bf16.msra.mxu3 %v2251_v7  ;;  %v1616_v54 = vadd.f32 %v5249_v58, %v1615_v55 }
 0x17a   : > { %v5617_v20 = vpack.c.bf16 %v1616_v54, %v1614_v47 }
 0x17c   : > { %2312 = vmatpush.bf16.msrb.mxu1 %v2249_v32  ;;  %4028 = vmatpush.bf16.msra.mxu3 %v2249_v32 }
 0x180   : > { %2313 = vmatpush.bf16.msrb.mxu1 %v2247_v40  ;;  %4029 = vmatpush.bf16.msra.mxu3 %v2247_v40  ;;  %v1618_v60 = vpop.f32.mrf.mxu0 }
 0x181   : > { %3917 = vmatmul.msk.bf16.gmra.mxu2 %vm1723_vm1, %v5609_v42  ;;  %v1619_v41 = vadd.f32 %v5249_v58, %v1618_v60 }
 0x184   : > { %2533 = vmatpush.bf16.xpose.msra.mxu1 %v2527_v30 }
 0x188   : > { %v1620_v3 = vpop.f32.mrf.mxu0 }
 0x189   : > { %v1621_v46 = vadd.f32 %v5249_v58, %v1620_v3 }
 0x18b   : > { %v5625_v43 = vpack.c.bf16 %v1621_v46, %v1619_v41 }
 0x18c   : > { %2534 = vmatpush.bf16.xpose.msra.mxu1 %v2524_v9 }
 0x190   : > { %v1623_v14 = vpop.f32.mrf.mxu0 }
 0x191   : > { %3918 = vmatmul.msk.bf16.gmra.mxu2 %vm1723_vm1, %v5617_v20  ;;  %v1624_v38 = vadd.f32 %v5249_v58, %v1623_v14 }
 0x194   : > { %2535 = vmatpush.bf16.xpose.msra.mxu1 %v2521_v17 }
 0x198   : > { %v1625_v53 = vpop.f32.mrf.mxu0 }
 0x199   : > { %v1626_v44 = vadd.f32 %v5249_v58, %v1625_v53 }
 0x19b   : > { %v5633_v59 = vpack.c.bf16 %v1626_v44, %v1624_v38 }
 0x19c   : > { %2536 = vmatpush.bf16.xpose.msra.mxu1 %v2518_v15 }
 0x19e   : > { %v1793_v62 = vpop.f32.mrf.mxu1 }
 0x19f   : > { %v1874_v19 = vsel %vm1873_vm2, %v1793_v62, -inf }
 0x1a0   : > { %1875 = vmax.xlane.f32.xlu0 %v1874_v19 }
 0x1a1   : > { %3919 = vmatmul.msk.bf16.gmra.mxu2 %vm1723_vm1, %v5625_v43 }
 0x1a4   : > { %v5670_v7 = vpop.f32.mrf.mxu2 }
 0x1a5   : > { %v1898_v53 = vsel %vm1873_vm2, %v5670_v7, -inf }
 0x1a6   : > { %v1795_v4 = vpop.f32.mrf.mxu1 }
 0x1a7   : > { %v1877_v49 = vsel %vm1873_vm2, %v1795_v4, -inf }
 0x1a8   : > { %1878 = vmax.xlane.f32.xlu0 %v1877_v49 }
 0x1ac   : > { %v5677_v30 = vpop.f32.mrf.mxu2 }
 0x1ad   : > { %v1901_v60 = vsel %vm1873_vm2, %v5677_v30, -inf }
 0x1ae   : > { %v1798_v25 = vpop.f32.mrf.mxu1 }
 0x1af   : > { %v1880_v52 = vsel %vm1873_vm2, %v1798_v25, -inf }
 0x1b0   : > { %1881 = vmax.xlane.f32.xlu1 %v1880_v52 }
 0x1b1   : > { %3920 = vmatmul.msk.bf16.gmra.mxu2 %vm1723_vm1, %v5633_v59 }
 0x1b4   : > { %v5685_v3 = vpop.f32.mrf.mxu2 }
 0x1b5   : > { %v1904_v15 = vsel %vm1873_vm2, %v5685_v3, -inf }
 0x1b6   : > { %v1800_v29 = vpop.f32.mrf.mxu1 }
 0x1b7   : > { %v1883_v57 = vsel %vm1873_vm2, %v1800_v29, -inf }
 0x1b8   : > { %1884 = vmax.xlane.f32.xlu1 %v1883_v57 }
 0x1bc   : > { %2435 = vrot.lane.b32.xlu0 %v5583_v31, %s4337_s18  ;;  %v1636_v31 = vadd.f32 %v5249_v58, %v5292_v16  ;;  %v5698_v19 = vpop.f32.mrf.mxu2 }
 0x1bd   : > { %v1907_v38 = vsel %vm1873_vm2, %v5698_v19, -inf }
 0x1be   : > { %v1803_v23 = vpop.f32.mrf.mxu1  ;;  %v5658_v8 = vpack.c.bf16 %v1636_v31, %v1634_v12 }
 0x1bf   : > { %v1886_v40 = vsel %vm1873_vm2, %v1803_v23, -inf }
 0x1c0   : > { %1887 = vmax.xlane.f32.xlu2 %v1886_v40 }
 0x1c1   : > { %3921 = vmatmul.msk.bf16.gmra.mxu2 %vm1723_vm1, %v5645_v6 }
 0x1c6   : > { %v5650_v0 = vpop.f32.mrf.mxu1 }
 0x1c7   : > { %v1889_v18 = vsel %vm1873_vm2, %v5650_v0, -inf }
 0x1c8   : > { %1890 = vmax.xlane.f32.xlu2 %v1889_v18 }
 0x1d1   : > { %3922 = vmatmul.msk.bf16.gmra.mxu2 %vm1723_vm1, %v5658_v8  ;;  %2437 = vrot.lane.b32.xlu1 %v5549_v45, %s4337_s18  ;;  %v5672_v45 = vpop.f32.mrf.mxu1 }
 0x1d2   : > { %v1892_v5 = vsel %vm1873_vm2, %v5672_v45, -inf }
 0x1d9   : > { %v5702_v49 = vpop.f32.mrf.mxu1 }
 0x1e0   : > { %2433 = vrot.lane.b32.xlu2 %v5569_v27, %s4337_s18 }
 0x213   : > { %v1876_v35 = vpop.xlane.xlu0 %1875 }
 0x214   : > { %v1970_v34 = vsub.f32 %v1793_v62, %v1876_v35 }
 0x216   : > { %v2002_v37 = vmul.f32 1.442695, %v1970_v34 }
 0x218   : > { %4064 = vpow2.f32 %v2002_v37 }
 0x21b   : > { %v1879_v48 = vpop.xlane.xlu0 %1878 }
 0x21c   : > { %v1971_v16 = vsub.f32 %v1795_v4, %v1879_v48 }
 0x21e   : > { %v5666_v24 = vpop.eup %4064  ;;  %v2004_v58 = vmul.f32 1.442695, %v1971_v16 }
 0x21f   : > { %v2066_v2 = vsel %vm1873_vm2, %v5666_v24, 0.0 }
 0x220   : > { %4066 = vpow2.f32 %v2004_v58  ;;  %2067 = vadd.xlane.f32.xlu1 %v2066_v2 }
 0x223   : > { %v1882_v1 = vpop.xlane.xlu1 %1881 }
 0x224   : > { %v1972_v27 = vsub.f32 %v1798_v25, %v1882_v1 }
 0x226   : > { %v4067_v32 = vpop.eup %4066  ;;  %v2006_v61 = vmul.f32 1.442695, %v1972_v27 }
 0x227   : > { %v2069_v55 = vsel %vm1873_vm2, %v4067_v32, 0.0 }
 0x228   : > { %4068 = vpow2.f32 %v2006_v61  ;;  %2070 = vadd.xlane.f32.xlu2 %v2069_v55  ;;  %1893 = vmax.xlane.f32.xlu1 %v1892_v5 }
 0x22b   : > { %v1885_v39 = vpop.xlane.xlu1 %1884 }
 0x22c   : > { %v1973_v9 = vsub.f32 %v1800_v29, %v1885_v39 }
 0x22e   : > { %v5681_v47 = vpop.eup %4068  ;;  %v2008_v54 = vmul.f32 1.442695, %v1973_v9  ;;  %v5734_v31 = vpop.permute.xlu0 %2435 }
 0x22f   : > { %v2072_v17 = vsel %vm1873_vm2, %v5681_v47, 0.0 }
 0x230   : > { %4070 = vpow2.f32 %v2008_v54  ;;  %2073 = vadd.xlane.f32.xlu0 %v2072_v17  ;;  %1902 = vmax.xlane.f32.xlu1 %v1901_v60 }
 0x233   : > { %v1888_v14 = vpop.xlane.xlu2 %1887 }
 0x234   : > { %v1974_v62 = vsub.f32 %v1803_v23, %v1888_v14 }
 0x236   : > { %v4071_v41 = vpop.eup %4070  ;;  %v2010_v4 = vmul.f32 1.442695, %v1974_v62 }
 0x237   : > { %v2075_v46 = vsel %vm1873_vm2, %v4071_v41, 0.0 }
 0x238   : > { %2076 = vadd.xlane.f32.xlu2 %v2075_v46  ;;  %1905 = vmax.xlane.f32.xlu1 %v1904_v15  ;;  %4072 = vpow2.f32 %v2010_v4 }
 0x23b   : > { %v5718_v52 = vpop.xlane.xlu2 %1890 }
 0x243   : > { %v5722_v57 = vpop.permute.xlu1 %2437  ;;  %v5728_v10 = vpop.permute.xlu2 %2433 }
 0x244   : > { %2441 = vrot.lane.b32.xlu0 %v5571_v56, %s4337_s18  ;;  %v5704_v56 = vpop.f32.mrf.mxu2 }
 0x245   : > { %v1910_v25 = vsel %vm1873_vm2, %v5704_v56, -inf }
 0x24c   : > { %2443 = vrot.lane.b32.xlu0 %v5585_v13, %s4337_s18  ;;  %v5706_v13 = vpop.eup %4072  ;;  %v5714_v44 = vpop.f32.mrf.mxu2 }
 0x24d   : > { %v1913_v39 = vsel %vm1873_vm2, %v5714_v44, -inf }
 0x250   : > { %2439 = vrot.lane.b32.xlu2 %v5557_v36, %s4337_s18  ;;  %v1895_v36 = vsel %vm1873_vm2, %v5702_v49, -inf }
 0x251   : > { %2447 = vrot.lane.b32.xlu1 %v5601_v26, %s4337_s18  ;;  %v2078_v26 = vsel %vm1873_vm2, %v5706_v13, 0.0 }
 0x254   : > { %v5720_v29 = vpop.f32.mrf.mxu2 }
 0x255   : > { %v1916_v21 = vsel %vm1873_vm2, %v5720_v29, -inf }
 0x276   : > { %1899 = vmax.xlane.f32.xlu0 %v1898_v53 }
 0x279   : > { %1896 = vmax.xlane.f32.xlu2 %v1895_v36 }
 0x27b   : > { %2079 = vadd.xlane.f32.xlu1 %v2078_v26 }
 0x27e   : > { %1908 = vmax.xlane.f32.xlu0 %v1907_v38 }
 0x286   : > { %1911 = vmax.xlane.f32.xlu0 %v1910_v25 }
 0x28e   : > { %1917 = vmax.xlane.f32.xlu0 %v1916_v21 }
 0x291   : > { %2445 = vrot.lane.b32.xlu2 %v5595_v51, %s4337_s18  ;;  %v5737_v51 = vpop.f32.mrf.mxu2 }
 0x292   : > { %v1919_v54 = vsel %vm1873_vm2, %v5737_v51, -inf }
 0x293   : > { %v2068_v23 = vpop.xlane.xlu1 %2067 }
 0x294   : > { %2449 = vrot.lane.b32.xlu1 %v5609_v42, %s4337_s18  ;;  %4074 = vrcp.f32 %v2068_v23 }
 0x299   : > { %v5740_v1 = vpop.f32.mrf.mxu2 }
 0x29a   : > { %v4075_v12 = vpop.eup %4074 }
 0x29b   : > { %v2071_v40 = vpop.xlane.xlu2 %2070  ;;  %v5732_v18 = vpop.xlane.xlu1 %1893  ;;  %v2194_v34 = vmul.f32 %v4075_v12, %v5666_v24 }
 0x29c   : > { %4076 = vrcp.f32 %v2071_v40 }
 0x2a1   : > { %v5747_v60 = vpop.f32.mrf.mxu2 }
 0x2a2   : > { %v4077_v35 = vpop.eup %4076 }
 0x2a3   : > { %v2195_v37 = vmul.f32 %v4077_v35, %v4067_v32  ;;  %v2074_v16 = vpop.xlane.xlu0 %2073  ;;  %v1903_v58 = vpop.xlane.xlu1 %1902  ;;  %v1922_v35 = vsel %vm1873_vm2, %v5740_v1, -inf }
 0x2a4   : > { %4078 = vrcp.f32 %v2074_v16 }
 0x2a5   : > { %v2226_v48 = vpack.c.bf16 %v2195_v37, %v2194_v34  ;;  %v4018_v37 = vld [vmem:[%s6552_s8] sm:$0xff] }
 0x2a6   : > { %3357 = vmatpush.bf16.msrb.mxu2 %v4018_v37 }
 0x2a7   : > { %3923 = vmatmul.msk.bf16.vlgmr.msrb.gmra.mxu1 %vm1873_vm2, %v2226_v48  ;;  %v1975_v48 = vsub.f32 %v5650_v0, %v5718_v52 }
 0x2a9   : > { %v2012_v16 = vmul.f32 1.442695, %v1975_v48 }
 0x2aa   : > { %v4079_v2 = vpop.eup %4078 }
 0x2ab   : > { %v2077_v42 = vpop.xlane.xlu2 %2076  ;;  %v1906_v27 = vpop.xlane.xlu1 %1905  ;;  %v2196_v61 = vmul.f32 %v4079_v2, %v5681_v47 }
 0x2ac   : > { %4080 = vrcp.f32 %v2077_v42  ;;  %v1980_v24 = vsub.f32 %v5685_v3, %v1906_v27  ;;  %v5753_v47 = vpop.f32.mrf.mxu2 }
 0x2ad   : > { %v1928_v15 = vsel %vm1873_vm2, %v5753_v47, -inf }
 0x2ae   : > { %v2022_v9 = vmul.f32 1.442695, %v1980_v24 }
 0x2b0   : > { %4082 = vpow2.f32 %v2022_v9 }
 0x2b2   : > { %v4081_v5 = vpop.eup %4080 }
 0x2b3   : > { %v2197_v55 = vmul.f32 %v4081_v5, %v4071_v41 }
 0x2b4   : > { %v5759_v41 = vpop.f32.mrf.mxu2 }
 0x2b5   : > { %v2227_v32 = vpack.c.bf16 %v2197_v55, %v2196_v61  ;;  %v1931_v46 = vsel %vm1873_vm2, %v5759_v41, -inf }
 0x2b6   : > { %v5751_v17 = vpop.eup %4082  ;;  %v5765_v14 = vpop.permute.xlu0 %2441 }
 0x2b7   : > { %3924 = vmatmul.msk.bf16.gmra.mxu1 %vm1873_vm2, %v2227_v32  ;;  %v2096_v3 = vsel %vm1873_vm2, %v5751_v17, 0.0 }
 0x2ba   : > { %1914 = vmax.xlane.f32.xlu2 %v1913_v39 }
 0x2bc   : > { %v5767_v62 = vpop.f32.mrf.mxu2 }
 0x2bd   : > { %v1934_v4 = vsel %vm1873_vm2, %v5767_v62, -inf }
 0x2be   : > { %1920 = vmax.xlane.f32.xlu1 %v1919_v54  ;;  %v5773_v53 = vpop.permute.xlu0 %2443 }
 0x2c4   : > { %v5775_v36 = vpop.f32.mrf.mxu2 }
 0x2c6   : > { %2097 = vadd.xlane.f32.xlu1 %v2096_v3 }
 0x2ce   : > { %1929 = vmax.xlane.f32.xlu1 %v1928_v15 }
 0x2d2   : > { %2451 = vrot.lane.b32.xlu2 %v5617_v20, %s4337_s18  ;;  %v1937_v20 = vsel %vm1873_vm2, %v5775_v36, -inf }
 0x2d6   : > { %1932 = vmax.xlane.f32.xlu1 %v1931_v46 }
 0x2da   : > { %2455 = vrot.lane.b32.xlu2 %v5633_v59, %s4337_s18  ;;  %v1979_v59 = vsub.f32 %v5677_v30, %v1903_v58  ;;  %v5805_v58 = vpop.permute.xlu2 %2439 }
 0x2dc   : > { %v2020_v21 = vmul.f32 1.442695, %v1979_v59 }
 0x2de   : > { %1935 = vmax.xlane.f32.xlu1 %v1934_v4  ;;  %v5822_v4 = vpop.f32.mrf.mxu2 }
 0x2e2   : > { %2990 = vrot.lane.b32.xlu2 %v5483_v22, %s4339_s16 }
 0x2e6   : > { %1938 = vmax.xlane.f32.xlu1 %v1937_v20 }
 0x2e9   : > { %v1900_v26 = vpop.xlane.xlu0 %1899 }
 0x2ea   : > { %v1978_v38 = vsub.f32 %v5670_v7, %v1900_v26  ;;  %v1940_v26 = vsel %vm1873_vm2, %v5822_v4, -inf }
 0x2ec   : > { %v2018_v25 = vmul.f32 1.442695, %v1978_v38  ;;  %v5811_v27 = vpop.xlane.xlu2 %1896 }
 0x2ee   : > { %4084 = vpow2.f32 %v2018_v25 }
 0x2ef   : > { %4086 = vpow2.f32 %v2020_v21 }
 0x2f1   : > { %v1909_v7 = vpop.xlane.xlu0 %1908 }
 0x2f2   : > { %v1981_v30 = vsub.f32 %v5698_v19, %v1909_v7 }
 0x2f4   : > { %v5783_v23 = vpop.eup %4084  ;;  %v2024_v34 = vmul.f32 1.442695, %v1981_v30  ;;  %v5815_v61 = vpop.permute.xlu2 %2445 }
 0x2f5   : > { %v2090_v40 = vsel %vm1873_vm2, %v5783_v23, 0.0  ;;  %v5787_v22 = vpop.eup %4086 }
 0x2f6   : > { %2091 = vadd.xlane.f32.xlu0 %v2090_v40  ;;  %v2093_v12 = vsel %vm1873_vm2, %v5787_v22, 0.0  ;;  %4088 = vpow2.f32 %v2024_v34 }
 0x2f7   : > { %4090 = vpow2.f32 %v2012_v16 }
 0x2f9   : > { %v1912_v52 = vpop.xlane.xlu0 %1911 }
 0x2fa   : > { %v1982_v25 = vsub.f32 %v5704_v56, %v1912_v52  ;;  %v5852_v52 = vpop.permute.xlu1 %2447 }
 0x2fc   : > { %v5803_v19 = vpop.eup %4088  ;;  %v2026_v21 = vmul.f32 1.442695, %v1982_v25 }
 0x2fd   : > { %v2099_v42 = vsel %vm1873_vm2, %v5803_v19, 0.0  ;;  %v5809_v2 = vpop.eup %4090 }
 0x2fe   : > { %2094 = vadd.xlane.f32.xlu0 %v2093_v12  ;;  %v2081_v0 = vsel %vm1873_vm2, %v5809_v2, 0.0 }
 0x2ff   : > { %2457 = vrot.lane.b32.xlu1 %v5645_v6, %s4337_s18  ;;  %v1925_v6 = vsel %vm1873_vm2, %v5747_v60, -inf }
 0x301   : > { %v1918_v24 = vpop.xlane.xlu0 %1917 }
 0x302   : > { %v1984_v54 = vsub.f32 %v5720_v29, %v1918_v24  ;;  %v2080_v24 = vpop.xlane.xlu1 %2079 }
 0x304   : > { %v2030_v15 = vmul.f32 1.442695, %v1984_v54 }
 0x306   : > { %1923 = vmax.xlane.f32.xlu0 %v1922_v35 }
 0x30b   : > { %1941 = vmax.xlane.f32.xlu2 %v1940_v26 }
 0x30e   : > { %1926 = vmax.xlane.f32.xlu0 %v1925_v6 }
 0x316   : > { %2100 = vadd.xlane.f32.xlu0 %v2099_v42 }
 0x31e   : > { %2082 = vadd.xlane.f32.xlu0 %v2081_v0 }
 0x324   : > { %v2315_v5 = vpop.f32.mrf.mxu1 }
 0x32c   : > { %v2317_v55 = vpop.f32.mrf.mxu1 }
 0x32d   : > { %v2395_v32 = vpack.c.bf16 %v2317_v55, %v2315_v5  ;;  %v1915_v39 = vpop.xlane.xlu2 %1914 }
 0x32e   : > { %v1983_v9 = vsub.f32 %v5714_v44, %v1915_v39 }
 0x32f   : > { %3995 = vmatmul.msk.bf16.vlgmr.msrb.gmra.mxu2 %vm1723_vm1, %v2395_v32 }
 0x330   : > { %v2028_v3 = vmul.f32 1.442695, %v1983_v9  ;;  %v5864_v9 = vpop.f32.mrf.mxu2 }
 0x331   : > { %v1943_v54 = vsel %vm1873_vm2, %v5864_v9, -inf }
 0x332   : > { %4092 = vpow2.f32 %v2028_v3  ;;  %2453 = vrot.lane.b32.xlu0 %v5625_v43, %s4337_s18 }
 0x333   : > { %4094 = vpow2.f32 %v2030_v15 }
 0x334   : > { %v2320_v46 = vpop.f32.mrf.mxu1  ;;  %4096 = vpow2.f32 %v2026_v21 }
 0x338   : > { %v5824_v20 = vpop.eup %4092 }
 0x339   : > { %v2105_v44 = vsel %vm1873_vm2, %v5824_v20, 0.0  ;;  %v5830_v59 = vpop.eup %4094 }
 0x33a   : > { %2106 = vadd.xlane.f32.xlu1 %v2105_v44  ;;  %v2108_v43 = vsel %vm1873_vm2, %v5830_v59, 0.0  ;;  %v5836_v40 = vpop.eup %4096  ;;  %v1976_v44 = vsub.f32 %v5672_v45, %v5732_v18 }
 0x33b   : > { %v2102_v12 = vsel %vm1873_vm2, %v5836_v40, 0.0 }
 0x33c   : > { %v2322_v29 = vpop.f32.mrf.mxu1 }
 0x33d   : > { %v2396_v38 = vpack.c.bf16 %v2322_v29, %v2320_v46  ;;  %v2450_v29 = vpop.permute.xlu1 %2449 }
 0x33f   : > { %3996 = vmatmul.msk.bf16.gmra.mxu2 %vm1723_vm1, %v2396_v38 }
 0x342   : > { %2109 = vadd.xlane.f32.xlu1 %v2108_v43  ;;  %v5885_v43 = vpop.permute.xlu2 %2451 }
 0x35c   : > { %2103 = vadd.xlane.f32.xlu0 %v2102_v12 }
 0x369   : > { %v2092_v7 = vpop.xlane.xlu0 %2091 }
 0x36a   : > { %4098 = vrcp.f32 %v2092_v7 }
 0x370   : > { %2992 = vrot.lane.b32.xlu0 %v5521_v28, %s4339_s16  ;;  %v4099_v35 = vpop.eup %4098 }
 0x371   : > { %v2095_v30 = vpop.xlane.xlu0 %2094  ;;  %v5843_v56 = vmul.f32 %v4099_v35, %v5783_v23 }
 0x372   : > { %4100 = vrcp.f32 %v2095_v30 }
 0x378   : > { %v4101_v34 = vpop.eup %4100 }
 0x379   : > { %v1924_v37 = vpop.xlane.xlu0 %1923  ;;  %v5846_v48 = vmul.f32 %v4101_v34, %v5787_v22 }
 0x37a   : > { %v1986_v6 = vsub.f32 %v5740_v1, %v1924_v37 }
 0x37b   : > { %v2230_v16 = vpack.c.bf16 %v5846_v48, %v5843_v56 }
 0x37c   : > { %v2034_v42 = vmul.f32 1.442695, %v1986_v6 }
 0x37e   : > { %4102 = vpow2.f32 %v2034_v42 }
 0x381   : > { %v1927_v0 = vpop.xlane.xlu0 %1926 }
 0x382   : > { %v1987_v28 = vsub.f32 %v5747_v60, %v1927_v0 }
 0x384   : > { %v5854_v5 = vpop.eup %4102  ;;  %v2036_v55 = vmul.f32 1.442695, %v1987_v28 }
 0x385   : > { %v2114_v23 = vsel %vm1873_vm2, %v5854_v5, 0.0 }
 0x386   : > { %4104 = vpow2.f32 %v2036_v55  ;;  %2115 = vadd.xlane.f32.xlu1 %v2114_v23 }
 0x387   : > { %4106 = vrcp.f32 %v2080_v24 }
 0x389   : > { %v5858_v22 = vpop.xlane.xlu0 %2100 }
 0x38c   : > { %v5860_v1 = vpop.eup %4104 }
 0x38d   : > { %v2117_v32 = vsel %vm1873_vm2, %v5860_v1, 0.0  ;;  %v4107_v39 = vpop.eup %4106 }
 0x38e   : > { %2118 = vadd.xlane.f32.xlu1 %v2117_v32  ;;  %v2198_v15 = vmul.f32 %v4107_v39, %v5706_v13  ;;  %v2014_v13 = vmul.f32 1.442695, %v1976_v44 }
 0x391   : > { %v2083_v60 = vpop.xlane.xlu0 %2082 }
 0x392   : > { %4108 = vrcp.f32 %v2083_v60 }
 0x393   : > { %4110 = vpow2.f32 %v2014_v13 }
 0x398   : > { %v4109_v3 = vpop.eup %4108 }
 0x399   : > { %v2199_v46 = vmul.f32 %v4109_v3, %v5809_v2  ;;  %v1977_v2 = vsub.f32 %v5702_v49, %v5811_v27  ;;  %v5887_v25 = vpop.eup %4110  ;;  %v5894_v49 = vpop.permute.xlu2 %2455 }
 0x39a   : > { %1944 = vmax.xlane.f32.xlu0 %v1943_v54  ;;  %v2084_v45 = vsel %vm1873_vm2, %v5887_v25, 0.0 }
 0x39b   : > { %v2228_v26 = vpack.c.bf16 %v2199_v46, %v2198_v15 }
 0x39d   : > { %3925 = vmatmul.msk.bf16.gmra.mxu1 %vm1873_vm2, %v2228_v26 }
 0x3a1   : > { %v2991_v7 = vpop.permute.xlu2 %2990 }
 0x3a4   : > { %v5883_v38 = vpop.permute.xlu0 %2453 }
 0x3ad   : > { %3939 = vmatmul.msk.bf16.vlgmr.msra.gmra.mxu1 %vm1723_vm1, %v5603_v63  ;;  %v2016_v63 = vmul.f32 1.442695, %v1977_v2 }
 0x3ae   : > { %2988 = vrot.lane.b32.xlu0 %v5436_v33, %s4339_s16  ;;  %v1921_v33 = vpop.xlane.xlu1 %1920 }
 0x3af   : > { %4112 = vpow2.f32 %v2016_v63 }
 0x3b5   : > { %v4113_v21 = vpop.eup %4112 }
 0x3b6   : > { %v2087_v27 = vsel %vm1873_vm2, %v4113_v21, 0.0  ;;  %v2098_v55 = vpop.xlane.xlu1 %2097 }
 0x3bd   : > { %3940 = vmatmul.msk.bf16.gmra.mxu1 %vm1723_vm1, %v5591_v11  ;;  %v1985_v11 = vsub.f32 %v5737_v51, %v1921_v33  ;;  %v5954_v33 = vpop.f32.mrf.mxu2 }
 0x3cd   : > { %3941 = vmatmul.msk.bf16.gmra.mxu1 %vm1723_vm1, %v5728_v10  ;;  %v2032_v10 = vmul.f32 1.442695, %v1985_v11 }
 0x3cf   : > { %v5892_v18 = vpop.xlane.xlu0 %2103  ;;  %4114 = vpow2.f32 %v2032_v10 }
 0x3d5   : > { %v5899_v51 = vpop.eup %4114 }
 0x3d6   : > { %v2111_v30 = vsel %vm1873_vm2, %v5899_v51, 0.0 }
 0x3d8   : > { %2085 = vadd.xlane.f32.xlu0 %v2084_v45 }
 0x3dd   : > { %3942 = vmatmul.msk.bf16.gmra.mxu1 %vm1723_vm1, %v5734_v31 }
 0x3e0   : > { %2088 = vadd.xlane.f32.xlu0 %v2087_v27 }
 0x3e2   : > { %v2993_v12 = vpop.permute.xlu0 %2992 }
 0x3e3   : > { %3050 = vmatpush.bf16.msrb.mxu0 %v2993_v12 }
 0x3e7   : > { %3051 = vmatpush.bf16.msrb.mxu0 %v2991_v7 }
 0x3e8   : > { %2112 = vadd.xlane.f32.xlu0 %v2111_v30 }
 0x3ed   : > { %3943 = vmatmul.msk.bf16.gmra.mxu1 %vm1723_vm1, %v5722_v57 }
 0x3fd   : > { %3944 = vmatmul.msk.bf16.gmra.mxu1 %vm1723_vm1, %v5805_v58 }
 0x40d   : > { %3945 = vmatmul.msk.bf16.gmra.mxu1 %vm1723_vm1, %v5765_v14  ;;  %v5909_v31 = vpop.xlane.xlu0 %1944 }
 0x41a   : > { %v2325_v35 = vpop.f32.mrf.mxu1 }
 0x41d   : > { %3946 = vmatmul.msk.bf16.gmra.mxu1 %vm1723_vm1, %v5773_v53 }
 0x420   : > { %v2989_v34 = vpop.permute.xlu0 %2988 }
 0x421   : > { %3052 = vmatpush.bf16.msrb.mxu0 %v2989_v34 }
 0x422   : > { %v2327_v37 = vpop.f32.mrf.mxu1 }
 0x423   : > { %v2397_v6 = vpack.c.bf16 %v2327_v37, %v2325_v35 }
 0x425   : > { %3997 = vmatmul.msk.bf16.gmra.mxu2 %vm1723_vm1, %v2397_v6  ;;  %v5990_v6 = vpop.f32.mrf.mxu2 }
 0x42a   : > { %v5914_v42 = vpop.f32.mrf.mxu1 }
 0x42b   : > { %v2618_v57 = vsel %vm1873_vm2, %v5914_v42, -inf }
 0x42c   : > { %2619 = vmax.xlane.f32.xlu2 %v2618_v57 }
 0x42d   : > { %3947 = vmatmul.msk.bf16.gmra.mxu1 %vm1723_vm1, %v5815_v61 }
 0x432   : > { %v5920_v14 = vpop.f32.mrf.mxu1 }
 0x433   : > { %v2621_v53 = vsel %vm1873_vm2, %v5920_v14, -inf }
 0x434   : > { %2622 = vmax.xlane.f32.xlu0 %v2621_v53 }
 0x43a   : > { %v5924_v58 = vpop.f32.mrf.mxu1 }
 0x43b   : > { %v2624_v0 = vsel %vm1873_vm2, %v5924_v58, -inf }
 0x43c   : > { %2625 = vmax.xlane.f32.xlu1 %v2624_v0  ;;  %v5998_v0 = vpop.f32.mrf.mxu2 }
 0x43d   : > { %3948 = vmatmul.msk.bf16.gmra.mxu1 %vm1723_vm1, %v5852_v52  ;;  %v1930_v52 = vpop.xlane.xlu1 %1929 }
 0x43e   : > { %v1988_v46 = vsub.f32 %v5753_v47, %v1930_v52 }
 0x440   : > { %v2038_v63 = vmul.f32 1.442695, %v1988_v46  ;;  %v6014_v46 = vpop.xlane.xlu2 %1941 }
 0x442   : > { %v5930_v28 = vpop.f32.mrf.mxu1 }
 0x443   : > { %v2627_v61 = vsel %vm1873_vm2, %v5930_v28, -inf }
 0x444   : > { %2628 = vmax.xlane.f32.xlu2 %v2627_v61 }
 0x445   : > { %v1933_v3 = vpop.xlane.xlu1 %1932 }
 0x446   : > { %v1989_v47 = vsub.f32 %v5759_v41, %v1933_v3 }
 0x448   : > { %2986 = vrot.lane.b32.xlu0 %v5379_v50, %s4339_s16 }
 0x44a   : > { %v5936_v23 = vpop.f32.mrf.mxu1 }
 0x44b   : > { %v2086_v24 = vpop.xlane.xlu0 %2085  ;;  %v2630_v32 = vsel %vm1873_vm2, %v5936_v23, -inf }
 0x44c   : > { %2631 = vmax.xlane.f32.xlu1 %v2630_v32  ;;  %4116 = vrcp.f32 %v2086_v24  ;;  %v6006_v32 = vpop.f32.mrf.mxu2 }
 0x44d   : > { %3949 = vmatmul.msk.bf16.gmra.mxu1 %vm1723_vm1, %v2450_v29  ;;  %v5959_v45 = vpop.xlane.xlu1 %1935 }
 0x452   : > { %v5941_v60 = vpop.f32.mrf.mxu1  ;;  %v4117_v50 = vpop.eup %4116 }
 0x453   : > { %v2089_v39 = vpop.xlane.xlu0 %2088  ;;  %v2633_v54 = vsel %vm1873_vm2, %v5941_v60, -inf  ;;  %v2200_v29 = vmul.f32 %v4117_v50, %v5887_v25  ;;  %v1946_v25 = vsel %vm1873_vm2, %v5954_v33, -inf }
 0x454   : > { %4118 = vrcp.f32 %v2089_v39  ;;  %2634 = vmax.xlane.f32.xlu1 %v2633_v54 }
 0x455   : > { %4120 = vpow2.f32 %v2038_v63  ;;  %v5973_v7 = vpop.xlane.xlu1 %1938 }
 0x45a   : > { %v4119_v15 = vpop.eup %4118  ;;  %v5946_v26 = vpop.f32.mrf.mxu1 }
 0x45b   : > { %v2636_v44 = vsel %vm1873_vm2, %v5946_v26, -inf  ;;  %v2201_v13 = vmul.f32 %v4119_v15, %v4113_v21  ;;  %v5965_v21 = vpop.eup %4120 }
 0x45c   : > { %2637 = vmax.xlane.f32.xlu2 %v2636_v44  ;;  %v2120_v41 = vsel %vm1873_vm2, %v5965_v21, 0.0 }
 0x45d   : > { %3950 = vmatmul.msk.bf16.gmra.mxu1 %vm1723_vm1, %v5885_v43  ;;  %v2229_v2 = vpack.c.bf16 %v2201_v13, %v2200_v29  ;;  %v2040_v43 = vmul.f32 1.442695, %v1989_v47  ;;  %v2458_v48 = vpop.permute.xlu1 %2457 }
 0x45f   : > { %3926 = vmatmul.msk.bf16.vlgmr.msra.gmra.mxu3 %vm1873_vm2, %v2229_v2  ;;  %4122 = vpow2.f32 %v2040_v43 }
 0x460   : > { %4124 = vrcp.f32 %v5858_v22 }
 0x461   : > { %4126 = vrcp.f32 %v2098_v55 }
 0x462   : > { %v5957_v11 = vpop.f32.mrf.mxu1  ;;  %4128 = vrcp.f32 %v5892_v18  ;;  %v2113_v18 = vpop.xlane.xlu0 %2112 }
 0x463   : > { %v2639_v10 = vsel %vm1873_vm2, %v5957_v11, -inf }
 0x464   : > { %1947 = vmax.xlane.f32.xlu2 %v1946_v25  ;;  %2640 = vmax.xlane.f32.xlu1 %v2639_v10 }
 0x465   : > { %v5981_v30 = vpop.eup %4122  ;;  %v2107_v61 = vpop.xlane.xlu1 %2106 }
 0x466   : > { %v2123_v34 = vsel %vm1873_vm2, %v5981_v30, 0.0  ;;  %v4125_v56 = vpop.eup %4124  ;;  %4130 = vrcp.f32 %v2107_v61 }
 0x467   : > { %4132 = vrcp.f32 %v2113_v18 }
 0x46a   : > { %v5967_v27 = vpop.f32.mrf.mxu1 }
 0x46b   : > { %v2642_v12 = vsel %vm1873_vm2, %v5967_v27, -inf }
 0x46c   : > { %2121 = vadd.xlane.f32.xlu2 %v2120_v41  ;;  %2643 = vmax.xlane.f32.xlu1 %v2642_v12 }
 0x46d   : > { %3951 = vmatmul.msk.bf16.gmra.mxu1 %vm1723_vm1, %v5883_v38  ;;  %v2205_v38 = vmul.f32 %v4125_v56, %v5803_v19  ;;  %v2110_v39 = vpop.xlane.xlu1 %2109 }
 0x46e   : > { %4134 = vrcp.f32 %v2110_v39 }
 0x46f   : > { %3927 = vmatmul.msk.bf16.gmra.mxu3 %vm1873_vm2, %v2230_v16  ;;  %v4127_v16 = vpop.eup %4126 }
 0x470   : > { %v2204_v22 = vmul.f32 %v4127_v16, %v5751_v17  ;;  %v4129_v24 = vpop.eup %4128 }
 0x471   : > { %v4131_v17 = vpop.eup %4130  ;;  %v2206_v52 = vmul.f32 %v4129_v24, %v5836_v40 }
 0x472   : > { %v5984_v35 = vpop.f32.mrf.mxu1  ;;  %v2231_v53 = vpack.c.bf16 %v2205_v38, %v2204_v22  ;;  %v2207_v54 = vmul.f32 %v4131_v17, %v5824_v20  ;;  %v4133_v15 = vpop.eup %4132  ;;  %v1952_v17 = vsel %vm1873_vm2, %v5998_v0, -inf }
 0x473   : > { %v2645_v37 = vsel %vm1873_vm2, %v5984_v35, -inf  ;;  %v2209_v29 = vmul.f32 %v4133_v15, %v5899_v51 }
 0x474   : > { %2124 = vadd.xlane.f32.xlu2 %v2123_v34  ;;  %2646 = vmax.xlane.f32.xlu0 %v2645_v37  ;;  %v2232_v50 = vpack.c.bf16 %v2207_v54, %v2206_v52  ;;  %v4135_v44 = vpop.eup %4134 }
 0x475   : > { %v2116_v3 = vpop.xlane.xlu1 %2115  ;;  %v2208_v40 = vmul.f32 %v4135_v44, %v5830_v59 }
 0x477   : > { %v2233_v20 = vpack.c.bf16 %v2209_v29, %v2208_v40  ;;  %v6062_v40 = vpop.f32.mrf.mxu2 }
 0x47a   : > { %v5993_v57 = vpop.f32.mrf.mxu1 }
 0x47d   : > { %3952 = vmatmul.msk.bf16.gmra.mxu1 %vm1723_vm1, %v5894_v49  ;;  %v1955_v49 = vsel %vm1873_vm2, %v6006_v32, -inf  ;;  %v2119_v13 = vpop.xlane.xlu1 %2118 }
 0x47e   : > { %4136 = vrcp.f32 %v2119_v13 }
 0x47f   : > { %3928 = vmatmul.msk.bf16.gmra.mxu3 %vm1873_vm2, %v2231_v53  ;;  %4138 = vrcp.f32 %v2116_v3 }
 0x482   : > { %v6002_v55 = vpop.f32.mrf.mxu1 }
 0x483   : > { %v2651_v19 = vsel %vm1873_vm2, %v6002_v55, -inf }
 0x484   : > { %2652 = vmax.xlane.f32.xlu2 %v2651_v19  ;;  %v4137_v25 = vpop.eup %4136 }
 0x485   : > { %v4139_v43 = vpop.eup %4138  ;;  %v2211_v51 = vmul.f32 %v4137_v25, %v5860_v1  ;;  %v1990_v1 = vsub.f32 %v5767_v62, %v5959_v45  ;;  %v1991_v62 = vsub.f32 %v5775_v36, %v5973_v7 }
 0x486   : > { %v2210_v37 = vmul.f32 %v4139_v43, %v5854_v5  ;;  %v2648_v5 = vsel %vm1873_vm2, %v5993_v57, -inf }
 0x487   : > { %v2042_v22 = vmul.f32 1.442695, %v1990_v1 }
 0x48c   : > { %1956 = vmax.xlane.f32.xlu2 %v1955_v49  ;;  %v2044_v49 = vmul.f32 1.442695, %v1991_v62 }
 0x48d   : > { %3953 = vmatmul.msk.bf16.gmra.mxu1 %vm1723_vm1, %v2458_v48 }
 0x48f   : > { %3929 = vmatmul.msk.bf16.gmra.mxu3 %vm1873_vm2, %v2232_v50 }
 0x49f   : > { %3930 = vmatmul.msk.bf16.gmra.mxu3 %vm1873_vm2, %v2233_v20  ;;  %v2620_v2 = vpop.xlane.xlu2 %2619 }
 0x4a0   : > { %v2714_v63 = vsub.f32 %v5914_v42, %v2620_v2  ;;  %v2234_v42 = vpack.c.bf16 %v2211_v51, %v2210_v37 }
 0x4a2   : > { %v2746_v47 = vmul.f32 1.442695, %v2714_v63 }
 0x4a4   : > { %4140 = vpow2.f32 %v2746_v47 }
 0x4a7   : > { %v2623_v10 = vpop.xlane.xlu0 %2622 }
 0x4a8   : > { %v2715_v41 = vsub.f32 %v5920_v14, %v2623_v10 }
 0x4aa   : > { %v6022_v12 = vpop.eup %4140  ;;  %v2748_v59 = vmul.f32 1.442695, %v2715_v41  ;;  %v6081_v41 = vpop.f32.mrf.mxu2 }
 0x4ab   : > { %v2810_v34 = vsel %vm1873_vm2, %v6022_v12, 0.0 }
 0x4ac   : > { %4142 = vpow2.f32 %v2748_v59  ;;  %2811 = vadd.xlane.f32.xlu0 %v2810_v34 }
 0x4af   : > { %3931 = vmatmul.msk.bf16.gmra.mxu3 %vm1873_vm2, %v2234_v42  ;;  %v2626_v56 = vpop.xlane.xlu1 %2625 }
 0x4b0   : > { %v2716_v48 = vsub.f32 %v5924_v58, %v2626_v56 }
 0x4b2   : > { %v6029_v16 = vpop.eup %4142  ;;  %v2750_v14 = vmul.f32 1.442695, %v2716_v48 }
 0x4b3   : > { %v2813_v38 = vsel %vm1873_vm2, %v6029_v16, 0.0 }
 0x4b4   : > { %4144 = vpow2.f32 %v2750_v14  ;;  %2814 = vadd.xlane.f32.xlu1 %v2813_v38  ;;  %2649 = vmax.xlane.f32.xlu0 %v2648_v5 }
 0x4b5   : > { %4146 = vpow2.f32 %v2042_v22 }
 0x4b7   : > { %v2629_v53 = vpop.xlane.xlu2 %2628 }
 0x4b8   : > { %v2717_v61 = vsub.f32 %v5930_v28, %v2629_v53  ;;  %v6046_v28 = vpop.f32.mrf.mxu1 }
 0x4ba   : > { %v6038_v58 = vpop.eup %4144  ;;  %v2752_v45 = vmul.f32 1.442695, %v2717_v61  ;;  %v2987_v19 = vpop.permute.xlu0 %2986 }
 0x4bb   : > { %3053 = vmatpush.bf16.msrb.mxu0 %v2987_v19  ;;  %v2816_v24 = vsel %vm1873_vm2, %v6038_v58, 0.0  ;;  %v6048_v39 = vpop.eup %4146 }
 0x4bc   : > { %4148 = vpow2.f32 %v2752_v45  ;;  %2817 = vadd.xlane.f32.xlu2 %v2816_v24  ;;  %1953 = vmax.xlane.f32.xlu0 %v1952_v17  ;;  %v2126_v7 = vsel %vm1873_vm2, %v6048_v39, 0.0 }
 0x4bd   : > { %4150 = vpow2.f32 %v2044_v49 }
 0x4bf   : > { %v2632_v52 = vpop.xlane.xlu1 %2631 }
 0x4c0   : > { %v2718_v36 = vsub.f32 %v5936_v23, %v2632_v52  ;;  %v6059_v44 = vpop.f32.mrf.mxu1 }
 0x4c1   : > { %v2657_v13 = vsel %vm1873_vm2, %v6059_v44, -inf }
 0x4c2   : > { %v6050_v54 = vpop.eup %4148  ;;  %v2754_v50 = vmul.f32 1.442695, %v2718_v36 }
 0x4c3   : > { %v2819_v18 = vsel %vm1873_vm2, %v6050_v54, 0.0  ;;  %v6057_v15 = vpop.eup %4150 }
 0x4c4   : > { %2127 = vadd.xlane.f32.xlu0 %v2126_v7  ;;  %2820 = vadd.xlane.f32.xlu2 %v2819_v18  ;;  %4152 = vpow2.f32 %v2754_v50  ;;  %v2129_v20 = vsel %vm1873_vm2, %v6057_v15, 0.0 }
 0x4c7   : > { %v2635_v3 = vpop.xlane.xlu1 %2634 }
 0x4c8   : > { %v2719_v29 = vsub.f32 %v5941_v60, %v2635_v3  ;;  %v1993_v60 = vsub.f32 %v5864_v9, %v5909_v31  ;;  %v1958_v9 = vsel %vm1873_vm2, %v6062_v40, -inf  ;;  %v1961_v31 = vsel %vm1873_vm2, %v6081_v41, -inf  ;;  %v6095_v1 = vpop.f32.mrf.mxu1 }
 0x4c9   : > { %v2660_v7 = vsel %vm1873_vm2, %v6095_v1, -inf }
 0x4ca   : > { %v2756_v23 = vmul.f32 1.442695, %v2719_v29  ;;  %v6070_v63 = vpop.eup %4152 }
 0x4cb   : > { %v2822_v10 = vsel %vm1873_vm2, %v6070_v63, 0.0 }
 0x4cc   : > { %4154 = vpow2.f32 %v2756_v23  ;;  %2658 = vmax.xlane.f32.xlu0 %v2657_v13  ;;  %2130 = vadd.xlane.f32.xlu2 %v2129_v20 }
 0x4cd   : > { %2459 = vrot.lane.b32.xlu1 %v5658_v8, %s4337_s18  ;;  %v2048_v8 = vmul.f32 1.442695, %v1993_v60 }
 0x4cf   : > { %v2638_v2 = vpop.xlane.xlu2 %2637  ;;  %4156 = vpow2.f32 %v2048_v8 }
 0x4d0   : > { %v2720_v25 = vsub.f32 %v5946_v26, %v2638_v2  ;;  %v6089_v26 = vpop.f32.mrf.mxu2  ;;  %v6105_v24 = vpop.f32.mrf.mxu1 }
 0x4d2   : > { %v6074_v47 = vpop.eup %4154  ;;  %v2758_v51 = vmul.f32 1.442695, %v2720_v25 }
 0x4d3   : > { %v2825_v43 = vsel %vm1873_vm2, %v6074_v47, 0.0 }
 0x4d4   : > { %2823 = vadd.xlane.f32.xlu0 %v2822_v10  ;;  %2826 = vadd.xlane.f32.xlu2 %v2825_v43  ;;  %4158 = vpow2.f32 %v2758_v51 }
 0x4d5   : > { %v6091_v37 = vpop.eup %4156 }
 0x4d6   : > { %v2135_v5 = vsel %vm1873_vm2, %v6091_v37, 0.0 }
 0x4d7   : > { %v6083_v59 = vpop.xlane.xlu1 %2640  ;;  %v1948_v34 = vpop.xlane.xlu2 %1947 }
 0x4d8   : > { %v6102_v45 = vpop.f32.mrf.mxu2  ;;  %v6124_v25 = vpop.f32.mrf.mxu1 }
 0x4d9   : > { %v1967_v36 = vsel %vm1873_vm2, %v6102_v45, -inf }
 0x4da   : > { %v6093_v48 = vpop.eup %4158 }
 0x4db   : > { %v2828_v22 = vsel %vm1873_vm2, %v6093_v48, 0.0 }
 0x4dc   : > { %1959 = vmax.xlane.f32.xlu0 %v1958_v9  ;;  %1962 = vmax.xlane.f32.xlu2 %v1961_v31 }
 0x4df   : > { %v2644_v42 = vpop.xlane.xlu1 %2643  ;;  %v2122_v56 = vpop.xlane.xlu2 %2121 }
 0x4e0   : > { %v2722_v14 = vsub.f32 %v5967_v27, %v2644_v42  ;;  %4160 = vrcp.f32 %v2122_v56  ;;  %v1994_v27 = vsub.f32 %v5954_v33, %v1948_v34  ;;  %v2666_v42 = vsel %vm1873_vm2, %v6124_v25, -inf }
 0x4e2   : > { %v2330_v38 = vpop.f32.mrf.mxu3  ;;  %v2762_v53 = vmul.f32 1.442695, %v2722_v14  ;;  %v2050_v50 = vmul.f32 1.442695, %v1994_v27 }
 0x4e4   : > { %2136 = vadd.xlane.f32.xlu0 %v2135_v5  ;;  %2829 = vadd.xlane.f32.xlu2 %v2828_v22 }
 0x4e6   : > { %v4161_v18 = vpop.eup %4160 }
 0x4e7   : > { %v2647_v61 = vpop.xlane.xlu0 %2646  ;;  %v2125_v62 = vpop.xlane.xlu2 %2124  ;;  %v2212_v33 = vmul.f32 %v4161_v18, %v5965_v21  ;;  %v1992_v21 = vsub.f32 %v5822_v4, %v6014_v46  ;;  %v2721_v4 = vsub.f32 %v5957_v11, %v6083_v59  ;;  %v2654_v46 = vsel %vm1873_vm2, %v6046_v28, -inf }
 0x4e8   : > { %v2723_v19 = vsub.f32 %v5984_v35, %v2647_v61  ;;  %4162 = vrcp.f32 %v2125_v62 }
 0x4e9   : > { %4164 = vpow2.f32 %v2762_v53  ;;  %v2046_v51 = vmul.f32 1.442695, %v1992_v21  ;;  %v2760_v14 = vmul.f32 1.442695, %v2721_v4 }
 0x4ea   : > { %v2764_v17 = vmul.f32 1.442695, %v2723_v19  ;;  %v2332_v49 = vpop.f32.mrf.mxu3 }
 0x4eb   : > { %v2398_v52 = vpack.c.bf16 %v2332_v49, %v2330_v38 }
 0x4ec   : > { %4166 = vpow2.f32 %v2764_v17  ;;  %1968 = vmax.xlane.f32.xlu0 %v1967_v36  ;;  %2661 = vmax.xlane.f32.xlu2 %v2660_v7  ;;  %v2663_v36 = vsel %vm1873_vm2, %v6105_v24, -inf }
 0x4ed   : > { %3998 = vmatmul.msk.bf16.gmra.mxu2 %vm1723_vm1, %v2398_v52  ;;  %4168 = vpow2.f32 %v2050_v50 }
 0x4ee   : > { %v4163_v35 = vpop.eup %4162 }
 0x4ef   : > { %v2213_v3 = vmul.f32 %v4163_v35, %v5981_v30  ;;  %v6115_v29 = vpop.eup %4164  ;;  %v1949_v30 = vsel %vm1873_vm2, %v5990_v6, -inf  ;;  %v1964_v35 = vsel %vm1873_vm2, %v6089_v26, -inf }
 0x4f0   : > { %v2834_v2 = vsel %vm1873_vm2, %v6115_v29, 0.0 }
 0x4f1   : > { %v2235_v23 = vpack.c.bf16 %v2213_v3, %v2212_v33 }
 0x4f2   : > { %v6117_v13 = vpop.eup %4166  ;;  %v2335_v20 = vpop.f32.mrf.mxu3 }
 0x4f3   : > { %3932 = vmatmul.msk.bf16.gmra.mxu3 %vm1873_vm2, %v2235_v23  ;;  %v2837_v60 = vsel %vm1873_vm2, %v6117_v13, 0.0  ;;  %v6130_v43 = vpop.eup %4168 }
 0x4f4   : > { %2835 = vadd.xlane.f32.xlu0 %v2834_v2  ;;  %2838 = vadd.xlane.f32.xlu2 %v2837_v60  ;;  %v2138_v56 = vsel %vm1873_vm2, %v6130_v43, 0.0 }
 0x4f7   : > { %1950 = vmax.xlane.f32.xlu1 %v1949_v30  ;;  %v2653_v10 = vpop.xlane.xlu2 %2652 }
 0x4f8   : > { %v2725_v8 = vsub.f32 %v6002_v55, %v2653_v10  ;;  %v6140_v55 = vpop.f32.mrf.mxu1 }
 0x4f9   : > { %v2669_v53 = vsel %vm1873_vm2, %v6140_v55, -inf }
 0x4fa   : > { %v2768_v34 = vmul.f32 1.442695, %v2725_v8  ;;  %v2337_v9 = vpop.f32.mrf.mxu3 }
 0x4fb   : > { %v2399_v31 = vpack.c.bf16 %v2337_v9, %v2335_v20 }
 0x4fc   : > { %4170 = vpow2.f32 %v2768_v34  ;;  %2667 = vmax.xlane.f32.xlu0 %v2666_v42  ;;  %2139 = vadd.xlane.f32.xlu2 %v2138_v56 }
 0x4fd   : > { %4172 = vpow2.f32 %v2046_v51  ;;  %3999 = vmatmul.msk.bf16.gmra.mxu2 %vm1723_vm1, %v2399_v31 }
 0x4fe   : > { %4174 = vpow2.f32 %v2760_v14 }
 0x4ff   : > { %2655 = vmax.xlane.f32.xlu1 %v2654_v46  ;;  %v6168_v3 = vpop.xlane.xlu2 %1956 }
 0x500   : > { %v6154_v61 = vpop.f32.mrf.mxu1 }
 0x501   : > { %v2672_v17 = vsel %vm1873_vm2, %v6154_v61, -inf }
 0x502   : > { %v6144_v38 = vpop.eup %4170  ;;  %v2340_v5 = vpop.f32.mrf.mxu3 }
 0x503   : > { %v6146_v22 = vpop.eup %4172  ;;  %v2843_v11 = vsel %vm1873_vm2, %v6144_v38, 0.0 }
 0x504   : > { %2670 = vmax.xlane.f32.xlu2 %v2669_v53  ;;  %2844 = vadd.xlane.f32.xlu0 %v2843_v11  ;;  %v2132_v59 = vsel %vm1873_vm2, %v6146_v22, 0.0  ;;  %v6156_v19 = vpop.eup %4174 }
 0x505   : > { %v2831_v49 = vsel %vm1873_vm2, %v6156_v19, 0.0 }
 0x507   : > { %2133 = vadd.xlane.f32.xlu1 %v2132_v59 }
 0x50a   : > { %v2342_v62 = vpop.f32.mrf.mxu3 }
 0x50b   : > { %v2400_v27 = vpack.c.bf16 %v2342_v62, %v2340_v5  ;;  %v6182_v62 = vpop.f32.mrf.mxu1 }
 0x50c   : > { %2673 = vmax.xlane.f32.xlu0 %v2672_v17 }
 0x50d   : > { %4000 = vmatmul.msk.bf16.gmra.mxu2 %vm1723_vm1, %v2400_v27 }
 0x50f   : > { %2832 = vadd.xlane.f32.xlu1 %v2831_v49 }
 0x512   : > { %v2345_v52 = vpop.f32.mrf.mxu3 }
 0x517   : > { %2664 = vmax.xlane.f32.xlu1 %v2663_v36 }
 0x51a   : > { %v2347_v7 = vpop.f32.mrf.mxu3 }
 0x51b   : > { %v2401_v18 = vpack.c.bf16 %v2347_v7, %v2345_v52 }
 0x51d   : > { %4001 = vmatmul.msk.bf16.gmra.mxu2 %vm1723_vm1, %v2401_v18  ;;  %v2675_v18 = vsel %vm1873_vm2, %v6182_v62, -inf }
 0x51f   : > { %1965 = vmax.xlane.f32.xlu1 %v1964_v35  ;;  %v2812_v50 = vpop.xlane.xlu0 %2811 }
 0x520   : > { %4176 = vrcp.f32 %v2812_v50 }
 0x522   : > { %v2350_v33 = vpop.f32.mrf.mxu3 }
 0x526   : > { %v4177_v21 = vpop.eup %4176 }
 0x527   : > { %v2815_v23 = vpop.xlane.xlu1 %2814  ;;  %v6170_v20 = vpop.xlane.xlu0 %2649  ;;  %v2938_v10 = vmul.f32 %v4177_v21, %v6022_v12 }
 0x528   : > { %4178 = vrcp.f32 %v2815_v23 }
 0x52a   : > { %v2352_v2 = vpop.f32.mrf.mxu3 }
 0x52b   : > { %v2402_v60 = vpack.c.bf16 %v2352_v2, %v2350_v33 }
 0x52d   : > { %4002 = vmatmul.msk.bf16.gmra.mxu2 %vm1723_vm1, %v2402_v60 }
 0x52e   : > { %v4179_v30 = vpop.eup %4178 }
 0x52f   : > { %v2939_v8 = vmul.f32 %v4179_v30, %v6029_v16  ;;  %v1954_v51 = vpop.xlane.xlu0 %1953  ;;  %v2818_v34 = vpop.xlane.xlu2 %2817 }
 0x530   : > { %v1996_v9 = vsub.f32 %v5998_v0, %v1954_v51  ;;  %v6199_v51 = vpop.f32.mrf.mxu1 }
 0x531   : > { %v2970_v31 = vpack.c.bf16 %v2939_v8, %v2938_v10 }
 0x532   : > { %v2054_v42 = vmul.f32 1.442695, %v1996_v9  ;;  %v2355_v56 = vpop.f32.mrf.mxu3 }
 0x533   : > { %3955 = vmatmul.msk.bf16.vlgmr.msrb.gmra.mxu0 %vm1873_vm2, %v2970_v31  ;;  %v2678_v31 = vsel %vm1873_vm2, %v6199_v51, -inf }
 0x534   : > { %4180 = vpow2.f32 %v2054_v42 }
 0x535   : > { %4182 = vrcp.f32 %v2818_v34 }
 0x537   : > { %v2128_v4 = vpop.xlane.xlu0 %2127  ;;  %v2821_v46 = vpop.xlane.xlu2 %2820 }
 0x538   : > { %4184 = vrcp.f32 %v2821_v46 }
 0x539   : > { %4186 = vrcp.f32 %v2128_v4 }
 0x53a   : > { %v6177_v14 = vpop.eup %4180  ;;  %v2357_v5 = vpop.f32.mrf.mxu3 }
 0x53b   : > { %v2403_v12 = vpack.c.bf16 %v2357_v5, %v2355_v56  ;;  %v2144_v16 = vsel %vm1873_vm2, %v6177_v14, 0.0  ;;  %v4183_v53 = vpop.eup %4182  ;;  %v6210_v56 = vpop.f32.mrf.mxu1 }
 0x53c   : > { %2145 = vadd.xlane.f32.xlu2 %v2144_v16  ;;  %v2940_v27 = vmul.f32 %v4183_v53, %v6038_v58  ;;  %v2724_v16 = vsub.f32 %v5993_v57, %v6170_v20 }
 0x53d   : > { %4003 = vmatmul.msk.bf16.gmra.mxu2 %vm1723_vm1, %v2403_v12 }
 0x53e   : > { %v4185_v0 = vpop.eup %4184 }
 0x53f   : > { %v2460_v11 = vpop.permute.xlu1 %2459  ;;  %v2659_v59 = vpop.xlane.xlu0 %2658  ;;  %v2941_v17 = vmul.f32 %v4185_v0, %v6050_v54  ;;  %v2766_v0 = vmul.f32 1.442695, %v2724_v16 }
 0x540   : > { %v2727_v49 = vsub.f32 %v6059_v44, %v2659_v59  ;;  %v2131_v52 = vpop.xlane.xlu2 %2130  ;;  %3954 = vmatmul.msk.bf16.gmra.mxu1 %vm1723_vm1, %v2460_v11  ;;  %v4187_v35 = vpop.eup %4186 }
 0x541   : > { %4188 = vrcp.f32 %v2131_v52  ;;  %v2971_v7 = vpack.c.bf16 %v2941_v17, %v2940_v27  ;;  %v2214_v44 = vmul.f32 %v4187_v35, %v6048_v39 }
 0x542   : > { %v2772_v36 = vmul.f32 1.442695, %v2727_v49  ;;  %v1997_v49 = vsub.f32 %v6006_v32, %v6168_v3 }
 0x543   : > { %3956 = vmatmul.msk.bf16.gmra.mxu0 %vm1873_vm2, %v2971_v7 }
 0x544   : > { %4190 = vpow2.f32 %v2772_v36  ;;  %2676 = vmax.xlane.f32.xlu2 %v2675_v18  ;;  %v2056_v36 = vmul.f32 1.442695, %v1997_v49 }
 0x547   : > { %v4189_v50 = vpop.eup %4188  ;;  %v2824_v58 = vpop.xlane.xlu0 %2823 }
 0x548   : > { %4192 = vrcp.f32 %v2824_v58  ;;  %v2827_v54 = vpop.xlane.xlu2 %2826  ;;  %v2215_v33 = vmul.f32 %v4189_v50, %v6057_v15  ;;  %v6230_v58 = vpop.f32.mrf.mxu1 }
 0x549   : > { %4194 = vrcp.f32 %v2827_v54 }
 0x54a   : > { %v6193_v23 = vpop.eup %4190  ;;  %v2236_v2 = vpack.c.bf16 %v2215_v33, %v2214_v44 }
 0x54b   : > { %v2849_v60 = vsel %vm1873_vm2, %v6193_v23, 0.0 }
 0x54c   : > { %3933 = vmatmul.msk.bf16.gmra.mxu3 %vm1873_vm2, %v2236_v2  ;;  %2850 = vadd.xlane.f32.xlu0 %v2849_v60 }
 0x54e   : > { %v4193_v21 = vpop.eup %4192 }
 0x54f   : > { %v4195_v30 = vpop.eup %4194  ;;  %v2942_v10 = vmul.f32 %v4193_v21, %v6070_v63  ;;  %v1960_v8 = vpop.xlane.xlu0 %1959 }
 0x550   : > { %v2943_v39 = vmul.f32 %v4195_v30, %v6074_v47  ;;  %v1998_v15 = vsub.f32 %v6062_v40, %v1960_v8  ;;  %v1963_v47 = vpop.xlane.xlu2 %1962  ;;  %v2681_v40 = vsel %vm1873_vm2, %v6210_v56, -inf }
 0x551   : > { %v1999_v30 = vsub.f32 %v6081_v41, %v1963_v47 }
 0x552   : > { %v2058_v34 = vmul.f32 1.442695, %v1998_v15  ;;  %v2972_v9 = vpack.c.bf16 %v2943_v39, %v2942_v10 }
 0x554   : > { %4196 = vpow2.f32 %v2058_v34  ;;  %3957 = vmatmul.msk.bf16.gmra.mxu0 %vm1873_vm2, %v2972_v9  ;;  %2679 = vmax.xlane.f32.xlu0 %v2678_v31  ;;  %v2060_v34 = vmul.f32 1.442695, %v1999_v30  ;;  %v6245_v9 = vpop.f32.mrf.mxu1 }
 0x557   : > { %v2137_v4 = vpop.xlane.xlu0 %2136 }
 0x558   : > { %v2830_v46 = vpop.xlane.xlu2 %2829 }
 0x55a   : > { %v6206_v42 = vpop.eup %4196 }
 0x55b   : > { %v2150_v63 = vsel %vm1873_vm2, %v6206_v42, 0.0 }
 0x55c   : > { %2151 = vadd.xlane.f32.xlu2 %v2150_v63 }
 0x55f   : > { %v6217_v11 = vpop.xlane.xlu0 %1968 }
 0x560   : > { %v2662_v27 = vpop.xlane.xlu2 %2661 }
 0x564   : > { %2682 = vmax.xlane.f32.xlu2 %v2681_v40 }
 0x567   : > { %v2836_v7 = vpop.xlane.xlu0 %2835 }
 0x568   : > { %v2839_v35 = vpop.xlane.xlu2 %2838 }
 0x56a   : > { %v1951_v5 = vpop.xlane.xlu1 %1950 }
 0x56b   : > { %v1995_v12 = vsub.f32 %v5990_v6, %v1951_v5  ;;  %v2728_v5 = vsub.f32 %v6095_v1, %v2662_v27 }
 0x56d   : > { %v2052_v53 = vmul.f32 1.442695, %v1995_v12  ;;  %v2774_v16 = vmul.f32 1.442695, %v2728_v5 }
 0x56f   : > { %4198 = vpow2.f32 %v2052_v53  ;;  %v6238_v8 = vpop.xlane.xlu0 %2667 }
 0x570   : > { %4200 = vpow2.f32 %v2766_v0 }
 0x571   : > { %4202 = vrcp.f32 %v2137_v4 }
 0x572   : > { %v2656_v59 = vpop.xlane.xlu1 %2655 }
 0x573   : > { %v2726_v18 = vsub.f32 %v6046_v28, %v2656_v59  ;;  %v6260_v59 = vpop.f32.mrf.mxu1 }
 0x575   : > { %v6219_v17 = vpop.eup %4198  ;;  %v2770_v33 = vmul.f32 1.442695, %v2726_v18 }
 0x576   : > { %v2360_v52 = vpop.f32.mrf.mxu3  ;;  %v2141_v6 = vsel %vm1873_vm2, %v6219_v17, 0.0  ;;  %v6225_v20 = vpop.eup %4200 }
 0x577   : > { %2142 = vadd.xlane.f32.xlu1 %v2141_v6  ;;  %v2840_v32 = vsel %vm1873_vm2, %v6225_v20, 0.0  ;;  %v4203_v3 = vpop.eup %4202 }
 0x578   : > { %v2217_v28 = vmul.f32 %v4203_v3, %v6091_v37 }
 0x57a   : > { %v2134_v57 = vpop.xlane.xlu1 %2133 }
 0x57b   : > { %4204 = vrcp.f32 %v2134_v57  ;;  %v6278_v3 = vpop.f32.mrf.mxu1 }
 0x57c   : > { %4206 = vpow2.f32 %v2056_v36  ;;  %v2001_v36 = vsub.f32 %v6102_v45, %v6217_v11 }
 0x57d   : > { %4208 = vrcp.f32 %v2830_v46 }
 0x57e   : > { %v2362_v50 = vpop.f32.mrf.mxu3 }
 0x57f   : > { %v2404_v54 = vpack.c.bf16 %v2362_v50, %v2360_v52  ;;  %2841 = vadd.xlane.f32.xlu1 %v2840_v32 }
 0x581   : > { %v4205_v44 = vpop.eup %4204  ;;  %4004 = vmatmul.msk.bf16.gmra.mxu2 %vm1723_vm1, %v2404_v54 }
 0x582   : > { %v2833_v2 = vpop.xlane.xlu1 %2832  ;;  %v2216_v60 = vmul.f32 %v4205_v44, %v6146_v22  ;;  %v6235_v21 = vpop.eup %4206  ;;  %v2730_v44 = vsub.f32 %v6124_v25, %v6238_v8  ;;  %v2687_v25 = vsel %vm1873_vm2, %v6245_v9, -inf }
 0x583   : > { %4210 = vrcp.f32 %v2833_v2  ;;  %v2147_v39 = vsel %vm1873_vm2, %v6235_v21, 0.0  ;;  %v4209_v15 = vpop.eup %4208  ;;  %v6243_v22 = vpop.xlane.xlu2 %2139 }
 0x584   : > { %v2237_v10 = vpack.c.bf16 %v2217_v28, %v2216_v60  ;;  %4212 = vpow2.f32 %v2770_v33  ;;  %v2944_v31 = vmul.f32 %v4209_v15, %v6093_v48  ;;  %v6256_v48 = vpop.xlane.xlu0 %2844 }
 0x585   : > { %4214 = vpow2.f32 %v2060_v34  ;;  %v2690_v34 = vsel %vm1873_vm2, %v6260_v59, -inf }
 0x586   : > { %3934 = vmatmul.msk.bf16.gmra.mxu3 %vm1873_vm2, %v2237_v10  ;;  %4216 = vrcp.f32 %v2836_v7  ;;  %v6298_v10 = vpop.f32.mrf.mxu1 }
 0x587   : > { %2148 = vadd.xlane.f32.xlu1 %v2147_v39  ;;  %4218 = vrcp.f32 %v2839_v35 }
 0x589   : > { %v4211_v37 = vpop.eup %4210 }
 0x58a   : > { %v2945_v41 = vmul.f32 %v4211_v37, %v6156_v19  ;;  %v2665_v63 = vpop.xlane.xlu1 %2664  ;;  %v6249_v47 = vpop.eup %4212 }
 0x58b   : > { %v2729_v40 = vsub.f32 %v6105_v24, %v2665_v63  ;;  %v2846_v12 = vsel %vm1873_vm2, %v6249_v47, 0.0  ;;  %v6258_v19 = vpop.eup %4214  ;;  %v2671_v24 = vpop.xlane.xlu2 %2670 }
 0x58c   : > { %v2973_v4 = vpack.c.bf16 %v2945_v41, %v2944_v31  ;;  %v4217_v0 = vpop.eup %4216  ;;  %v2731_v52 = vsub.f32 %v6140_v55, %v2671_v24  ;;  %v2153_v7 = vsel %vm1873_vm2, %v6258_v19, 0.0  ;;  %v2064_v55 = vmul.f32 1.442695, %v2001_v36  ;;  %v2674_v50 = vpop.xlane.xlu0 %2673 }
 0x58d   : > { %v2776_v46 = vmul.f32 1.442695, %v2729_v40  ;;  %v4219_v27 = vpop.eup %4218  ;;  %v2732_v54 = vsub.f32 %v6154_v61, %v2674_v50  ;;  %v2778_v61 = vmul.f32 1.442695, %v2730_v44 }
 0x58e   : > { %3958 = vmatmul.msk.bf16.gmra.mxu0 %vm1873_vm2, %v2973_v4  ;;  %v2947_v18 = vmul.f32 %v4219_v27, %v6117_v13  ;;  %v2780_v35 = vmul.f32 1.442695, %v2731_v52  ;;  %v2684_v13 = vsel %vm1873_vm2, %v6230_v58, -inf  ;;  %v6312_v63 = vpop.f32.mrf.mxu1  ;;  %v2693_v4 = vsel %vm1873_vm2, %v6278_v3, -inf }
 0x58f   : > { %4220 = vpow2.f32 %v2776_v46  ;;  %2847 = vadd.xlane.f32.xlu1 %v2846_v12  ;;  %v2782_v2 = vmul.f32 1.442695, %v2732_v54  ;;  %v2699_v40 = vsel %vm1873_vm2, %v6312_v63, -inf }
 0x590   : > { %4222 = vpow2.f32 %v2774_v16 }
 0x592   : > { %v1966_v53 = vpop.xlane.xlu1 %1965 }
 0x593   : > { %v2000_v1 = vsub.f32 %v6089_v26, %v1966_v53  ;;  %v2946_v26 = vmul.f32 %v4217_v0, %v6115_v29  ;;  %v2696_v0 = vsel %vm1873_vm2, %v6298_v10, -inf }
 0x595   : > { %v6263_v49 = vpop.eup %4220  ;;  %v2062_v6 = vmul.f32 1.442695, %v2000_v1  ;;  %v2974_v45 = vpack.c.bf16 %v2947_v18, %v2946_v26 }
 0x596   : > { %v2855_v57 = vsel %vm1873_vm2, %v6263_v49, 0.0  ;;  %v6274_v32 = vpop.eup %4222  ;;  %v6319_v16 = vpop.f32.mrf.mxu1 }
 0x597   : > { %4224 = vpow2.f32 %v2062_v6  ;;  %2856 = vadd.xlane.f32.xlu0 %v2855_v57  ;;  %2154 = vadd.xlane.f32.xlu1 %v2153_v7  ;;  %v2852_v33 = vsel %vm1873_vm2, %v6274_v32, 0.0  ;;  %v2702_v24 = vsel %vm1873_vm2, %v6319_v16, -inf }
 0x598   : > { %4226 = vpow2.f32 %v2780_v35 }
 0x599   : > { %4228 = vpow2.f32 %v2064_v55 }
 0x59a   : > { %4230 = vpow2.f32 %v2782_v2 }
 0x59b   : > { %4232 = vpow2.f32 %v2778_v61 }
 0x59d   : > { %v6276_v11 = vpop.eup %4224 }
 0x59e   : > { %3959 = vmatmul.msk.bf16.gmra.mxu0 %vm1873_vm2, %v2974_v45  ;;  %v2156_v29 = vsel %vm1873_vm2, %v6276_v11, 0.0  ;;  %v6290_v60 = vpop.eup %4226  ;;  %v6334_v55 = vpop.f32.mrf.mxu1 }
 0x59f   : > { %2157 = vadd.xlane.f32.xlu2 %v2156_v29  ;;  %2685 = vmax.xlane.f32.xlu0 %v2684_v13  ;;  %v6292_v28 = vpop.eup %4228  ;;  %v2861_v30 = vsel %vm1873_vm2, %v6290_v60, 0.0 }
 0x5a0   : > { %2853 = vadd.xlane.f32.xlu1 %v2852_v33  ;;  %v2159_v8 = vsel %vm1873_vm2, %v6292_v28, 0.0  ;;  %v6302_v39 = vpop.eup %4230 }
 0x5a1   : > { %v6304_v15 = vpop.eup %4232  ;;  %v2864_v37 = vsel %vm1873_vm2, %v6302_v39, 0.0 }
 0x5a2   : > { %v2858_v31 = vsel %vm1873_vm2, %v6304_v15, 0.0 }
 0x5a7   : > { %2688 = vmax.xlane.f32.xlu2 %v2687_v25  ;;  %2862 = vadd.xlane.f32.xlu0 %v2861_v30 }
 0x5a8   : > { %2160 = vadd.xlane.f32.xlu1 %v2159_v8 }
 0x5af   : > { %2691 = vmax.xlane.f32.xlu2 %v2690_v34  ;;  %2865 = vadd.xlane.f32.xlu0 %v2864_v37  ;;  %v2146_v41 = vpop.xlane.xlu2 %2145  ;;  %v4019_v34 = vld [vmem:[%s6552_s8 + $0x8] sm:$0xff] }
 0x5b0   : > { %2859 = vadd.xlane.f32.xlu1 %v2858_v31  ;;  %3214 = vmatpush.bf16.msrb.mxu3 %v4019_v34 }
 0x5b7   : > { %2700 = vmax.xlane.f32.xlu0 %v2699_v40  ;;  %v2677_v46 = vpop.xlane.xlu2 %2676 }
 0x5b8   : > { %2694 = vmax.xlane.f32.xlu1 %v2693_v4  ;;  %v2733_v5 = vsub.f32 %v6182_v62, %v2677_v46 }
 0x5ba   : > { %v2784_v12 = vmul.f32 1.442695, %v2733_v5 }
 0x5bc   : > { %4234 = vpow2.f32 %v2784_v12 }
 0x5bd   : > { %v6340_v44 = vpop.f32.mrf.mxu1 }
 0x5be   : > { %v2708_v13 = vsel %vm1873_vm2, %v6340_v44, -inf }
 0x5bf   : > { %v2851_v53 = vpop.xlane.xlu0 %2850  ;;  %2703 = vmax.xlane.f32.xlu0 %v2702_v24 }
 0x5c0   : > { %2697 = vmax.xlane.f32.xlu1 %v2696_v0 }
 0x5c2   : > { %v6325_v1 = vpop.eup %4234 }
 0x5c3   : > { %v2867_v27 = vsel %vm1873_vm2, %v6325_v1, 0.0 }
 0x5c4   : > { %2868 = vadd.xlane.f32.xlu2 %v2867_v27 }
 0x5c7   : > { %v2680_v62 = vpop.xlane.xlu0 %2679 }
 0x5c8   : > { %v2734_v52 = vsub.f32 %v6199_v51, %v2680_v62  ;;  %v2705_v51 = vsel %vm1873_vm2, %v6334_v55, -inf }
 0x5ca   : > { %v2786_v6 = vmul.f32 1.442695, %v2734_v52 }
 0x5cc   : > { %4236 = vpow2.f32 %v2786_v6 }
 0x5cf   : > { %v2365_v36 = vpop.f32.mrf.mxu3  ;;  %v2152_v57 = vpop.xlane.xlu2 %2151 }
 0x5d2   : > { %v6330_v7 = vpop.eup %4236 }
 0x5d3   : > { %v2870_v26 = vsel %vm1873_vm2, %v6330_v7, 0.0 }
 0x5d4   : > { %2871 = vadd.xlane.f32.xlu2 %v2870_v26 }
 0x5d7   : > { %v2367_v18 = vpop.f32.mrf.mxu3  ;;  %v2683_v35 = vpop.xlane.xlu2 %2682 }
 0x5d8   : > { %v2405_v50 = vpack.c.bf16 %v2367_v18, %v2365_v36  ;;  %v2735_v45 = vsub.f32 %v6210_v56, %v2683_v35 }
 0x5da   : > { %v2788_v54 = vmul.f32 1.442695, %v2735_v45  ;;  %4005 = vmatmul.msk.bf16.gmra.mxu2 %vm1723_vm1, %v2405_v50 }
 0x5dc   : > { %4238 = vpow2.f32 %v2788_v54  ;;  %2706 = vmax.xlane.f32.xlu2 %v2705_v51 }
 0x5dd   : > { %4240 = vrcp.f32 %v6243_v22 }
 0x5e2   : > { %v6342_v29 = vpop.eup %4238 }
 0x5e3   : > { %v2873_v33 = vsel %vm1873_vm2, %v6342_v29, 0.0  ;;  %v4241_v2 = vpop.eup %4240 }
 0x5e4   : > { %2709 = vmax.xlane.f32.xlu2 %v2708_v13  ;;  %2874 = vadd.xlane.f32.xlu1 %v2873_v33  ;;  %v2218_v30 = vmul.f32 %v4241_v2, %v6130_v43  ;;  %v6370_v13 = vpop.f32.mrf.mxu0 }
 0x5ea   : > { %v2143_v56 = vpop.xlane.xlu1 %2142 }
 0x5eb   : > { %4242 = vrcp.f32 %v2143_v56 }
 0x5ec   : > { %4244 = vrcp.f32 %v6256_v48 }
 0x5f1   : > { %v4243_v61 = vpop.eup %4242 }
 0x5f2   : > { %v2842_v25 = vpop.xlane.xlu1 %2841  ;;  %v2219_v8 = vmul.f32 %v4243_v61, %v6219_v17  ;;  %v4245_v22 = vpop.eup %4244 }
 0x5f3   : > { %4246 = vrcp.f32 %v2842_v25  ;;  %v2949_v40 = vmul.f32 %v4245_v22, %v6144_v38 }
 0x5f4   : > { %v2238_v37 = vpack.c.bf16 %v2219_v8, %v2218_v30  ;;  %4248 = vrcp.f32 %v2146_v41 }
 0x5f6   : > { %3935 = vmatmul.msk.bf16.gmra.mxu3 %vm1873_vm2, %v2238_v37 }
 0x5f9   : > { %v4247_v31 = vpop.eup %4246 }
 0x5fa   : > { %v2948_v48 = vmul.f32 %v4247_v31, %v6225_v20  ;;  %v2149_v4 = vpop.xlane.xlu1 %2148  ;;  %v4249_v17 = vpop.eup %4248 }
 0x5fb   : > { %4250 = vrcp.f32 %v2149_v4  ;;  %v2220_v12 = vmul.f32 %v4249_v17, %v6177_v14  ;;  %v6380_v31 = vpop.f32.mrf.mxu1 }
 0x5fc   : > { %v2975_v43 = vpack.c.bf16 %v2949_v40, %v2948_v48  ;;  %4252 = vrcp.f32 %v2851_v53 }
 0x5fe   : > { %3960 = vmatmul.msk.bf16.gmra.mxu0 %vm1873_vm2, %v2975_v43  ;;  %v3057_v43 = vpop.f32.mrf.mxu0 }
 0x601   : > { %v4251_v46 = vpop.eup %4250 }
 0x602   : > { %v2848_v5 = vpop.xlane.xlu1 %2847  ;;  %v2221_v24 = vmul.f32 %v4251_v46, %v6235_v21  ;;  %v4253_v38 = vpop.eup %4252 }
 0x603   : > { %4254 = vrcp.f32 %v2848_v5  ;;  %v2951_v27 = vmul.f32 %v4253_v38, %v6193_v23 }
 0x604   : > { %v2239_v0 = vpack.c.bf16 %v2221_v24, %v2220_v12  ;;  %4256 = vrcp.f32 %v2152_v57  ;;  %v2711_v12 = vsel %vm1873_vm2, %v6380_v31, -inf }
 0x606   : > { %3936 = vmatmul.msk.bf16.gmra.mxu3 %vm1873_vm2, %v2239_v0 }
 0x609   : > { %v4255_v41 = vpop.eup %4254  ;;  %v2370_v20 = vpop.f32.mrf.mxu3 }
 0x60a   : > { %v2950_v62 = vmul.f32 %v4255_v41, %v6249_v47  ;;  %v2857_v52 = vpop.xlane.xlu0 %2856  ;;  %v2155_v6 = vpop.xlane.xlu1 %2154 }
 0x60b   : > { %4258 = vrcp.f32 %v2155_v6  ;;  %v4257_v14 = vpop.eup %4256 }
 0x60c   : > { %v2976_v53 = vpack.c.bf16 %v2951_v27, %v2950_v62  ;;  %4260 = vrcp.f32 %v2857_v52  ;;  %v2222_v23 = vmul.f32 %v4257_v14, %v6206_v42 }
 0x60e   : > { %3961 = vmatmul.msk.bf16.gmra.mxu0 %vm1873_vm2, %v2976_v53  ;;  %v3060_v53 = vpop.f32.mrf.mxu0 }
 0x611   : > { %v2372_v21 = vpop.f32.mrf.mxu3  ;;  %v4259_v36 = vpop.eup %4258 }
 0x612   : > { %v2406_v26 = vpack.c.bf16 %v2372_v21, %v2370_v20  ;;  %v2686_v18 = vpop.xlane.xlu0 %2685  ;;  %v2158_v35 = vpop.xlane.xlu2 %2157  ;;  %v2223_v47 = vmul.f32 %v4259_v36, %v6258_v19 }
 0x613   : > { %v2736_v50 = vsub.f32 %v6230_v58, %v2686_v18  ;;  %v2854_v45 = vpop.xlane.xlu1 %2853  ;;  %v4261_v51 = vpop.eup %4260 }
 0x614   : > { %4262 = vrcp.f32 %v2854_v45  ;;  %4006 = vmatmul.msk.bf16.gmra.mxu2 %vm1723_vm1, %v2406_v26  ;;  %v2240_v54 = vpack.c.bf16 %v2223_v47, %v2222_v23  ;;  %v2953_v2 = vmul.f32 %v4261_v51, %v6263_v49  ;;  %v3135_v26 = vpack.c.bf16 %v3057_v43, %v6370_v13 }
 0x615   : > { %v2790_v57 = vmul.f32 1.442695, %v2736_v50 }
 0x616   : > { %3937 = vmatmul.msk.bf16.gmra.mxu3 %vm1873_vm2, %v2240_v54 }
 0x617   : > { %4264 = vpow2.f32 %v2790_v57 }
 0x618   : > { %4266 = vrcp.f32 %v2158_v35 }
 0x61a   : > { %v4263_v33 = vpop.eup %4262  ;;  %v2863_v56 = vpop.xlane.xlu0 %2862 }
 0x61b   : > { %v2689_v58 = vpop.xlane.xlu2 %2688  ;;  %v2952_v42 = vmul.f32 %v4263_v33, %v6274_v32  ;;  %v2161_v19 = vpop.xlane.xlu1 %2160 }
 0x61c   : > { %v2737_v61 = vsub.f32 %v6245_v9, %v2689_v58  ;;  %4268 = vrcp.f32 %v2161_v19 }
 0x61d   : > { %v6375_v25 = vpop.eup %4264  ;;  %v2977_v8 = vpack.c.bf16 %v2953_v2, %v2952_v42 }
 0x61e   : > { %v2792_v30 = vmul.f32 1.442695, %v2737_v61  ;;  %v2876_v34 = vsel %vm1873_vm2, %v6375_v25, 0.0  ;;  %v4267_v37 = vpop.eup %4266 }
 0x61f   : > { %3962 = vmatmul.msk.bf16.gmra.mxu0 %vm1873_vm2, %v2977_v8  ;;  %2877 = vadd.xlane.f32.xlu1 %v2876_v34  ;;  %v2224_v9 = vmul.f32 %v4267_v37, %v6276_v11 }
 0x620   : > { %4270 = vpow2.f32 %v2792_v30 }
 0x621   : > { %4272 = vrcp.f32 %v2863_v56 }
 0x622   : > { %v4269_v22 = vpop.eup %4268  ;;  %v2866_v49 = vpop.xlane.xlu0 %2865 }
 0x623   : > { %v2692_v32 = vpop.xlane.xlu2 %2691  ;;  %v2225_v40 = vmul.f32 %v4269_v22, %v6292_v28  ;;  %v2860_v48 = vpop.xlane.xlu1 %2859 }
 0x624   : > { %v2738_v4 = vsub.f32 %v6260_v59, %v2692_v32  ;;  %4274 = vrcp.f32 %v2860_v48 }
 0x625   : > { %v2241_v5 = vpack.c.bf16 %v2225_v40, %v2224_v9 }
 0x626   : > { %v6385_v17 = vpop.eup %4270  ;;  %v2794_v46 = vmul.f32 1.442695, %v2738_v4 }
 0x627   : > { %v2879_v24 = vsel %vm1873_vm2, %v6385_v17, 0.0  ;;  %3938 = vmatmul.msk.bf16.gmra.mxu3 %vm1873_vm2, %v2241_v5  ;;  %2712 = vmax.xlane.f32.xlu1 %v2711_v12  ;;  %v4273_v11 = vpop.eup %4272 }
 0x628   : > { %4276 = vpow2.f32 %v2794_v46  ;;  %2880 = vadd.xlane.f32.xlu0 %v2879_v24  ;;  %v2955_v0 = vmul.f32 %v4273_v11, %v6290_v60 }
 0x62a   : > { %v4275_v28 = vpop.eup %4274  ;;  %v2701_v59 = vpop.xlane.xlu0 %2700 }
 0x62b   : > { %v2954_v38 = vmul.f32 %v4275_v28, %v6304_v15  ;;  %v2695_v41 = vpop.xlane.xlu1 %2694  ;;  %v2741_v20 = vsub.f32 %v6312_v63, %v2701_v59 }
 0x62c   : > { %v2739_v27 = vsub.f32 %v6278_v3, %v2695_v41 }
 0x62d   : > { %v2800_v52 = vmul.f32 1.442695, %v2741_v20  ;;  %v2978_v6 = vpack.c.bf16 %v2955_v0, %v2954_v38  ;;  %v6440_v0 = vpop.f32.mrf.mxu2 }
 0x62e   : > { %v6396_v62 = vpop.eup %4276  ;;  %v2796_v14 = vmul.f32 1.442695, %v2739_v27 }
 0x62f   : > { %v2882_v21 = vsel %vm1873_vm2, %v6396_v62, 0.0  ;;  %4278 = vpow2.f32 %v2800_v52  ;;  %3963 = vmatmul.msk.bf16.gmra.mxu0 %vm1873_vm2, %v2978_v6 }
 0x630   : > { %4280 = vpow2.f32 %v2796_v14  ;;  %2883 = vadd.xlane.f32.xlu0 %v2882_v21 }
 0x631   : > { %4282 = vrcp.f32 %v2866_v49 }
 0x632   : > { %v2704_v60 = vpop.xlane.xlu0 %2703 }
 0x633   : > { %v2698_v15 = vpop.xlane.xlu1 %2697  ;;  %v2742_v63 = vsub.f32 %v6319_v16, %v2704_v60 }
 0x634   : > { %v2740_v3 = vsub.f32 %v6298_v10, %v2698_v15  ;;  %v3062_v10 = vpop.f32.mrf.mxu0 }
 0x635   : > { %v6403_v36 = vpop.eup %4278  ;;  %v2802_v18 = vmul.f32 1.442695, %v2742_v63  ;;  %v3136_v19 = vpack.c.bf16 %v3062_v10, %v3060_v53  ;;  %v6443_v41 = vpop.f32.mrf.mxu2 }
 0x636   : > { %v6406_v35 = vpop.eup %4280  ;;  %v2798_v50 = vmul.f32 1.442695, %v2740_v3  ;;  %v2891_v45 = vsel %vm1873_vm2, %v6403_v36, 0.0 }
 0x637   : > { %4284 = vpow2.f32 %v2802_v18  ;;  %3975 = vmatmul.msk.bf16.vlgmr.msrb.gmra.mxu3 %vm1723_vm1, %v3135_v26  ;;  %v2885_v16 = vsel %vm1873_vm2, %v6406_v35, 0.0  ;;  %v2869_v23 = vpop.xlane.xlu2 %2868  ;;  %v4283_v47 = vpop.eup %4282 }
 0x638   : > { %4286 = vpow2.f32 %v2798_v50  ;;  %2886 = vadd.xlane.f32.xlu2 %v2885_v16  ;;  %2892 = vadd.xlane.f32.xlu0 %v2891_v45  ;;  %v2956_v56 = vmul.f32 %v4283_v47, %v6302_v39 }
 0x639   : > { %4288 = vrcp.f32 %v2869_v23 }
 0x63c   : > { %v3065_v2 = vpop.f32.mrf.mxu0 }
 0x63d   : > { %v6413_v57 = vpop.eup %4284  ;;  %v6446_v53 = vpop.f32.mrf.mxu2 }
 0x63e   : > { %v6415_v54 = vpop.eup %4286  ;;  %v2894_v51 = vsel %vm1873_vm2, %v6413_v57, 0.0 }
 0x63f   : > { %v4289_v13 = vpop.eup %4288  ;;  %v2888_v33 = vsel %vm1873_vm2, %v6415_v54, 0.0 }
 0x640   : > { %v2957_v58 = vmul.f32 %v4289_v13, %v6325_v1  ;;  %2895 = vadd.xlane.f32.xlu2 %v2894_v51  ;;  %2889 = vadd.xlane.f32.xlu1 %v2888_v33 }
 0x642   : > { %v2979_v42 = vpack.c.bf16 %v2957_v58, %v2956_v56 }
 0x644   : > { %3964 = vmatmul.msk.bf16.gmra.mxu0 %vm1873_vm2, %v2979_v42  ;;  %v3067_v30 = vpop.f32.mrf.mxu0 }
 0x645   : > { %v3137_v39 = vpack.c.bf16 %v3067_v30, %v3065_v2  ;;  %v6449_v60 = vpop.f32.mrf.mxu2 }
 0x647   : > { %3976 = vmatmul.msk.bf16.gmra.mxu3 %vm1723_vm1, %v3136_v19  ;;  %v2872_v61 = vpop.xlane.xlu2 %2871 }
 0x64c   : > { %v3070_v22 = vpop.f32.mrf.mxu0 }
 0x64d   : > { %v6453_v50 = vpop.f32.mrf.mxu2 }
 0x64f   : > { %v2707_v8 = vpop.xlane.xlu2 %2706 }
 0x650   : > { %v2743_v34 = vsub.f32 %v6334_v55, %v2707_v8 }
 0x652   : > { %v2804_v37 = vmul.f32 1.442695, %v2743_v34 }
 0x654   : > { %4290 = vpow2.f32 %v2804_v37  ;;  %v3072_v43 = vpop.f32.mrf.mxu0 }
 0x655   : > { %4292 = vrcp.f32 %v2872_v61  ;;  %v3138_v11 = vpack.c.bf16 %v3072_v43, %v3070_v22  ;;  %v6456_v58 = vpop.f32.mrf.mxu2 }
 0x657   : > { %3977 = vmatmul.msk.bf16.gmra.mxu3 %vm1723_vm1, %v3137_v39  ;;  %v2875_v1 = vpop.xlane.xlu1 %2874  ;;  %v2710_v49 = vpop.xlane.xlu2 %2709 }
 0x658   : > { %4294 = vrcp.f32 %v2875_v1  ;;  %v2744_v32 = vsub.f32 %v6340_v44, %v2710_v49 }
 0x65a   : > { %v6428_v9 = vpop.eup %4290  ;;  %v2806_v40 = vmul.f32 1.442695, %v2744_v32 }
 0x65b   : > { %v2897_v48 = vsel %vm1873_vm2, %v6428_v9, 0.0  ;;  %v4293_v4 = vpop.eup %4292 }
 0x65c   : > { %4296 = vpow2.f32 %v2806_v40  ;;  %2898 = vadd.xlane.f32.xlu1 %v2897_v48  ;;  %v2958_v46 = vmul.f32 %v4293_v4, %v6330_v7  ;;  %v3075_v28 = vpop.f32.mrf.mxu0 }
 0x65d   : > { %v6467_v22 = vpop.f32.mrf.mxu2 }
 0x65e   : > { %v4295_v55 = vpop.eup %4294 }
 0x65f   : > { %v2959_v5 = vmul.f32 %v4295_v55, %v6342_v29 }
 0x661   : > { %v2980_v12 = vpack.c.bf16 %v2959_v5, %v2958_v46 }
 0x662   : > { %v6434_v24 = vpop.eup %4296 }
 0x663   : > { %3965 = vmatmul.msk.bf16.gmra.mxu0 %vm1873_vm2, %v2980_v12  ;;  %v2900_v44 = vsel %vm1873_vm2, %v6434_v24, 0.0 }
 0x664   : > { %2901 = vadd.xlane.f32.xlu0 %v2900_v44  ;;  %v3077_v59 = vpop.f32.mrf.mxu0 }
 0x665   : > { %v3139_v38 = vpack.c.bf16 %v3077_v59, %v3075_v28  ;;  %v6471_v43 = vpop.f32.mrf.mxu2 }
 0x667   : > { %3978 = vmatmul.msk.bf16.gmra.mxu3 %vm1723_vm1, %v3138_v11 }
 0x677   : > { %3979 = vmatmul.msk.bf16.gmra.mxu3 %vm1723_vm1, %v3139_v38 }
 0x679   : > { %v2375_v7 = vpop.f32.mrf.mxu3 }
 0x67b   : > { %v3080_v29 = vpop.f32.mrf.mxu0 }
 0x681   : > { %v2377_v20 = vpop.f32.mrf.mxu3 }
 0x682   : > { %v2407_v27 = vpack.c.bf16 %v2377_v20, %v2375_v7 }
 0x683   : > { %v3082_v52 = vpop.f32.mrf.mxu0 }
 0x684   : > { %v3140_v6 = vpack.c.bf16 %v3082_v52, %v3080_v29  ;;  %4007 = vmatmul.msk.bf16.gmra.mxu2 %vm1723_vm1, %v2407_v27 }
 0x687   : > { %3980 = vmatmul.msk.bf16.gmra.mxu3 %vm1723_vm1, %v3140_v6 }
 0x689   : > { %v2380_v14 = vpop.f32.mrf.mxu3 }
 0x68b   : > { %v3085_v21 = vpop.f32.mrf.mxu0 }
 0x691   : > { %v2382_v15 = vpop.f32.mrf.mxu3 }
 0x692   : > { %v2408_v63 = vpack.c.bf16 %v2382_v15, %v2380_v14  ;;  %v2878_v3 = vpop.xlane.xlu1 %2877 }
 0x693   : > { %v3087_v26 = vpop.f32.mrf.mxu0  ;;  %4298 = vrcp.f32 %v2878_v3 }
 0x694   : > { %v3141_v18 = vpack.c.bf16 %v3087_v26, %v3085_v21  ;;  %4008 = vmatmul.msk.bf16.gmra.mxu2 %vm1723_vm1, %v2408_v63 }
 0x697   : > { %3981 = vmatmul.msk.bf16.gmra.mxu3 %vm1723_vm1, %v3141_v18 }
 0x699   : > { %v2385_v45 = vpop.f32.mrf.mxu3  ;;  %v4299_v13 = vpop.eup %4298 }
 0x69a   : > { %v2713_v16 = vpop.xlane.xlu1 %2712  ;;  %v2960_v2 = vmul.f32 %v4299_v13, %v6375_v25 }
 0x69b   : > { %v2745_v23 = vsub.f32 %v6380_v31, %v2713_v16  ;;  %v2881_v10 = vpop.xlane.xlu0 %2880 }
 0x69c   : > { %4300 = vrcp.f32 %v2881_v10  ;;  %v3090_v47 = vpop.f32.mrf.mxu0 }
 0x69d   : > { %v2808_v51 = vmul.f32 1.442695, %v2745_v23 }
 0x69f   : > { %4302 = vpow2.f32 %v2808_v51 }
 0x6a1   : > { %v2387_v56 = vpop.f32.mrf.mxu3 }
 0x6a2   : > { %v4301_v33 = vpop.eup %4300  ;;  %v2409_v19 = vpack.c.bf16 %v2387_v56, %v2385_v45 }
 0x6a3   : > { %v2961_v42 = vmul.f32 %v4301_v33, %v6385_v17  ;;  %v2884_v37 = vpop.xlane.xlu0 %2883 }
 0x6a4   : > { %v3092_v61 = vpop.f32.mrf.mxu0  ;;  %4009 = vmatmul.msk.bf16.gmra.mxu2 %vm1723_vm1, %v2409_v19  ;;  %4304 = vrcp.f32 %v2884_v37 }
 0x6a5   : > { %v6460_v30 = vpop.eup %4302  ;;  %v3142_v8 = vpack.c.bf16 %v3092_v61, %v3090_v47  ;;  %v2981_v31 = vpack.c.bf16 %v2961_v42, %v2960_v2 }
 0x6a6   : > { %v2903_v34 = vsel %vm1873_vm2, %v6460_v30, 0.0 }
 0x6a7   : > { %3966 = vmatmul.msk.bf16.gmra.mxu0 %vm1873_vm2, %v2981_v31  ;;  %3982 = vmatmul.msk.bf16.gmra.mxu3 %vm1723_vm1, %v3142_v8 }
 0x6a8   : > { %2904 = vadd.xlane.f32.xlu2 %v2903_v34 }
 0x6aa   : > { %v2390_v25 = vpop.f32.mrf.mxu3  ;;  %v4305_v1 = vpop.eup %4304 }
 0x6ab   : > { %v2887_v17 = vpop.xlane.xlu2 %2886  ;;  %v2962_v48 = vmul.f32 %v4305_v1, %v6396_v62  ;;  %v2893_v44 = vpop.xlane.xlu0 %2892  ;;  %v6479_v62 = vld [vmem:[%s6553_s9] ss:$0 sm:$0xff] }
 0x6ac   : > { %v3095_v39 = vpop.f32.mrf.mxu0  ;;  %4306 = vrcp.f32 %v2887_v17 }
 0x6b2   : > { %v2392_v49 = vpop.f32.mrf.mxu3  ;;  %v4307_v32 = vpop.eup %4306 }
 0x6b3   : > { %v2410_v40 = vpack.c.bf16 %v2392_v49, %v2390_v25  ;;  %v2963_v4 = vmul.f32 %v4307_v32, %v6406_v35  ;;  %v2890_v5 = vpop.xlane.xlu1 %2889  ;;  %v2896_v63 = vpop.xlane.xlu2 %2895 }
 0x6b4   : > { %v3097_v55 = vpop.f32.mrf.mxu0  ;;  %4308 = vrcp.f32 %v2890_v5 }
 0x6b5   : > { %v3143_v46 = vpack.c.bf16 %v3097_v55, %v3095_v39  ;;  %4010 = vmatmul.msk.bf16.gmra.mxu2 %vm1723_vm1, %v2410_v40  ;;  %v2982_v12 = vpack.c.bf16 %v2963_v4, %v2962_v48  ;;  %4310 = vrcp.f32 %v2893_v44 }
 0x6b6   : > { %4312 = vrcp.f32 %v2896_v63 }
 0x6b7   : > { %3983 = vmatmul.msk.bf16.gmra.mxu3 %vm1723_vm1, %v3143_v46  ;;  %3967 = vmatmul.msk.bf16.gmra.mxu0 %vm1873_vm2, %v2982_v12 }
 0x6ba   : > { %v3216_v35 = vpop.f32.mrf.mxu3  ;;  %v4309_v59 = vpop.eup %4308 }
 0x6bb   : > { %v3360_v11 = vadd.f32 %v6440_v0, %v3216_v35  ;;  %v4311_v38 = vpop.eup %4310  ;;  %v2964_v29 = vmul.f32 %v4309_v59, %v6415_v54 }
 0x6bc   : > { %v2965_v52 = vmul.f32 %v4311_v38, %v6403_v36  ;;  %v4313_v18 = vpop.eup %4312 }
 0x6bd   : > { %v3443_v28 = vadd.f32 %v6479_v62, %v3360_v11  ;;  %v2966_v23 = vmul.f32 %v4313_v18, %v6413_v57  ;;  %v3379_v57 = vpop.f32.mrf.mxu2 }
 0x6be   : > { %v2983_v14 = vpack.c.bf16 %v2965_v52, %v2964_v29 }
 0x6bf   : > { %3475 = vxpose.xlu1.b32.start [1/16] (narrow) %v3443_v28, 32 }
 0x6c1   : > { %v3100_v7 = vpop.f32.mrf.mxu0 }
 0x6c2   : > { %v3218_v20 = vpop.f32.mrf.mxu3 }
 0x6c3   : > { %v3362_v27 = vadd.f32 %v6443_v41, %v3218_v20 }
 0x6c5   : > { %v3444_v6 = vadd.f32 %v6479_v62, %v3362_v27  ;;  %v3381_v8 = vpop.f32.mrf.mxu2 }
 0x6c7   : > { %3476 = vxpose.xlu1.b32.cont [2/16] (narrow) %v3444_v6, 32  ;;  %3968 = vmatmul.msk.bf16.gmra.mxu0 %vm1873_vm2, %v2983_v14 }
 0x6c9   : > { %v3102_v0 = vpop.f32.mrf.mxu0 }
 0x6ca   : > { %v3144_v21 = vpack.c.bf16 %v3102_v0, %v3100_v7  ;;  %v3221_v15 = vpop.f32.mrf.mxu3 }
 0x6cb   : > { %v3365_v3 = vadd.f32 %v6446_v53, %v3221_v15 }
 0x6cc   : > { %3984 = vmatmul.msk.bf16.gmra.mxu3 %vm1723_vm1, %v3144_v21 }
 0x6cd   : > { %v3445_v54 = vadd.f32 %v6479_v62, %v3365_v3  ;;  %v3384_v17 = vpop.f32.mrf.mxu2 }
 0x6cf   : > { %3477 = vxpose.xlu1.b32.cont [3/16] (narrow) %v3445_v54, 32  ;;  %v2899_v41 = vpop.xlane.xlu1 %2898 }
 0x6d0   : > { %4314 = vrcp.f32 %v2899_v41 }
 0x6d2   : > { %v3223_v36 = vpop.f32.mrf.mxu3 }
 0x6d3   : > { %v3367_v26 = vadd.f32 %v6449_v60, %v3223_v36 }
 0x6d5   : > { %v3446_v45 = vadd.f32 %v6479_v62, %v3367_v26  ;;  %v3386_v32 = vpop.f32.mrf.mxu2 }
 0x6d6   : > { %v4315_v16 = vpop.eup %4314 }
 0x6d7   : > { %v2967_v10 = vmul.f32 %v4315_v16, %v6428_v9  ;;  %3478 = vxpose.xlu1.b32.cont [4/16] (narrow) %v3446_v45, 32  ;;  %v2902_v12 = vpop.xlane.xlu0 %2901 }
 0x6d8   : > { %4316 = vrcp.f32 %v2902_v12 }
 0x6d9   : > { %v2984_v53 = vpack.c.bf16 %v2967_v10, %v2966_v23 }
 0x6da   : > { %v3226_v47 = vpop.f32.mrf.mxu3 }
 0x6db   : > { %v3370_v51 = vadd.f32 %v6453_v50, %v3226_v47  ;;  %3969 = vmatmul.msk.bf16.gmra.mxu0 %vm1873_vm2, %v2984_v53 }
 0x6dd   : > { %v3447_v13 = vadd.f32 %v6479_v62, %v3370_v51  ;;  %v3389_v55 = vpop.f32.mrf.mxu2 }
 0x6de   : > { %v4317_v38 = vpop.eup %4316 }
 0x6df   : > { %3479 = vxpose.xlu1.b32.cont [5/16] (narrow) %v3447_v13, 32  ;;  %v2968_v20 = vmul.f32 %v4317_v38, %v6434_v24 }
 0x6e0   : > { %v3105_v33 = vpop.f32.mrf.mxu0 }
 0x6e2   : > { %v3228_v60 = vpop.f32.mrf.mxu3 }
 0x6e3   : > { %v3372_v56 = vadd.f32 %v6456_v58, %v3228_v60 }
 0x6e5   : > { %v3448_v2 = vadd.f32 %v6479_v62, %v3372_v56  ;;  %v3391_v44 = vpop.f32.mrf.mxu2 }
 0x6e7   : > { %3480 = vxpose.xlu1.b32.cont [6/16] (narrow) %v3448_v2, 32 }
 0x6e8   : > { %v3107_v42 = vpop.f32.mrf.mxu0 }
 0x6e9   : > { %v3145_v9 = vpack.c.bf16 %v3107_v42, %v3105_v33 }
 0x6ea   : > { %v3231_v19 = vpop.f32.mrf.mxu3 }
 0x6eb   : > { %v3375_v61 = vadd.f32 %v6467_v22, %v3231_v19  ;;  %3985 = vmatmul.msk.bf16.gmra.mxu3 %vm1723_vm1, %v3145_v9 }
 0x6ed   : > { %v3449_v50 = vadd.f32 %v6479_v62, %v3375_v61  ;;  %v3394_v6 = vpop.f32.mrf.mxu2 }
 0x6ef   : > { %3481 = vxpose.xlu1.b32.cont [7/16] (narrow) %v3449_v50, 32 }
 0x6f2   : > { %v3233_v31 = vpop.f32.mrf.mxu3 }
 0x6f3   : > { %v3377_v34 = vadd.f32 %v6471_v43, %v3233_v31 }
 0x6f5   : > { %v3450_v58 = vadd.f32 %v6479_v62, %v3377_v34  ;;  %v3396_v36 = vpop.f32.mrf.mxu2 }
 0x6f7   : > { %3482 = vxpose.xlu1.b32.cont [8/16] (narrow) %v3450_v58, 32 }
 0x6fa   : > { %v3236_v37 = vpop.f32.mrf.mxu3 }
 0x6fb   : > { %v3380_v25 = vadd.f32 %v3379_v57, %v3236_v37 }
 0x6fd   : > { %v3451_v39 = vadd.f32 %v6479_v62, %v3380_v25  ;;  %v3399_v45 = vpop.f32.mrf.mxu2 }
 0x6ff   : > { %3483 = vxpose.xlu1.b32.cont [9/16] (narrow) %v3451_v39, 32 }
 0x702   : > { %v3238_v1 = vpop.f32.mrf.mxu3 }
 0x703   : > { %v3382_v22 = vadd.f32 %v3381_v8, %v3238_v1 }
 0x705   : > { %v3452_v49 = vadd.f32 %v6479_v62, %v3382_v22  ;;  %v3401_v51 = vpop.f32.mrf.mxu2 }
 0x707   : > { %3484 = vxpose.xlu1.b32.cont [10/16] (narrow) %v3452_v49, 32 }
 0x70a   : > { %v3241_v40 = vpop.f32.mrf.mxu3 }
 0x70b   : > { %v3385_v48 = vadd.f32 %v3384_v17, %v3241_v40 }
 0x70d   : > { %v3453_v4 = vadd.f32 %v6479_v62, %v3385_v48  ;;  %v3404_v2 = vpop.f32.mrf.mxu2 }
 0x70f   : > { %3485 = vxpose.xlu1.b32.cont [11/16] (narrow) %v3453_v4, 32 }
 0x712   : > { %v3243_v43 = vpop.f32.mrf.mxu3 }
 0x713   : > { %v3387_v46 = vadd.f32 %v3386_v32, %v3243_v43 }
 0x715   : > { %v3454_v5 = vadd.f32 %v6479_v62, %v3387_v46  ;;  %v3406_v50 = vpop.f32.mrf.mxu2 }
 0x717   : > { %3486 = vxpose.xlu1.b32.cont [12/16] (narrow) %v3454_v5, 32 }
 0x71a   : > { %v3246_v35 = vpop.f32.mrf.mxu3 }
 0x71b   : > { %v3390_v11 = vadd.f32 %v3389_v55, %v3246_v35  ;;  %v2905_v28 = vpop.xlane.xlu2 %2904 }
 0x71c   : > { %4318 = vrcp.f32 %v2905_v28 }
 0x71d   : > { %v3455_v59 = vadd.f32 %v6479_v62, %v3390_v11  ;;  %v3409_v17 = vpop.f32.mrf.mxu2 }
 0x71f   : > { %3487 = vxpose.xlu1.b32.cont [13/16] (narrow) %v3455_v59, 32 }
 0x722   : > { %v4319_v7 = vpop.eup %4318  ;;  %v3248_v29 = vpop.f32.mrf.mxu3 }
 0x723   : > { %v2969_v27 = vmul.f32 %v4319_v7, %v6460_v30  ;;  %v3392_v52 = vadd.f32 %v3391_v44, %v3248_v29 }
 0x724   : > { %v3110_v14 = vpop.f32.mrf.mxu0 }
 0x725   : > { %v3456_v0 = vadd.f32 %v6479_v62, %v3392_v52  ;;  %v2985_v21 = vpack.c.bf16 %v2969_v27, %v2968_v20  ;;  %v3411_v49 = vpop.f32.mrf.mxu2 }
 0x727   : > { %3488 = vxpose.xlu1.b32.cont [14/16] (narrow) %v3456_v0, 32  ;;  %3970 = vmatmul.msk.bf16.gmra.mxu0 %vm1873_vm2, %v2985_v21 }
 0x72a   : > { %v3251_v15 = vpop.f32.mrf.mxu3 }
 0x72b   : > { %v3395_v63 = vadd.f32 %v3394_v6, %v3251_v15 }
 0x72c   : > { %v3112_v3 = vpop.f32.mrf.mxu0 }
 0x72d   : > { %v3457_v54 = vadd.f32 %v6479_v62, %v3395_v63  ;;  %v3146_v41 = vpack.c.bf16 %v3112_v3, %v3110_v14  ;;  %v3414_v55 = vpop.f32.mrf.mxu2 }
 0x72f   : > { %3986 = vmatmul.msk.bf16.gmra.mxu3 %vm1723_vm1, %v3146_v41  ;;  %3489 = vxpose.xlu1.b32.cont [15/16] (narrow) %v3457_v54, 32 }
 0x732   : > { %v3253_v24 = vpop.f32.mrf.mxu3 }
 0x733   : > { %v3397_v30 = vadd.f32 %v3396_v36, %v3253_v24 }
 0x734   : > { %v3115_v18 = vpop.f32.mrf.mxu0 }
 0x735   : > { %v3458_v26 = vadd.f32 %v6479_v62, %v3397_v30  ;;  %v3416_v44 = vpop.f32.mrf.mxu2 }
 0x737   : > { %3490 = vxpose.xlu1.b32.end [16/16] (narrow) %v3458_v26, 32 }
 0x73a   : > { %v3256_v16 = vpop.f32.mrf.mxu3 }
 0x73b   : > { %v3400_v23 = vadd.f32 %v3399_v45, %v3256_v16 }
 0x73c   : > { %v3117_v53 = vpop.f32.mrf.mxu0 }
 0x73d   : > { %v3459_v10 = vadd.f32 %v6479_v62, %v3400_v23  ;;  %v3147_v47 = vpack.c.bf16 %v3117_v53, %v3115_v18  ;;  %v3419_v59 = vpop.f32.mrf.mxu2 }
 0x73f   : > { %3507 = vxpose.xlu0.b32.start [1/16] (narrow) %v3459_v10, 32  ;;  %3987 = vmatmul.msk.bf16.gmra.mxu3 %vm1723_vm1, %v3147_v47 }
 0x742   : > { %v3258_v13 = vpop.f32.mrf.mxu3 }
 0x743   : > { %v3402_v33 = vadd.f32 %v3401_v51, %v3258_v13 }
 0x744   : > { %v3120_v56 = vpop.f32.mrf.mxu0 }
 0x745   : > { %v3460_v60 = vadd.f32 %v6479_v62, %v3402_v33  ;;  %v3421_v20 = vpop.f32.mrf.mxu2 }
 0x747   : > { %3508 = vxpose.xlu0.b32.cont [2/16] (narrow) %v3460_v60, 32 }
 0x74c   : > { %v3122_v57 = vpop.f32.mrf.mxu0 }
 0x74d   : > { %v3148_v42 = vpack.c.bf16 %v3122_v57, %v3120_v56  ;;  %v3424_v0 = vpop.f32.mrf.mxu2 }
 0x74f   : > { %v3261_v9 = vpop.f32.mrf.mxu3  ;;  %3988 = vmatmul.msk.bf16.gmra.mxu3 %vm1723_vm1, %v3148_v42 }
 0x750   : > { %v3405_v19 = vadd.f32 %v3404_v2, %v3261_v9 }
 0x752   : > { %v3461_v61 = vadd.f32 %v6479_v62, %v3405_v19 }
 0x754   : > { %3509 = vxpose.xlu0.b32.cont [3/16] (narrow) %v3461_v61, 32 }
 0x755   : > { %v3426_v3 = vpop.f32.mrf.mxu2 }
 0x757   : > { %v3263_v8 = vpop.f32.mrf.mxu3 }
 0x758   : > { %v3407_v31 = vadd.f32 %v3406_v50, %v3263_v8  ;;  %v3125_v34 = vpop.f32.mrf.mxu0 }
 0x75a   : > { %v3462_v58 = vadd.f32 %v6479_v62, %v3407_v31 }
 0x75c   : > { %3510 = vxpose.xlu0.b32.cont [4/16] (narrow) %v3462_v58, 32 }
 0x75d   : > { %v3429_v24 = vpop.f32.mrf.mxu2 }
 0x760   : > { %v3127_v37 = vpop.f32.mrf.mxu0 }
 0x761   : > { %v3149_v25 = vpack.c.bf16 %v3127_v37, %v3125_v34 }
 0x763   : > { %3989 = vmatmul.msk.bf16.gmra.mxu3 %vm1723_vm1, %v3149_v25  ;;  %v3491_v53 = vpop.trf.xlu1 }
 0x764   : > { %3539 = vst [vmem:[%s379_s12] sm:$0xff] %v3491_v53 }
 0x765   : > { %v3431_v45 = vpop.f32.mrf.mxu2 }
 0x76b   : > { %v3492_v42 = vpop.trf.xlu1 }
 0x76c   : > { %3541 = vst [vmem:[%s379_s12 + $0x10] sm:$0xff] %v3492_v42 }
 0x76d   : > { %v3434_v47 = vpop.f32.mrf.mxu2 }
 0x76e   : > { %v3266_v39 = vpop.f32.mrf.mxu3 }
 0x76f   : > { %v3410_v1 = vadd.f32 %v3409_v17, %v3266_v39 }
 0x771   : > { %v3463_v22 = vadd.f32 %v6479_v62, %v3410_v1 }
 0x773   : > { %3511 = vxpose.xlu0.b32.cont [5/16] (narrow) %v3463_v22, 32  ;;  %v3493_v9 = vpop.trf.xlu1 }
 0x774   : > { %3543 = vst [vmem:[%s379_s12 + $0x20] sm:$0xff] %v3493_v9 }
 0x775   : > { %v3436_v60 = vpop.f32.mrf.mxu2 }
 0x776   : > { %v3268_v32 = vpop.f32.mrf.mxu3 }
 0x777   : > { %v3412_v40 = vadd.f32 %v3411_v49, %v3268_v32 }
 0x779   : > { %v3464_v48 = vadd.f32 %v6479_v62, %v3412_v40 }
 0x77b   : > { %3512 = vxpose.xlu0.b32.cont [6/16] (narrow) %v3464_v48, 32  ;;  %v3494_v19 = vpop.trf.xlu1 }
 0x77c   : > { %3545 = vst [vmem:[%s379_s12 + $0x30] sm:$0xff] %v3494_v19 }
 0x7a4   : > { %v3130_v4 = vpop.f32.mrf.mxu0 }
 0x7ac   : > { %v3132_v43 = vpop.f32.mrf.mxu0 }
 0x7ad   : > { %v3150_v46 = vpack.c.bf16 %v3132_v43, %v3130_v4 }
 0x7af   : > { %3990 = vmatmul.msk.bf16.gmra.mxu3 %vm1723_vm1, %v3150_v46 }
 0x7b2   : > { %v3271_v5 = vpop.f32.mrf.mxu3 }
 0x7b3   : > { %v3415_v12 = vadd.f32 %v3414_v55, %v3271_v5 }
 0x7b5   : > { %v3465_v35 = vadd.f32 %v6479_v62, %v3415_v12 }
 0x7b7   : > { %3513 = vxpose.xlu0.b32.cont [7/16] (narrow) %v3465_v35, 32 }
 0x7ba   : > { %v3273_v11 = vpop.f32.mrf.mxu3 }
 0x7bb   : > { %v3417_v28 = vadd.f32 %v3416_v44, %v3273_v11 }
 0x7bd   : > { %v3466_v38 = vadd.f32 %v6479_v62, %v3417_v28 }
 0x7bf   : > { %3514 = vxpose.xlu0.b32.cont [8/16] (narrow) %v3466_v38, 32 }
 0x7c2   : > { %v3276_v7 = vpop.f32.mrf.mxu3 }
 0x7c3   : > { %v3420_v29 = vadd.f32 %v3419_v59, %v3276_v7 }
 0x7c5   : > { %v3467_v27 = vadd.f32 %v6479_v62, %v3420_v29 }
 0x7c7   : > { %3515 = vxpose.xlu0.b32.cont [9/16] (narrow) %v3467_v27, 32 }
 0x7ca   : > { %v3278_v52 = vpop.f32.mrf.mxu3 }
 0x7cb   : > { %v3422_v6 = vadd.f32 %v3421_v20, %v3278_v52 }
 0x7cd   : > { %v3468_v14 = vadd.f32 %v6479_v62, %v3422_v6 }
 0x7cf   : > { %3516 = vxpose.xlu0.b32.cont [10/16] (narrow) %v3468_v14, 32 }
 0x7d2   : > { %v3281_v21 = vpop.f32.mrf.mxu3 }
 0x7d3   : > { %v3425_v15 = vadd.f32 %v3424_v0, %v3281_v21 }
 0x7d5   : > { %v3469_v63 = vadd.f32 %v6479_v62, %v3425_v15 }
 0x7d7   : > { %3517 = vxpose.xlu0.b32.cont [11/16] (narrow) %v3469_v63, 32 }
 0x7da   : > { %v3283_v54 = vpop.f32.mrf.mxu3 }
 0x7db   : > { %v3427_v41 = vadd.f32 %v3426_v3, %v3283_v54 }
 0x7dd   : > { %v3470_v36 = vadd.f32 %v6479_v62, %v3427_v41 }
 0x7df   : > { %3518 = vxpose.xlu0.b32.cont [12/16] (narrow) %v3470_v36, 32 }
 0x7e6   : > { %v3286_v30 = vpop.f32.mrf.mxu3 }
 0x7e7   : > { %v3430_v26 = vadd.f32 %v3429_v24, %v3286_v30 }
 0x7e9   : > { %v3471_v18 = vadd.f32 %v6479_v62, %v3430_v26 }
 0x7eb   : > { %3519 = vxpose.xlu0.b32.cont [13/16] (narrow) %v3471_v18, 32 }
 0x7ee   : > { %v3288_v16 = vpop.f32.mrf.mxu3 }
 0x7ef   : > { %v3432_v23 = vadd.f32 %v3431_v45, %v3288_v16 }
 0x7f1   : > { %v3472_v10 = vadd.f32 %v6479_v62, %v3432_v23 }
 0x7f3   : > { %3520 = vxpose.xlu0.b32.cont [14/16] (narrow) %v3472_v10, 32 }
 0x832   : > { %v3291_v51 = vpop.f32.mrf.mxu3 }
 0x833   : > { %v3435_v13 = vadd.f32 %v3434_v47, %v3291_v51 }
 0x835   : > { %v3473_v33 = vadd.f32 %v6479_v62, %v3435_v13 }
 0x837   : > { %3521 = vxpose.xlu0.b32.cont [15/16] (narrow) %v3473_v33, 32 }
 0x83a   : > { %v3293_v56 = vpop.f32.mrf.mxu3 }
 0x83b   : > { %v3437_v2 = vadd.f32 %v3436_v60, %v3293_v56 }
 0x83d   : > { %v3474_v57 = vadd.f32 %v6479_v62, %v3437_v2 }
 0x83f   : > { %3522 = vxpose.xlu0.b32.end [16/16] (narrow) %v3474_v57, 32 }
 0x86b   : > { %v3523_v61 = vpop.trf.xlu0 }
 0x86c   : > { %3540 = vst [vmem:[%s379_s12 + $0x8] sm:$0xff] %v3523_v61 }
 0x873   : > { %v3524_v50 = vpop.trf.xlu0 }
 0x874   : > { %3542 = vst [vmem:[%s379_s12 + $0x18] sm:$0xff] %v3524_v50 }
 0x87b   : > { %v3525_v8 = vpop.trf.xlu0 }
 0x87c   : > { %3544 = vst [vmem:[%s379_s12 + $0x28] sm:$0xff] %v3525_v8 }
 0x883   : > { %v3526_v31 = vpop.trf.xlu0 }
 0x884   : > { %3546 = vst [vmem:[%s379_s12 + $0x38] sm:$0xff] %v3526_v31 }
 0x885 PF: > { %s20_s13 = sadd.s32 1, %s4335_s13  }
 0x886   : > { %p17_p4 = scmp.ge.s32.totalorder %s20_s13, 4  }
 0x888   :  { %19 = sbr.rel (!%p17_p4) target bundleno = 1 (0x1), region = 100 }

</bundles_post_ra>
